<compile_context>
chip_gen: v7x
topology: tpu7x:2x2x1
jax: 0.10.0
libtpu: 0.0.40
codegen_flags: <defaults>
</compile_context>

<pallas_src>
import functools

import jax
import jax.numpy as jnp
from jax.experimental import pallas as pl
from jax.experimental.pallas import tpu as pltpu


# ----------------------------------------------------------------------------
# Fused kernel: `nb` samples per grid step, unrolled sample loop.
# ----------------------------------------------------------------------------
def _ffn_kernel(x_ref, rc_ref, w_in_ref, b_in_ref, w3_ref, b3_ref,
                w5_ref, b5_ref, w_out_ref, b_out_ref, k_eca_ref,
                o_ref, cat_ref, *, nb, hidden, height, width):
    hw = height * width

    # ---- boundary predicates, hoisted once per grid step (shared by every
    # sample and every tap of both branches).
    row = rc_ref[0:1, :]                              # (1, hw) int32
    col = rc_ref[1:2, :]                              # (1, hw) int32
    row_ok = {0: None}
    col_ok = {0: None}
    for d in (1, 2):
        row_ok[d] = row < (height - d)
        row_ok[-d] = row >= d
        col_ok[d] = col < (width - d)
        col_ok[-d] = col >= d
    tap_mask = {}
    for dh in range(-2, 3):
        for dw in range(-2, 3):
            rm, cm = row_ok[dh], col_ok[dw]
            if rm is None:
                tap_mask[(dh, dw)] = cm
            elif cm is None:
                tap_mask[(dh, dw)] = rm
            else:
                tap_mask[(dh, dw)] = jnp.logical_and(rm, cm)

    # ---- weights / biases loaded once per step (not per sample / per tap).
    w_in = w_in_ref[...]                              # (2*hidden, dim) bf16
    b_in = b_in_ref[...]                              # (2*hidden, 1)   f32
    w3 = w3_ref[...]                                  # (hidden, 9)     f32
    b3 = b3_ref[...]                                  # (hidden, 1)     f32
    w5 = w5_ref[...]                                  # (hidden, 25)    f32
    b5 = b5_ref[...]                                  # (hidden, 1)     f32
    w_out = w_out_ref[...]                            # (dim, 2*hidden) bf16
    b_out = b_out_ref[...]                            # (dim, 1)        f32
    k_eca = k_eca_ref[...]                            # (dim, dim)      f32

    def dwconv_relu(src, w_taps, bias, k):
        """Depthwise k x k conv (zero pad k//2) + bias + ReLU on (hidden, hw)."""
        p = k // 2
        center = (k * k - 1) // 2
        acc = src * w_taps[:, center:center + 1]      # center tap: no mask
        for t in range(k * k):
            if t == center:
                continue
            dh = t // k - p
            dw = t % k - p
            delta = dh * width + dw                   # flat lane offset of tap
            # shifted[f] = src[f + delta]; wrap-around lanes are masked below.
            shifted = pltpu.roll(src, shift=(-delta) % hw, axis=1)
            tap = jnp.where(tap_mask[(dh, dw)], shifted, 0.0)
            acc = acc + tap * w_taps[:, t:t + 1]
        return jnp.maximum(acc + bias, 0.0)           # fused bias + ReLU

    # ---- static unrolled loop over the samples of this block.
    for j in range(nb):
        xj = x_ref[j]                                 # (dim, hw) bf16
        # project_in: bf16 MXU matmul, f32 accumulate.
        y = jnp.dot(w_in, xj, preferred_element_type=jnp.float32) + b_in
        # Both depthwise branches write one shared (2*hidden, hw) bf16 buffer
        # so project_out is a single K=2*hidden matmul.
        cat_ref[:hidden, :] = dwconv_relu(y[:hidden], w3, b3, 3).astype(jnp.bfloat16)
        cat_ref[hidden:, :] = dwconv_relu(y[hidden:], w5, b5, 5).astype(jnp.bfloat16)
        out = (jnp.dot(w_out, cat_ref[...], preferred_element_type=jnp.float32)
               + b_out)                               # (dim, hw) f32
        # ECA: pool first (linear), then tiny banded channel conv on (dim, 1),
        # sigmoid, scale.  No (dim,dim)@(dim,hw) matmul in the serial tail.
        pooled = jnp.mean(out, axis=1, keepdims=True)                # (dim, 1)
        att = jax.nn.sigmoid(
            jnp.dot(k_eca, pooled, preferred_element_type=jnp.float32))
        o_ref[j] = out * att


# ----------------------------------------------------------------------------
# Wrapper: parameter repacking + pallas_call
# ----------------------------------------------------------------------------
def feedforward_forward(x_nchw, params, *, samples_per_block=None):
    """params (PyTorch correspondence):
      w_in  (2*hidden, dim)   <- project_in.weight[:, :, 0, 0]
      b_in  (2*hidden,)       <- project_in.bias
      w3    (hidden, 3, 3)    <- dwconv3x3.weight[:, 0]
      b3    (hidden,)         <- dwconv3x3.bias
      w5    (hidden, 5, 5)    <- dwconv5x5.weight[:, 0]
      b5    (hidden,)         <- dwconv5x5.bias
      w_out (dim, 2*hidden)   <- project_out.weight[:, :, 0, 0]
      b_out (dim,)            <- project_out.bias
      w_eca (3,)              <- eca.conv[0].weight[0, 0]

    samples_per_block: samples processed per grid step.  Default = whole batch
    (one step: best on single-TC v5e/v6e).  On v7x set n//2 for a 2-TC split.
    """
    (w_in, b_in, w3, b3, w5, b5, w_out, b_out, w_eca) = params
    n, dim, height, width = x_nchw.shape
    two_hidden = w_in.shape[0]
    hidden = two_hidden // 2
    hw = height * width
    nb = n if samples_per_block is None else int(samples_per_block)
    assert n % nb == 0, (n, nb)
    num_blocks = n // nb

    # NCHW -> (N, C, H*W): free reshape (H*W on the lane axis); bf16 across the
    # boundary (it feeds a bf16 MXU matmul immediately) halves the input DMA.
    x = x_nchw.reshape(n, dim, hw).astype(jnp.bfloat16)

    # Precomputed row/col planes: no in-kernel div/mod (robust for any width).
    hw_idx = jnp.arange(hw, dtype=jnp.int32)
    rc = jnp.stack([hw_idx // width, hw_idx % width], axis=0)     # (2, hw) i32

    # Repack weights for the kernel layout.
    w_in_bf = w_in.reshape(two_hidden, dim).astype(jnp.bfloat16)
    b_in_c = b_in.reshape(two_hidden, 1).astype(jnp.float32)
    w3_taps = w3.reshape(hidden, 9).astype(jnp.float32)          # lane-dense
    w5_taps = w5.reshape(hidden, 25).astype(jnp.float32)
    b3_c = b3.reshape(hidden, 1).astype(jnp.float32)
    b5_c = b5.reshape(hidden, 1).astype(jnp.float32)
    w_out_bf = w_out.reshape(dim, two_hidden).astype(jnp.bfloat16)
    b_out_c = b_out.reshape(dim, 1).astype(jnp.float32)

    # Banded matrix of the ECA channel conv1d (kernel 3, zero padding 1):
    #   K[c, c'] = w_eca[c' - c + 1] if |c' - c| <= 1 else 0
    idx = jnp.arange(dim)
    diff = idx[None, :] - idx[:, None] + 1
    k_eca = jnp.where((diff >= 0) & (diff <= 2),
                      w_eca[jnp.clip(diff, 0, 2)], 0.0).astype(jnp.float32)

    kernel = functools.partial(_ffn_kernel, nb=nb, hidden=hidden,
                               height=height, width=width)

    operands = (x, rc, w_in_bf, b_in_c, w3_taps, b3_c, w5_taps, b5_c,
                w_out_bf, b_out_c, k_eca)
    flops = 2 * n * hw * (dim * two_hidden            # project_in
                          + hidden * (9 + 25)          # depthwise taps
                          + two_hidden * dim)          # project_out
    flops += 2 * n * dim * dim                         # ECA banded conv (tiny)
    bytes_accessed = (sum(int(a.size) * a.dtype.itemsize for a in operands)
                      + n * dim * hw * 4)

    out_flat = pl.pallas_call(
        kernel,
        out_shape=jax.ShapeDtypeStruct((n, dim, hw), jnp.float32),
        grid=(num_blocks,),
        in_specs=[
            pl.BlockSpec((nb, dim, hw), lambda b: (b, 0, 0)),       # x (bf16)
            pl.BlockSpec((2, hw), lambda b: (0, 0)),                # row/col
            pl.BlockSpec((two_hidden, dim), lambda b: (0, 0)),      # w_in bf16
            pl.BlockSpec((two_hidden, 1), lambda b: (0, 0)),        # b_in
            pl.BlockSpec((hidden, 9), lambda b: (0, 0)),            # w3 taps
            pl.BlockSpec((hidden, 1), lambda b: (0, 0)),            # b3
            pl.BlockSpec((hidden, 25), lambda b: (0, 0)),           # w5 taps
            pl.BlockSpec((hidden, 1), lambda b: (0, 0)),            # b5
            pl.BlockSpec((dim, two_hidden), lambda b: (0, 0)),      # w_out bf16
            pl.BlockSpec((dim, 1), lambda b: (0, 0)),               # b_out
            pl.BlockSpec((dim, dim), lambda b: (0, 0)),             # K_eca
        ],
        out_specs=pl.BlockSpec((nb, dim, hw), lambda b: (b, 0, 0)), # lane-dense
        scratch_shapes=[pltpu.VMEM((two_hidden, hw), jnp.bfloat16)],
        compiler_params=pltpu.CompilerParams(
            dimension_semantics=("parallel",)),
        cost_estimate=pl.CostEstimate(flops=flops, transcendentals=n * dim,
                                      bytes_accessed=bytes_accessed),
    )(*operands)

    return out_flat.reshape(n, dim, height, width)


# ----------------------------------------------------------------------------
# Pure-JAX f32 reference (for the correctness check)
# ----------------------------------------------------------------------------
def feedforward_reference(x_nchw, params):
    (w_in, b_in, w3, b3, w5, b5, w_out, b_out, w_eca) = params
    n, dim, h, w = x_nchw.shape
    hidden = w_in.shape[0] // 2
    x = x_nchw.astype(jnp.float32)

    y = jnp.einsum('oi,nihw->nohw', w_in, x) + b_in[None, :, None, None]
    y3, y5 = y[:, :hidden], y[:, hidden:]

    def dw(xx, ww, bb, k):
        p = k // 2
        out = jax.lax.conv_general_dilated(
            xx, ww.reshape(hidden, 1, k, k), window_strides=(1, 1),
            padding=[(p, p), (p, p)],
            dimension_numbers=("NCHW", "OIHW", "NCHW"),
            feature_group_count=hidden)
        return jnp.maximum(out + bb[None, :, None, None], 0.0)

    a3 = dw(y3, w3, b3, 3)
    a5 = dw(y5, w5, b5, 5)
    cat = jnp.concatenate([a3, a5], axis=1)
    out = jnp.einsum('oi,nihw->nohw', w_out, cat) + b_out[None, :, None, None]

    pooled = out.mean(axis=(2, 3))                    # (n, dim)
    pp = jnp.pad(pooled, ((0, 0), (1, 1)))
    s = w_eca[0] * pp[:, :-2] + w_eca[1] * pp[:, 1:-1] + w_eca[2] * pp[:, 2:]
    att = jax.nn.sigmoid(s)
    return out * att[:, :, None, None]


if __name__ == "__main__":
    # Module config: FeedForward(dim=8, ffn_expansion_factor=2, bias=True)
    dim = 8
    ffn_expansion_factor = 2.0
    hidden = int(dim * ffn_expansion_factor)          # 16
    n, height, width = 2, 16, 16

    key = jax.random.PRNGKey(0)
    ks = jax.random.split(key, 10)
    x = jax.random.normal(ks[0], (n, dim, height, width), jnp.float32)
    w_in = 0.1 * jax.random.normal(ks[1], (2 * hidden, dim), jnp.float32)
    b_in = 0.1 * jax.random.normal(ks[2], (2 * hidden,), jnp.float32)
    w3 = 0.1 * jax.random.normal(ks[3], (hidden, 3, 3), jnp.float32)
    b3 = 0.1 * jax.random.normal(ks[4], (hidden,), jnp.float32)
    w5 = 0.1 * jax.random.normal(ks[5], (hidden, 5, 5), jnp.float32)
    b5 = 0.1 * jax.random.normal(ks[6], (hidden,), jnp.float32)
    w_out = 0.1 * jax.random.normal(ks[7], (dim, 2 * hidden), jnp.float32)
    b_out = 0.1 * jax.random.normal(ks[8], (dim,), jnp.float32)
    w_eca = jax.random.normal(ks[9], (3,), jnp.float32)
    params = (w_in, b_in, w3, b3, w5, b5, w_out, b_out, w_eca)

    fwd = jax.jit(feedforward_forward)
    out = jax.block_until_ready(fwd(x, params))
    ref = jax.block_until_ready(feedforward_reference(x, params))

    assert out.shape == (n, dim, height, width), out.shape
    assert bool(jnp.all(jnp.isfinite(out)))
    err = float(jnp.max(jnp.abs(out - ref)))
    assert err < 2e-2, err        # headroom over bf16 input/matmul rounding

    print("KERNEL_OK")
</pallas_src>

<mosaic_0001>
module attributes {stable_mosaic.version = 11 : i64} {
  func.func @_ffn_kernel(%arg0: i32, %arg1: memref<2x8x256xbf16, #tpu.memory_space<vmem>>, %arg2: memref<2x256xi32, #tpu.memory_space<vmem>>, %arg3: memref<32x8xbf16, #tpu.memory_space<vmem>>, %arg4: memref<32x1xf32, #tpu.memory_space<vmem>>, %arg5: memref<16x9xf32, #tpu.memory_space<vmem>>, %arg6: memref<16x1xf32, #tpu.memory_space<vmem>>, %arg7: memref<16x25xf32, #tpu.memory_space<vmem>>, %arg8: memref<16x1xf32, #tpu.memory_space<vmem>>, %arg9: memref<8x32xbf16, #tpu.memory_space<vmem>>, %arg10: memref<8x1xf32, #tpu.memory_space<vmem>>, %arg11: memref<8x8xf32, #tpu.memory_space<vmem>>, %arg12: memref<2x8x256xf32, #tpu.memory_space<vmem>>, %arg13: memref<32x256xbf16, #tpu.memory_space<vmem>>) attributes {dimension_semantics = [#tpu.dimension_semantics<parallel>], iteration_bounds = array<i64: 1>, scalar_prefetch = 0 : i64, scratch_operands = 1 : i64, tpu.core_type = #tpu.core_type<tc>, window_params = [{transform_indices = @transform_0, window_bounds = array<i64: 2, 8, 256>}, {pipeline_mode = #tpu.pipeline_mode<synchronous>, transform_indices = @transform_1, window_bounds = array<i64: 2, 256>}, {pipeline_mode = #tpu.pipeline_mode<synchronous>, transform_indices = @transform_2, window_bounds = array<i64: 32, 8>}, {pipeline_mode = #tpu.pipeline_mode<synchronous>, transform_indices = @transform_3, window_bounds = array<i64: 32, 1>}, {pipeline_mode = #tpu.pipeline_mode<synchronous>, transform_indices = @transform_4, window_bounds = array<i64: 16, 9>}, {pipeline_mode = #tpu.pipeline_mode<synchronous>, transform_indices = @transform_5, window_bounds = array<i64: 16, 1>}, {pipeline_mode = #tpu.pipeline_mode<synchronous>, transform_indices = @transform_6, window_bounds = array<i64: 16, 25>}, {pipeline_mode = #tpu.pipeline_mode<synchronous>, transform_indices = @transform_7, window_bounds = array<i64: 16, 1>}, {pipeline_mode = #tpu.pipeline_mode<synchronous>, transform_indices = @transform_8, window_bounds = array<i64: 8, 32>}, {pipeline_mode = #tpu.pipeline_mode<synchronous>, transform_indices = @transform_9, window_bounds = array<i64: 8, 1>}, {pipeline_mode = #tpu.pipeline_mode<synchronous>, transform_indices = @transform_10, window_bounds = array<i64: 8, 8>}, {transform_indices = @transform_11, window_bounds = array<i64: 2, 8, 256>}]} {
    %c0 = arith.constant 0 : index
    %c0_0 = arith.constant 0 : index
    %0 = vector.load %arg2[%c0, %c0_0] : memref<2x256xi32, #tpu.memory_space<vmem>>, vector<1x256xi32>
    %c1 = arith.constant 1 : index
    %c0_1 = arith.constant 0 : index
    %1 = vector.load %arg2[%c1, %c0_1] : memref<2x256xi32, #tpu.memory_space<vmem>>, vector<1x256xi32>
    %c15_i32 = arith.constant 15 : i32
    %2 = vector.broadcast %c15_i32 : i32 to vector<1x256xi32>
    %3 = arith.cmpi slt, %0, %2 : vector<1x256xi32>
    %c1_i32 = arith.constant 1 : i32
    %4 = vector.broadcast %c1_i32 : i32 to vector<1x256xi32>
    %5 = arith.cmpi sge, %0, %4 : vector<1x256xi32>
    %c15_i32_2 = arith.constant 15 : i32
    %6 = vector.broadcast %c15_i32_2 : i32 to vector<1x256xi32>
    %7 = arith.cmpi slt, %1, %6 : vector<1x256xi32>
    %c1_i32_3 = arith.constant 1 : i32
    %8 = vector.broadcast %c1_i32_3 : i32 to vector<1x256xi32>
    %9 = arith.cmpi sge, %1, %8 : vector<1x256xi32>
    %c14_i32 = arith.constant 14 : i32
    %10 = vector.broadcast %c14_i32 : i32 to vector<1x256xi32>
    %11 = arith.cmpi slt, %0, %10 : vector<1x256xi32>
    %c2_i32 = arith.constant 2 : i32
    %12 = vector.broadcast %c2_i32 : i32 to vector<1x256xi32>
    %13 = arith.cmpi sge, %0, %12 : vector<1x256xi32>
    %c14_i32_4 = arith.constant 14 : i32
    %14 = vector.broadcast %c14_i32_4 : i32 to vector<1x256xi32>
    %15 = arith.cmpi slt, %1, %14 : vector<1x256xi32>
    %c2_i32_5 = arith.constant 2 : i32
    %16 = vector.broadcast %c2_i32_5 : i32 to vector<1x256xi32>
    %17 = arith.cmpi sge, %1, %16 : vector<1x256xi32>
    %18 = arith.andi %13, %17 : vector<1x256xi1>
    %19 = arith.andi %13, %9 : vector<1x256xi1>
    %20 = arith.andi %13, %7 : vector<1x256xi1>
    %21 = arith.andi %13, %15 : vector<1x256xi1>
    %22 = arith.andi %5, %17 : vector<1x256xi1>
    %23 = arith.andi %5, %9 : vector<1x256xi1>
    %24 = arith.andi %5, %7 : vector<1x256xi1>
    %25 = arith.andi %5, %15 : vector<1x256xi1>
    %26 = arith.andi %3, %17 : vector<1x256xi1>
    %27 = arith.andi %3, %9 : vector<1x256xi1>
    %28 = arith.andi %3, %7 : vector<1x256xi1>
    %29 = arith.andi %3, %15 : vector<1x256xi1>
    %30 = arith.andi %11, %17 : vector<1x256xi1>
    %31 = arith.andi %11, %9 : vector<1x256xi1>
    %32 = arith.andi %11, %7 : vector<1x256xi1>
    %33 = arith.andi %11, %15 : vector<1x256xi1>
    %c0_6 = arith.constant 0 : index
    %c0_7 = arith.constant 0 : index
    %34 = vector.load %arg3[%c0_6, %c0_7] : memref<32x8xbf16, #tpu.memory_space<vmem>>, vector<32x8xbf16>
    %c0_8 = arith.constant 0 : index
    %c0_9 = arith.constant 0 : index
    %35 = vector.load %arg4[%c0_8, %c0_9] : memref<32x1xf32, #tpu.memory_space<vmem>>, vector<32x1xf32>
    %c0_10 = arith.constant 0 : index
    %c0_11 = arith.constant 0 : index
    %36 = vector.load %arg5[%c0_10, %c0_11] : memref<16x9xf32, #tpu.memory_space<vmem>>, vector<16x9xf32>
    %c0_12 = arith.constant 0 : index
    %c0_13 = arith.constant 0 : index
    %37 = vector.load %arg6[%c0_12, %c0_13] : memref<16x1xf32, #tpu.memory_space<vmem>>, vector<16x1xf32>
    %c0_14 = arith.constant 0 : index
    %c0_15 = arith.constant 0 : index
    %38 = vector.load %arg7[%c0_14, %c0_15] : memref<16x25xf32, #tpu.memory_space<vmem>>, vector<16x25xf32>
    %c0_16 = arith.constant 0 : index
    %c0_17 = arith.constant 0 : index
    %39 = vector.load %arg8[%c0_16, %c0_17] : memref<16x1xf32, #tpu.memory_space<vmem>>, vector<16x1xf32>
    %c0_18 = arith.constant 0 : index
    %c0_19 = arith.constant 0 : index
    %40 = vector.load %arg9[%c0_18, %c0_19] : memref<8x32xbf16, #tpu.memory_space<vmem>>, vector<8x32xbf16>
    %c0_20 = arith.constant 0 : index
    %c0_21 = arith.constant 0 : index
    %41 = vector.load %arg10[%c0_20, %c0_21] : memref<8x1xf32, #tpu.memory_space<vmem>>, vector<8x1xf32>
    %c0_22 = arith.constant 0 : index
    %c0_23 = arith.constant 0 : index
    %42 = vector.load %arg11[%c0_22, %c0_23] : memref<8x8xf32, #tpu.memory_space<vmem>>, vector<8x8xf32>
    %c0_24 = arith.constant 0 : index
    %c0_25 = arith.constant 0 : index
    %c0_26 = arith.constant 0 : index
    %43 = vector.load %arg1[%c0_24, %c0_25, %c0_26] : memref<2x8x256xbf16, #tpu.memory_space<vmem>>, vector<1x8x256xbf16>
    %44 = vector.shape_cast %43 : vector<1x8x256xbf16> to vector<8x256xbf16>
    %cst = arith.constant dense<0.000000e+00> : vector<32x256xf32>
    %45 = tpu.matmul %34, %44, %cst {dimension_numbers = #tpu.dot_dimension_numbers<[1], [0], [0], [1], [0, 0, 1, 1], [], []>} : vector<32x8xbf16>, vector<8x256xbf16>, vector<32x256xf32> -> vector<32x256xf32>
    %46 = vector.broadcast %35 : vector<32x1xf32> to vector<32x256xf32>
    %47 = arith.addf %45, %46 : vector<32x256xf32>
    %48 = vector.extract_strided_slice %47 {offsets = [0, 0], sizes = [16, 256], strides = [1, 1]} : vector<32x256xf32> to vector<16x256xf32>
    %49 = vector.extract_strided_slice %36 {offsets = [0, 4], sizes = [16, 1], strides = [1, 1]} : vector<16x9xf32> to vector<16x1xf32>
    %50 = vector.broadcast %49 : vector<16x1xf32> to vector<16x256xf32>
    %51 = arith.mulf %48, %50 : vector<16x256xf32>
    %c17_i32 = arith.constant 17 : i32
    %52 = tpu.dynamic_rotate %48 by %c17_i32 dim 1 : vector<16x256xf32>, i32 -> vector<16x256xf32>
    %cst_27 = arith.constant 0.000000e+00 : f32
    %53 = vector.shape_cast %23 : vector<1x256xi1> to vector<1x256xi1>
    %54 = vector.broadcast %53 : vector<1x256xi1> to vector<16x256xi1>
    %55 = vector.broadcast %cst_27 : f32 to vector<16x256xf32>
    %56 = arith.select %54, %52, %55 : vector<16x256xi1>, vector<16x256xf32>
    %57 = vector.extract_strided_slice %36 {offsets = [0, 0], sizes = [16, 1], strides = [1, 1]} : vector<16x9xf32> to vector<16x1xf32>
    %58 = vector.broadcast %57 : vector<16x1xf32> to vector<16x256xf32>
    %59 = arith.mulf %56, %58 : vector<16x256xf32>
    %60 = arith.addf %51, %59 : vector<16x256xf32>
    %c16_i32 = arith.constant 16 : i32
    %61 = tpu.dynamic_rotate %48 by %c16_i32 dim 1 : vector<16x256xf32>, i32 -> vector<16x256xf32>
    %cst_28 = arith.constant 0.000000e+00 : f32
    %62 = vector.shape_cast %5 : vector<1x256xi1> to vector<1x256xi1>
    %63 = vector.broadcast %62 : vector<1x256xi1> to vector<16x256xi1>
    %64 = vector.broadcast %cst_28 : f32 to vector<16x256xf32>
    %65 = arith.select %63, %61, %64 : vector<16x256xi1>, vector<16x256xf32>
    %66 = vector.extract_strided_slice %36 {offsets = [0, 1], sizes = [16, 1], strides = [1, 1]} : vector<16x9xf32> to vector<16x1xf32>
    %67 = vector.broadcast %66 : vector<16x1xf32> to vector<16x256xf32>
    %68 = arith.mulf %65, %67 : vector<16x256xf32>
    %69 = arith.addf %60, %68 : vector<16x256xf32>
    %c15_i32_29 = arith.constant 15 : i32
    %70 = tpu.dynamic_rotate %48 by %c15_i32_29 dim 1 : vector<16x256xf32>, i32 -> vector<16x256xf32>
    %cst_30 = arith.constant 0.000000e+00 : f32
    %71 = vector.shape_cast %24 : vector<1x256xi1> to vector<1x256xi1>
    %72 = vector.broadcast %71 : vector<1x256xi1> to vector<16x256xi1>
    %73 = vector.broadcast %cst_30 : f32 to vector<16x256xf32>
    %74 = arith.select %72, %70, %73 : vector<16x256xi1>, vector<16x256xf32>
    %75 = vector.extract_strided_slice %36 {offsets = [0, 2], sizes = [16, 1], strides = [1, 1]} : vector<16x9xf32> to vector<16x1xf32>
    %76 = vector.broadcast %75 : vector<16x1xf32> to vector<16x256xf32>
    %77 = arith.mulf %74, %76 : vector<16x256xf32>
    %78 = arith.addf %69, %77 : vector<16x256xf32>
    %c1_i32_31 = arith.constant 1 : i32
    %79 = tpu.dynamic_rotate %48 by %c1_i32_31 dim 1 : vector<16x256xf32>, i32 -> vector<16x256xf32>
    %cst_32 = arith.constant 0.000000e+00 : f32
    %80 = vector.shape_cast %9 : vector<1x256xi1> to vector<1x256xi1>
    %81 = vector.broadcast %80 : vector<1x256xi1> to vector<16x256xi1>
    %82 = vector.broadcast %cst_32 : f32 to vector<16x256xf32>
    %83 = arith.select %81, %79, %82 : vector<16x256xi1>, vector<16x256xf32>
    %84 = vector.extract_strided_slice %36 {offsets = [0, 3], sizes = [16, 1], strides = [1, 1]} : vector<16x9xf32> to vector<16x1xf32>
    %85 = vector.broadcast %84 : vector<16x1xf32> to vector<16x256xf32>
    %86 = arith.mulf %83, %85 : vector<16x256xf32>
    %87 = arith.addf %78, %86 : vector<16x256xf32>
    %c255_i32 = arith.constant 255 : i32
    %88 = tpu.dynamic_rotate %48 by %c255_i32 dim 1 : vector<16x256xf32>, i32 -> vector<16x256xf32>
    %cst_33 = arith.constant 0.000000e+00 : f32
    %89 = vector.shape_cast %7 : vector<1x256xi1> to vector<1x256xi1>
    %90 = vector.broadcast %89 : vector<1x256xi1> to vector<16x256xi1>
    %91 = vector.broadcast %cst_33 : f32 to vector<16x256xf32>
    %92 = arith.select %90, %88, %91 : vector<16x256xi1>, vector<16x256xf32>
    %93 = vector.extract_strided_slice %36 {offsets = [0, 5], sizes = [16, 1], strides = [1, 1]} : vector<16x9xf32> to vector<16x1xf32>
    %94 = vector.broadcast %93 : vector<16x1xf32> to vector<16x256xf32>
    %95 = arith.mulf %92, %94 : vector<16x256xf32>
    %96 = arith.addf %87, %95 : vector<16x256xf32>
    %c241_i32 = arith.constant 241 : i32
    %97 = tpu.dynamic_rotate %48 by %c241_i32 dim 1 : vector<16x256xf32>, i32 -> vector<16x256xf32>
    %cst_34 = arith.constant 0.000000e+00 : f32
    %98 = vector.shape_cast %27 : vector<1x256xi1> to vector<1x256xi1>
    %99 = vector.broadcast %98 : vector<1x256xi1> to vector<16x256xi1>
    %100 = vector.broadcast %cst_34 : f32 to vector<16x256xf32>
    %101 = arith.select %99, %97, %100 : vector<16x256xi1>, vector<16x256xf32>
    %102 = vector.extract_strided_slice %36 {offsets = [0, 6], sizes = [16, 1], strides = [1, 1]} : vector<16x9xf32> to vector<16x1xf32>
    %103 = vector.broadcast %102 : vector<16x1xf32> to vector<16x256xf32>
    %104 = arith.mulf %101, %103 : vector<16x256xf32>
    %105 = arith.addf %96, %104 : vector<16x256xf32>
    %c240_i32 = arith.constant 240 : i32
    %106 = tpu.dynamic_rotate %48 by %c240_i32 dim 1 : vector<16x256xf32>, i32 -> vector<16x256xf32>
    %cst_35 = arith.constant 0.000000e+00 : f32
    %107 = vector.shape_cast %3 : vector<1x256xi1> to vector<1x256xi1>
    %108 = vector.broadcast %107 : vector<1x256xi1> to vector<16x256xi1>
    %109 = vector.broadcast %cst_35 : f32 to vector<16x256xf32>
    %110 = arith.select %108, %106, %109 : vector<16x256xi1>, vector<16x256xf32>
    %111 = vector.extract_strided_slice %36 {offsets = [0, 7], sizes = [16, 1], strides = [1, 1]} : vector<16x9xf32> to vector<16x1xf32>
    %112 = vector.broadcast %111 : vector<16x1xf32> to vector<16x256xf32>
    %113 = arith.mulf %110, %112 : vector<16x256xf32>
    %114 = arith.addf %105, %113 : vector<16x256xf32>
    %c239_i32 = arith.constant 239 : i32
    %115 = tpu.dynamic_rotate %48 by %c239_i32 dim 1 : vector<16x256xf32>, i32 -> vector<16x256xf32>
    %cst_36 = arith.constant 0.000000e+00 : f32
    %116 = vector.shape_cast %28 : vector<1x256xi1> to vector<1x256xi1>
    %117 = vector.broadcast %116 : vector<1x256xi1> to vector<16x256xi1>
    %118 = vector.broadcast %cst_36 : f32 to vector<16x256xf32>
    %119 = arith.select %117, %115, %118 : vector<16x256xi1>, vector<16x256xf32>
    %120 = vector.extract_strided_slice %36 {offsets = [0, 8], sizes = [16, 1], strides = [1, 1]} : vector<16x9xf32> to vector<16x1xf32>
    %121 = vector.broadcast %120 : vector<16x1xf32> to vector<16x256xf32>
    %122 = arith.mulf %119, %121 : vector<16x256xf32>
    %123 = arith.addf %114, %122 : vector<16x256xf32>
    %124 = vector.broadcast %37 : vector<16x1xf32> to vector<16x256xf32>
    %125 = arith.addf %123, %124 : vector<16x256xf32>
    %cst_37 = arith.constant 0.000000e+00 : f32
    %126 = vector.broadcast %cst_37 : f32 to vector<16x256xf32>
    %127 = arith.maximumf %125, %126 : vector<16x256xf32>
    %128 = arith.truncf %127 : vector<16x256xf32> to vector<16x256xbf16>
    %c0_38 = arith.constant 0 : index
    %c0_39 = arith.constant 0 : index
    %129 = vector.load %arg13[%c0_38, %c0_39] : memref<32x256xbf16, #tpu.memory_space<vmem>>, vector<16x256xbf16>
    tpu.vector_store %arg13[%c0_38, %c0_39], %128 {strides = array<i32>} : memref<32x256xbf16, #tpu.memory_space<vmem>>, vector<16x256xbf16>,
    %130 = vector.extract_strided_slice %47 {offsets = [16, 0], sizes = [16, 256], strides = [1, 1]} : vector<32x256xf32> to vector<16x256xf32>
    %131 = vector.extract_strided_slice %38 {offsets = [0, 12], sizes = [16, 1], strides = [1, 1]} : vector<16x25xf32> to vector<16x1xf32>
    %132 = vector.broadcast %131 : vector<16x1xf32> to vector<16x256xf32>
    %133 = arith.mulf %130, %132 : vector<16x256xf32>
    %c34_i32 = arith.constant 34 : i32
    %134 = tpu.dynamic_rotate %130 by %c34_i32 dim 1 : vector<16x256xf32>, i32 -> vector<16x256xf32>
    %cst_40 = arith.constant 0.000000e+00 : f32
    %135 = vector.shape_cast %18 : vector<1x256xi1> to vector<1x256xi1>
    %136 = vector.broadcast %135 : vector<1x256xi1> to vector<16x256xi1>
    %137 = vector.broadcast %cst_40 : f32 to vector<16x256xf32>
    %138 = arith.select %136, %134, %137 : vector<16x256xi1>, vector<16x256xf32>
    %139 = vector.extract_strided_slice %38 {offsets = [0, 0], sizes = [16, 1], strides = [1, 1]} : vector<16x25xf32> to vector<16x1xf32>
    %140 = vector.broadcast %139 : vector<16x1xf32> to vector<16x256xf32>
    %141 = arith.mulf %138, %140 : vector<16x256xf32>
    %142 = arith.addf %133, %141 : vector<16x256xf32>
    %c33_i32 = arith.constant 33 : i32
    %143 = tpu.dynamic_rotate %130 by %c33_i32 dim 1 : vector<16x256xf32>, i32 -> vector<16x256xf32>
    %cst_41 = arith.constant 0.000000e+00 : f32
    %144 = vector.shape_cast %19 : vector<1x256xi1> to vector<1x256xi1>
    %145 = vector.broadcast %144 : vector<1x256xi1> to vector<16x256xi1>
    %146 = vector.broadcast %cst_41 : f32 to vector<16x256xf32>
    %147 = arith.select %145, %143, %146 : vector<16x256xi1>, vector<16x256xf32>
    %148 = vector.extract_strided_slice %38 {offsets = [0, 1], sizes = [16, 1], strides = [1, 1]} : vector<16x25xf32> to vector<16x1xf32>
    %149 = vector.broadcast %148 : vector<16x1xf32> to vector<16x256xf32>
    %150 = arith.mulf %147, %149 : vector<16x256xf32>
    %151 = arith.addf %142, %150 : vector<16x256xf32>
    %c32_i32 = arith.constant 32 : i32
    %152 = tpu.dynamic_rotate %130 by %c32_i32 dim 1 : vector<16x256xf32>, i32 -> vector<16x256xf32>
    %cst_42 = arith.constant 0.000000e+00 : f32
    %153 = vector.shape_cast %13 : vector<1x256xi1> to vector<1x256xi1>
    %154 = vector.broadcast %153 : vector<1x256xi1> to vector<16x256xi1>
    %155 = vector.broadcast %cst_42 : f32 to vector<16x256xf32>
    %156 = arith.select %154, %152, %155 : vector<16x256xi1>, vector<16x256xf32>
    %157 = vector.extract_strided_slice %38 {offsets = [0, 2], sizes = [16, 1], strides = [1, 1]} : vector<16x25xf32> to vector<16x1xf32>
    %158 = vector.broadcast %157 : vector<16x1xf32> to vector<16x256xf32>
    %159 = arith.mulf %156, %158 : vector<16x256xf32>
    %160 = arith.addf %151, %159 : vector<16x256xf32>
    %c31_i32 = arith.constant 31 : i32
    %161 = tpu.dynamic_rotate %130 by %c31_i32 dim 1 : vector<16x256xf32>, i32 -> vector<16x256xf32>
    %cst_43 = arith.constant 0.000000e+00 : f32
    %162 = vector.shape_cast %20 : vector<1x256xi1> to vector<1x256xi1>
    %163 = vector.broadcast %162 : vector<1x256xi1> to vector<16x256xi1>
    %164 = vector.broadcast %cst_43 : f32 to vector<16x256xf32>
    %165 = arith.select %163, %161, %164 : vector<16x256xi1>, vector<16x256xf32>
    %166 = vector.extract_strided_slice %38 {offsets = [0, 3], sizes = [16, 1], strides = [1, 1]} : vector<16x25xf32> to vector<16x1xf32>
    %167 = vector.broadcast %166 : vector<16x1xf32> to vector<16x256xf32>
    %168 = arith.mulf %165, %167 : vector<16x256xf32>
    %169 = arith.addf %160, %168 : vector<16x256xf32>
    %c30_i32 = arith.constant 30 : i32
    %170 = tpu.dynamic_rotate %130 by %c30_i32 dim 1 : vector<16x256xf32>, i32 -> vector<16x256xf32>
    %cst_44 = arith.constant 0.000000e+00 : f32
    %171 = vector.shape_cast %21 : vector<1x256xi1> to vector<1x256xi1>
    %172 = vector.broadcast %171 : vector<1x256xi1> to vector<16x256xi1>
    %173 = vector.broadcast %cst_44 : f32 to vector<16x256xf32>
    %174 = arith.select %172, %170, %173 : vector<16x256xi1>, vector<16x256xf32>
    %175 = vector.extract_strided_slice %38 {offsets = [0, 4], sizes = [16, 1], strides = [1, 1]} : vector<16x25xf32> to vector<16x1xf32>
    %176 = vector.broadcast %175 : vector<16x1xf32> to vector<16x256xf32>
    %177 = arith.mulf %174, %176 : vector<16x256xf32>
    %178 = arith.addf %169, %177 : vector<16x256xf32>
    %c18_i32 = arith.constant 18 : i32
    %179 = tpu.dynamic_rotate %130 by %c18_i32 dim 1 : vector<16x256xf32>, i32 -> vector<16x256xf32>
    %cst_45 = arith.constant 0.000000e+00 : f32
    %180 = vector.shape_cast %22 : vector<1x256xi1> to vector<1x256xi1>
    %181 = vector.broadcast %180 : vector<1x256xi1> to vector<16x256xi1>
    %182 = vector.broadcast %cst_45 : f32 to vector<16x256xf32>
    %183 = arith.select %181, %179, %182 : vector<16x256xi1>, vector<16x256xf32>
    %184 = vector.extract_strided_slice %38 {offsets = [0, 5], sizes = [16, 1], strides = [1, 1]} : vector<16x25xf32> to vector<16x1xf32>
    %185 = vector.broadcast %184 : vector<16x1xf32> to vector<16x256xf32>
    %186 = arith.mulf %183, %185 : vector<16x256xf32>
    %187 = arith.addf %178, %186 : vector<16x256xf32>
    %c17_i32_46 = arith.constant 17 : i32
    %188 = tpu.dynamic_rotate %130 by %c17_i32_46 dim 1 : vector<16x256xf32>, i32 -> vector<16x256xf32>
    %cst_47 = arith.constant 0.000000e+00 : f32
    %189 = vector.shape_cast %23 : vector<1x256xi1> to vector<1x256xi1>
    %190 = vector.broadcast %189 : vector<1x256xi1> to vector<16x256xi1>
    %191 = vector.broadcast %cst_47 : f32 to vector<16x256xf32>
    %192 = arith.select %190, %188, %191 : vector<16x256xi1>, vector<16x256xf32>
    %193 = vector.extract_strided_slice %38 {offsets = [0, 6], sizes = [16, 1], strides = [1, 1]} : vector<16x25xf32> to vector<16x1xf32>
    %194 = vector.broadcast %193 : vector<16x1xf32> to vector<16x256xf32>
    %195 = arith.mulf %192, %194 : vector<16x256xf32>
    %196 = arith.addf %187, %195 : vector<16x256xf32>
    %c16_i32_48 = arith.constant 16 : i32
    %197 = tpu.dynamic_rotate %130 by %c16_i32_48 dim 1 : vector<16x256xf32>, i32 -> vector<16x256xf32>
    %cst_49 = arith.constant 0.000000e+00 : f32
    %198 = vector.shape_cast %5 : vector<1x256xi1> to vector<1x256xi1>
    %199 = vector.broadcast %198 : vector<1x256xi1> to vector<16x256xi1>
    %200 = vector.broadcast %cst_49 : f32 to vector<16x256xf32>
    %201 = arith.select %199, %197, %200 : vector<16x256xi1>, vector<16x256xf32>
    %202 = vector.extract_strided_slice %38 {offsets = [0, 7], sizes = [16, 1], strides = [1, 1]} : vector<16x25xf32> to vector<16x1xf32>
    %203 = vector.broadcast %202 : vector<16x1xf32> to vector<16x256xf32>
    %204 = arith.mulf %201, %203 : vector<16x256xf32>
    %205 = arith.addf %196, %204 : vector<16x256xf32>
    %c15_i32_50 = arith.constant 15 : i32
    %206 = tpu.dynamic_rotate %130 by %c15_i32_50 dim 1 : vector<16x256xf32>, i32 -> vector<16x256xf32>
    %cst_51 = arith.constant 0.000000e+00 : f32
    %207 = vector.shape_cast %24 : vector<1x256xi1> to vector<1x256xi1>
    %208 = vector.broadcast %207 : vector<1x256xi1> to vector<16x256xi1>
    %209 = vector.broadcast %cst_51 : f32 to vector<16x256xf32>
    %210 = arith.select %208, %206, %209 : vector<16x256xi1>, vector<16x256xf32>
    %211 = vector.extract_strided_slice %38 {offsets = [0, 8], sizes = [16, 1], strides = [1, 1]} : vector<16x25xf32> to vector<16x1xf32>
    %212 = vector.broadcast %211 : vector<16x1xf32> to vector<16x256xf32>
    %213 = arith.mulf %210, %212 : vector<16x256xf32>
    %214 = arith.addf %205, %213 : vector<16x256xf32>
    %c14_i32_52 = arith.constant 14 : i32
    %215 = tpu.dynamic_rotate %130 by %c14_i32_52 dim 1 : vector<16x256xf32>, i32 -> vector<16x256xf32>
    %cst_53 = arith.constant 0.000000e+00 : f32
    %216 = vector.shape_cast %25 : vector<1x256xi1> to vector<1x256xi1>
    %217 = vector.broadcast %216 : vector<1x256xi1> to vector<16x256xi1>
    %218 = vector.broadcast %cst_53 : f32 to vector<16x256xf32>
    %219 = arith.select %217, %215, %218 : vector<16x256xi1>, vector<16x256xf32>
    %220 = vector.extract_strided_slice %38 {offsets = [0, 9], sizes = [16, 1], strides = [1, 1]} : vector<16x25xf32> to vector<16x1xf32>
    %221 = vector.broadcast %220 : vector<16x1xf32> to vector<16x256xf32>
    %222 = arith.mulf %219, %221 : vector<16x256xf32>
    %223 = arith.addf %214, %222 : vector<16x256xf32>
    %c2_i32_54 = arith.constant 2 : i32
    %224 = tpu.dynamic_rotate %130 by %c2_i32_54 dim 1 : vector<16x256xf32>, i32 -> vector<16x256xf32>
    %cst_55 = arith.constant 0.000000e+00 : f32
    %225 = vector.shape_cast %17 : vector<1x256xi1> to vector<1x256xi1>
    %226 = vector.broadcast %225 : vector<1x256xi1> to vector<16x256xi1>
    %227 = vector.broadcast %cst_55 : f32 to vector<16x256xf32>
    %228 = arith.select %226, %224, %227 : vector<16x256xi1>, vector<16x256xf32>
    %229 = vector.extract_strided_slice %38 {offsets = [0, 10], sizes = [16, 1], strides = [1, 1]} : vector<16x25xf32> to vector<16x1xf32>
    %230 = vector.broadcast %229 : vector<16x1xf32> to vector<16x256xf32>
    %231 = arith.mulf %228, %230 : vector<16x256xf32>
    %232 = arith.addf %223, %231 : vector<16x256xf32>
    %c1_i32_56 = arith.constant 1 : i32
    %233 = tpu.dynamic_rotate %130 by %c1_i32_56 dim 1 : vector<16x256xf32>, i32 -> vector<16x256xf32>
    %cst_57 = arith.constant 0.000000e+00 : f32
    %234 = vector.shape_cast %9 : vector<1x256xi1> to vector<1x256xi1>
    %235 = vector.broadcast %234 : vector<1x256xi1> to vector<16x256xi1>
    %236 = vector.broadcast %cst_57 : f32 to vector<16x256xf32>
    %237 = arith.select %235, %233, %236 : vector<16x256xi1>, vector<16x256xf32>
    %238 = vector.extract_strided_slice %38 {offsets = [0, 11], sizes = [16, 1], strides = [1, 1]} : vector<16x25xf32> to vector<16x1xf32>
    %239 = vector.broadcast %238 : vector<16x1xf32> to vector<16x256xf32>
    %240 = arith.mulf %237, %239 : vector<16x256xf32>
    %241 = arith.addf %232, %240 : vector<16x256xf32>
    %c255_i32_58 = arith.constant 255 : i32
    %242 = tpu.dynamic_rotate %130 by %c255_i32_58 dim 1 : vector<16x256xf32>, i32 -> vector<16x256xf32>
    %cst_59 = arith.constant 0.000000e+00 : f32
    %243 = vector.shape_cast %7 : vector<1x256xi1> to vector<1x256xi1>
    %244 = vector.broadcast %243 : vector<1x256xi1> to vector<16x256xi1>
    %245 = vector.broadcast %cst_59 : f32 to vector<16x256xf32>
    %246 = arith.select %244, %242, %245 : vector<16x256xi1>, vector<16x256xf32>
    %247 = vector.extract_strided_slice %38 {offsets = [0, 13], sizes = [16, 1], strides = [1, 1]} : vector<16x25xf32> to vector<16x1xf32>
    %248 = vector.broadcast %247 : vector<16x1xf32> to vector<16x256xf32>
    %249 = arith.mulf %246, %248 : vector<16x256xf32>
    %250 = arith.addf %241, %249 : vector<16x256xf32>
    %c254_i32 = arith.constant 254 : i32
    %251 = tpu.dynamic_rotate %130 by %c254_i32 dim 1 : vector<16x256xf32>, i32 -> vector<16x256xf32>
    %cst_60 = arith.constant 0.000000e+00 : f32
    %252 = vector.shape_cast %15 : vector<1x256xi1> to vector<1x256xi1>
    %253 = vector.broadcast %252 : vector<1x256xi1> to vector<16x256xi1>
    %254 = vector.broadcast %cst_60 : f32 to vector<16x256xf32>
    %255 = arith.select %253, %251, %254 : vector<16x256xi1>, vector<16x256xf32>
    %256 = vector.extract_strided_slice %38 {offsets = [0, 14], sizes = [16, 1], strides = [1, 1]} : vector<16x25xf32> to vector<16x1xf32>
    %257 = vector.broadcast %256 : vector<16x1xf32> to vector<16x256xf32>
    %258 = arith.mulf %255, %257 : vector<16x256xf32>
    %259 = arith.addf %250, %258 : vector<16x256xf32>
    %c242_i32 = arith.constant 242 : i32
    %260 = tpu.dynamic_rotate %130 by %c242_i32 dim 1 : vector<16x256xf32>, i32 -> vector<16x256xf32>
    %cst_61 = arith.constant 0.000000e+00 : f32
    %261 = vector.shape_cast %26 : vector<1x256xi1> to vector<1x256xi1>
    %262 = vector.broadcast %261 : vector<1x256xi1> to vector<16x256xi1>
    %263 = vector.broadcast %cst_61 : f32 to vector<16x256xf32>
    %264 = arith.select %262, %260, %263 : vector<16x256xi1>, vector<16x256xf32>
    %265 = vector.extract_strided_slice %38 {offsets = [0, 15], sizes = [16, 1], strides = [1, 1]} : vector<16x25xf32> to vector<16x1xf32>
    %266 = vector.broadcast %265 : vector<16x1xf32> to vector<16x256xf32>
    %267 = arith.mulf %264, %266 : vector<16x256xf32>
    %268 = arith.addf %259, %267 : vector<16x256xf32>
    %c241_i32_62 = arith.constant 241 : i32
    %269 = tpu.dynamic_rotate %130 by %c241_i32_62 dim 1 : vector<16x256xf32>, i32 -> vector<16x256xf32>
    %cst_63 = arith.constant 0.000000e+00 : f32
    %270 = vector.shape_cast %27 : vector<1x256xi1> to vector<1x256xi1>
    %271 = vector.broadcast %270 : vector<1x256xi1> to vector<16x256xi1>
    %272 = vector.broadcast %cst_63 : f32 to vector<16x256xf32>
    %273 = arith.select %271, %269, %272 : vector<16x256xi1>, vector<16x256xf32>
    %274 = vector.extract_strided_slice %38 {offsets = [0, 16], sizes = [16, 1], strides = [1, 1]} : vector<16x25xf32> to vector<16x1xf32>
    %275 = vector.broadcast %274 : vector<16x1xf32> to vector<16x256xf32>
    %276 = arith.mulf %273, %275 : vector<16x256xf32>
    %277 = arith.addf %268, %276 : vector<16x256xf32>
    %c240_i32_64 = arith.constant 240 : i32
    %278 = tpu.dynamic_rotate %130 by %c240_i32_64 dim 1 : vector<16x256xf32>, i32 -> vector<16x256xf32>
    %cst_65 = arith.constant 0.000000e+00 : f32
    %279 = vector.shape_cast %3 : vector<1x256xi1> to vector<1x256xi1>
    %280 = vector.broadcast %279 : vector<1x256xi1> to vector<16x256xi1>
    %281 = vector.broadcast %cst_65 : f32 to vector<16x256xf32>
    %282 = arith.select %280, %278, %281 : vector<16x256xi1>, vector<16x256xf32>
    %283 = vector.extract_strided_slice %38 {offsets = [0, 17], sizes = [16, 1], strides = [1, 1]} : vector<16x25xf32> to vector<16x1xf32>
    %284 = vector.broadcast %283 : vector<16x1xf32> to vector<16x256xf32>
    %285 = arith.mulf %282, %284 : vector<16x256xf32>
    %286 = arith.addf %277, %285 : vector<16x256xf32>
    %c239_i32_66 = arith.constant 239 : i32
    %287 = tpu.dynamic_rotate %130 by %c239_i32_66 dim 1 : vector<16x256xf32>, i32 -> vector<16x256xf32>
    %cst_67 = arith.constant 0.000000e+00 : f32
    %288 = vector.shape_cast %28 : vector<1x256xi1> to vector<1x256xi1>
    %289 = vector.broadcast %288 : vector<1x256xi1> to vector<16x256xi1>
    %290 = vector.broadcast %cst_67 : f32 to vector<16x256xf32>
    %291 = arith.select %289, %287, %290 : vector<16x256xi1>, vector<16x256xf32>
    %292 = vector.extract_strided_slice %38 {offsets = [0, 18], sizes = [16, 1], strides = [1, 1]} : vector<16x25xf32> to vector<16x1xf32>
    %293 = vector.broadcast %292 : vector<16x1xf32> to vector<16x256xf32>
    %294 = arith.mulf %291, %293 : vector<16x256xf32>
    %295 = arith.addf %286, %294 : vector<16x256xf32>
    %c238_i32 = arith.constant 238 : i32
    %296 = tpu.dynamic_rotate %130 by %c238_i32 dim 1 : vector<16x256xf32>, i32 -> vector<16x256xf32>
    %cst_68 = arith.constant 0.000000e+00 : f32
    %297 = vector.shape_cast %29 : vector<1x256xi1> to vector<1x256xi1>
    %298 = vector.broadcast %297 : vector<1x256xi1> to vector<16x256xi1>
    %299 = vector.broadcast %cst_68 : f32 to vector<16x256xf32>
    %300 = arith.select %298, %296, %299 : vector<16x256xi1>, vector<16x256xf32>
    %301 = vector.extract_strided_slice %38 {offsets = [0, 19], sizes = [16, 1], strides = [1, 1]} : vector<16x25xf32> to vector<16x1xf32>
    %302 = vector.broadcast %301 : vector<16x1xf32> to vector<16x256xf32>
    %303 = arith.mulf %300, %302 : vector<16x256xf32>
    %304 = arith.addf %295, %303 : vector<16x256xf32>
    %c226_i32 = arith.constant 226 : i32
    %305 = tpu.dynamic_rotate %130 by %c226_i32 dim 1 : vector<16x256xf32>, i32 -> vector<16x256xf32>
    %cst_69 = arith.constant 0.000000e+00 : f32
    %306 = vector.shape_cast %30 : vector<1x256xi1> to vector<1x256xi1>
    %307 = vector.broadcast %306 : vector<1x256xi1> to vector<16x256xi1>
    %308 = vector.broadcast %cst_69 : f32 to vector<16x256xf32>
    %309 = arith.select %307, %305, %308 : vector<16x256xi1>, vector<16x256xf32>
    %310 = vector.extract_strided_slice %38 {offsets = [0, 20], sizes = [16, 1], strides = [1, 1]} : vector<16x25xf32> to vector<16x1xf32>
    %311 = vector.broadcast %310 : vector<16x1xf32> to vector<16x256xf32>
    %312 = arith.mulf %309, %311 : vector<16x256xf32>
    %313 = arith.addf %304, %312 : vector<16x256xf32>
    %c225_i32 = arith.constant 225 : i32
    %314 = tpu.dynamic_rotate %130 by %c225_i32 dim 1 : vector<16x256xf32>, i32 -> vector<16x256xf32>
    %cst_70 = arith.constant 0.000000e+00 : f32
    %315 = vector.shape_cast %31 : vector<1x256xi1> to vector<1x256xi1>
    %316 = vector.broadcast %315 : vector<1x256xi1> to vector<16x256xi1>
    %317 = vector.broadcast %cst_70 : f32 to vector<16x256xf32>
    %318 = arith.select %316, %314, %317 : vector<16x256xi1>, vector<16x256xf32>
    %319 = vector.extract_strided_slice %38 {offsets = [0, 21], sizes = [16, 1], strides = [1, 1]} : vector<16x25xf32> to vector<16x1xf32>
    %320 = vector.broadcast %319 : vector<16x1xf32> to vector<16x256xf32>
    %321 = arith.mulf %318, %320 : vector<16x256xf32>
    %322 = arith.addf %313, %321 : vector<16x256xf32>
    %c224_i32 = arith.constant 224 : i32
    %323 = tpu.dynamic_rotate %130 by %c224_i32 dim 1 : vector<16x256xf32>, i32 -> vector<16x256xf32>
    %cst_71 = arith.constant 0.000000e+00 : f32
    %324 = vector.shape_cast %11 : vector<1x256xi1> to vector<1x256xi1>
    %325 = vector.broadcast %324 : vector<1x256xi1> to vector<16x256xi1>
    %326 = vector.broadcast %cst_71 : f32 to vector<16x256xf32>
    %327 = arith.select %325, %323, %326 : vector<16x256xi1>, vector<16x256xf32>
    %328 = vector.extract_strided_slice %38 {offsets = [0, 22], sizes = [16, 1], strides = [1, 1]} : vector<16x25xf32> to vector<16x1xf32>
    %329 = vector.broadcast %328 : vector<16x1xf32> to vector<16x256xf32>
    %330 = arith.mulf %327, %329 : vector<16x256xf32>
    %331 = arith.addf %322, %330 : vector<16x256xf32>
    %c223_i32 = arith.constant 223 : i32
    %332 = tpu.dynamic_rotate %130 by %c223_i32 dim 1 : vector<16x256xf32>, i32 -> vector<16x256xf32>
    %cst_72 = arith.constant 0.000000e+00 : f32
    %333 = vector.shape_cast %32 : vector<1x256xi1> to vector<1x256xi1>
    %334 = vector.broadcast %333 : vector<1x256xi1> to vector<16x256xi1>
    %335 = vector.broadcast %cst_72 : f32 to vector<16x256xf32>
    %336 = arith.select %334, %332, %335 : vector<16x256xi1>, vector<16x256xf32>
    %337 = vector.extract_strided_slice %38 {offsets = [0, 23], sizes = [16, 1], strides = [1, 1]} : vector<16x25xf32> to vector<16x1xf32>
    %338 = vector.broadcast %337 : vector<16x1xf32> to vector<16x256xf32>
    %339 = arith.mulf %336, %338 : vector<16x256xf32>
    %340 = arith.addf %331, %339 : vector<16x256xf32>
    %c222_i32 = arith.constant 222 : i32
    %341 = tpu.dynamic_rotate %130 by %c222_i32 dim 1 : vector<16x256xf32>, i32 -> vector<16x256xf32>
    %cst_73 = arith.constant 0.000000e+00 : f32
    %342 = vector.shape_cast %33 : vector<1x256xi1> to vector<1x256xi1>
    %343 = vector.broadcast %342 : vector<1x256xi1> to vector<16x256xi1>
    %344 = vector.broadcast %cst_73 : f32 to vector<16x256xf32>
    %345 = arith.select %343, %341, %344 : vector<16x256xi1>, vector<16x256xf32>
    %346 = vector.extract_strided_slice %38 {offsets = [0, 24], sizes = [16, 1], strides = [1, 1]} : vector<16x25xf32> to vector<16x1xf32>
    %347 = vector.broadcast %346 : vector<16x1xf32> to vector<16x256xf32>
    %348 = arith.mulf %345, %347 : vector<16x256xf32>
    %349 = arith.addf %340, %348 : vector<16x256xf32>
    %350 = vector.broadcast %39 : vector<16x1xf32> to vector<16x256xf32>
    %351 = arith.addf %349, %350 : vector<16x256xf32>
    %cst_74 = arith.constant 0.000000e+00 : f32
    %352 = vector.broadcast %cst_74 : f32 to vector<16x256xf32>
    %353 = arith.maximumf %351, %352 : vector<16x256xf32>
    %354 = arith.truncf %353 : vector<16x256xf32> to vector<16x256xbf16>
    %c16 = arith.constant 16 : index
    %c0_75 = arith.constant 0 : index
    %355 = vector.load %arg13[%c16, %c0_75] : memref<32x256xbf16, #tpu.memory_space<vmem>>, vector<16x256xbf16>
    tpu.vector_store %arg13[%c16, %c0_75], %354 {strides = array<i32>} : memref<32x256xbf16, #tpu.memory_space<vmem>>, vector<16x256xbf16>,
    %c0_76 = arith.constant 0 : index
    %c0_77 = arith.constant 0 : index
    %356 = vector.load %arg13[%c0_76, %c0_77] : memref<32x256xbf16, #tpu.memory_space<vmem>>, vector<32x256xbf16>
    %cst_78 = arith.constant dense<0.000000e+00> : vector<8x256xf32>
    %357 = tpu.matmul %40, %356, %cst_78 {dimension_numbers = #tpu.dot_dimension_numbers<[1], [0], [0], [1], [0, 0, 1, 1], [], []>} : vector<8x32xbf16>, vector<32x256xbf16>, vector<8x256xf32> -> vector<8x256xf32>
    %358 = vector.broadcast %41 : vector<8x1xf32> to vector<8x256xf32>
    %359 = arith.addf %357, %358 : vector<8x256xf32>
    %cst_79 = arith.constant dense<0.000000e+00> : vector<8xf32>
    %360 = vector.multi_reduction <add>, %359, %cst_79 [1] : vector<8x256xf32> to vector<8xf32>
    %361 = vector.shape_cast %360 : vector<8xf32> to vector<8x1xf32>
    %cst_80 = arith.constant 2.560000e+02 : f32
    %362 = vector.broadcast %cst_80 : f32 to vector<8x1xf32>
    %363 = arith.divf %361, %362 : vector<8x1xf32>
    %cst_81 = arith.constant dense<0.000000e+00> : vector<8x1xf32>
    %364 = tpu.matmul %42, %363, %cst_81 {dimension_numbers = #tpu.dot_dimension_numbers<[1], [0], [0], [1], [0, 0, 1, 1], [], []>} : vector<8x8xf32>, vector<8x1xf32>, vector<8x1xf32> -> vector<8x1xf32>
    %365 = arith.negf %364 : vector<8x1xf32>
    %366 = math.exp %365 : vector<8x1xf32>
    %cst_82 = arith.constant 1.000000e+00 : f32
    %367 = vector.broadcast %cst_82 : f32 to vector<8x1xf32>
    %368 = arith.addf %367, %366 : vector<8x1xf32>
    %369 = arith.divf %367, %368 : vector<8x1xf32>
    %370 = vector.broadcast %369 : vector<8x1xf32> to vector<8x256xf32>
    %371 = arith.mulf %359, %370 : vector<8x256xf32>
    %c0_83 = arith.constant 0 : index
    %c0_84 = arith.constant 0 : index
    %c0_85 = arith.constant 0 : index
    %372 = vector.load %arg12[%c0_83, %c0_84, %c0_85] : memref<2x8x256xf32, #tpu.memory_space<vmem>>, vector<1x8x256xf32>
    %373 = vector.shape_cast %372 : vector<1x8x256xf32> to vector<8x256xf32>
    %374 = vector.shape_cast %371 : vector<8x256xf32> to vector<1x8x256xf32>
    tpu.vector_store %arg12[%c0_83, %c0_84, %c0_85], %374 {strides = array<i32>} : memref<2x8x256xf32, #tpu.memory_space<vmem>>, vector<1x8x256xf32>,
    %c1_86 = arith.constant 1 : index
    %c0_87 = arith.constant 0 : index
    %c0_88 = arith.constant 0 : index
    %375 = vector.load %arg1[%c1_86, %c0_87, %c0_88] : memref<2x8x256xbf16, #tpu.memory_space<vmem>>, vector<1x8x256xbf16>
    %376 = vector.shape_cast %375 : vector<1x8x256xbf16> to vector<8x256xbf16>
    %cst_89 = arith.constant dense<0.000000e+00> : vector<32x256xf32>
    %377 = tpu.matmul %34, %376, %cst_89 {dimension_numbers = #tpu.dot_dimension_numbers<[1], [0], [0], [1], [0, 0, 1, 1], [], []>} : vector<32x8xbf16>, vector<8x256xbf16>, vector<32x256xf32> -> vector<32x256xf32>
    %378 = vector.broadcast %35 : vector<32x1xf32> to vector<32x256xf32>
    %379 = arith.addf %377, %378 : vector<32x256xf32>
    %380 = vector.extract_strided_slice %379 {offsets = [0, 0], sizes = [16, 256], strides = [1, 1]} : vector<32x256xf32> to vector<16x256xf32>
    %381 = vector.extract_strided_slice %36 {offsets = [0, 4], sizes = [16, 1], strides = [1, 1]} : vector<16x9xf32> to vector<16x1xf32>
    %382 = vector.broadcast %381 : vector<16x1xf32> to vector<16x256xf32>
    %383 = arith.mulf %380, %382 : vector<16x256xf32>
    %c17_i32_90 = arith.constant 17 : i32
    %384 = tpu.dynamic_rotate %380 by %c17_i32_90 dim 1 : vector<16x256xf32>, i32 -> vector<16x256xf32>
    %cst_91 = arith.constant 0.000000e+00 : f32
    %385 = vector.shape_cast %23 : vector<1x256xi1> to vector<1x256xi1>
    %386 = vector.broadcast %385 : vector<1x256xi1> to vector<16x256xi1>
    %387 = vector.broadcast %cst_91 : f32 to vector<16x256xf32>
    %388 = arith.select %386, %384, %387 : vector<16x256xi1>, vector<16x256xf32>
    %389 = vector.extract_strided_slice %36 {offsets = [0, 0], sizes = [16, 1], strides = [1, 1]} : vector<16x9xf32> to vector<16x1xf32>
    %390 = vector.broadcast %389 : vector<16x1xf32> to vector<16x256xf32>
    %391 = arith.mulf %388, %390 : vector<16x256xf32>
    %392 = arith.addf %383, %391 : vector<16x256xf32>
    %c16_i32_92 = arith.constant 16 : i32
    %393 = tpu.dynamic_rotate %380 by %c16_i32_92 dim 1 : vector<16x256xf32>, i32 -> vector<16x256xf32>
    %cst_93 = arith.constant 0.000000e+00 : f32
    %394 = vector.shape_cast %5 : vector<1x256xi1> to vector<1x256xi1>
    %395 = vector.broadcast %394 : vector<1x256xi1> to vector<16x256xi1>
    %396 = vector.broadcast %cst_93 : f32 to vector<16x256xf32>
    %397 = arith.select %395, %393, %396 : vector<16x256xi1>, vector<16x256xf32>
    %398 = vector.extract_strided_slice %36 {offsets = [0, 1], sizes = [16, 1], strides = [1, 1]} : vector<16x9xf32> to vector<16x1xf32>
    %399 = vector.broadcast %398 : vector<16x1xf32> to vector<16x256xf32>
    %400 = arith.mulf %397, %399 : vector<16x256xf32>
    %401 = arith.addf %392, %400 : vector<16x256xf32>
    %c15_i32_94 = arith.constant 15 : i32
    %402 = tpu.dynamic_rotate %380 by %c15_i32_94 dim 1 : vector<16x256xf32>, i32 -> vector<16x256xf32>
    %cst_95 = arith.constant 0.000000e+00 : f32
    %403 = vector.shape_cast %24 : vector<1x256xi1> to vector<1x256xi1>
    %404 = vector.broadcast %403 : vector<1x256xi1> to vector<16x256xi1>
    %405 = vector.broadcast %cst_95 : f32 to vector<16x256xf32>
    %406 = arith.select %404, %402, %405 : vector<16x256xi1>, vector<16x256xf32>
    %407 = vector.extract_strided_slice %36 {offsets = [0, 2], sizes = [16, 1], strides = [1, 1]} : vector<16x9xf32> to vector<16x1xf32>
    %408 = vector.broadcast %407 : vector<16x1xf32> to vector<16x256xf32>
    %409 = arith.mulf %406, %408 : vector<16x256xf32>
    %410 = arith.addf %401, %409 : vector<16x256xf32>
    %c1_i32_96 = arith.constant 1 : i32
    %411 = tpu.dynamic_rotate %380 by %c1_i32_96 dim 1 : vector<16x256xf32>, i32 -> vector<16x256xf32>
    %cst_97 = arith.constant 0.000000e+00 : f32
    %412 = vector.shape_cast %9 : vector<1x256xi1> to vector<1x256xi1>
    %413 = vector.broadcast %412 : vector<1x256xi1> to vector<16x256xi1>
    %414 = vector.broadcast %cst_97 : f32 to vector<16x256xf32>
    %415 = arith.select %413, %411, %414 : vector<16x256xi1>, vector<16x256xf32>
    %416 = vector.extract_strided_slice %36 {offsets = [0, 3], sizes = [16, 1], strides = [1, 1]} : vector<16x9xf32> to vector<16x1xf32>
    %417 = vector.broadcast %416 : vector<16x1xf32> to vector<16x256xf32>
    %418 = arith.mulf %415, %417 : vector<16x256xf32>
    %419 = arith.addf %410, %418 : vector<16x256xf32>
    %c255_i32_98 = arith.constant 255 : i32
    %420 = tpu.dynamic_rotate %380 by %c255_i32_98 dim 1 : vector<16x256xf32>, i32 -> vector<16x256xf32>
    %cst_99 = arith.constant 0.000000e+00 : f32
    %421 = vector.shape_cast %7 : vector<1x256xi1> to vector<1x256xi1>
    %422 = vector.broadcast %421 : vector<1x256xi1> to vector<16x256xi1>
    %423 = vector.broadcast %cst_99 : f32 to vector<16x256xf32>
    %424 = arith.select %422, %420, %423 : vector<16x256xi1>, vector<16x256xf32>
    %425 = vector.extract_strided_slice %36 {offsets = [0, 5], sizes = [16, 1], strides = [1, 1]} : vector<16x9xf32> to vector<16x1xf32>
    %426 = vector.broadcast %425 : vector<16x1xf32> to vector<16x256xf32>
    %427 = arith.mulf %424, %426 : vector<16x256xf32>
    %428 = arith.addf %419, %427 : vector<16x256xf32>
    %c241_i32_100 = arith.constant 241 : i32
    %429 = tpu.dynamic_rotate %380 by %c241_i32_100 dim 1 : vector<16x256xf32>, i32 -> vector<16x256xf32>
    %cst_101 = arith.constant 0.000000e+00 : f32
    %430 = vector.shape_cast %27 : vector<1x256xi1> to vector<1x256xi1>
    %431 = vector.broadcast %430 : vector<1x256xi1> to vector<16x256xi1>
    %432 = vector.broadcast %cst_101 : f32 to vector<16x256xf32>
    %433 = arith.select %431, %429, %432 : vector<16x256xi1>, vector<16x256xf32>
    %434 = vector.extract_strided_slice %36 {offsets = [0, 6], sizes = [16, 1], strides = [1, 1]} : vector<16x9xf32> to vector<16x1xf32>
    %435 = vector.broadcast %434 : vector<16x1xf32> to vector<16x256xf32>
    %436 = arith.mulf %433, %435 : vector<16x256xf32>
    %437 = arith.addf %428, %436 : vector<16x256xf32>
    %c240_i32_102 = arith.constant 240 : i32
    %438 = tpu.dynamic_rotate %380 by %c240_i32_102 dim 1 : vector<16x256xf32>, i32 -> vector<16x256xf32>
    %cst_103 = arith.constant 0.000000e+00 : f32
    %439 = vector.shape_cast %3 : vector<1x256xi1> to vector<1x256xi1>
    %440 = vector.broadcast %439 : vector<1x256xi1> to vector<16x256xi1>
    %441 = vector.broadcast %cst_103 : f32 to vector<16x256xf32>
    %442 = arith.select %440, %438, %441 : vector<16x256xi1>, vector<16x256xf32>
    %443 = vector.extract_strided_slice %36 {offsets = [0, 7], sizes = [16, 1], strides = [1, 1]} : vector<16x9xf32> to vector<16x1xf32>
    %444 = vector.broadcast %443 : vector<16x1xf32> to vector<16x256xf32>
    %445 = arith.mulf %442, %444 : vector<16x256xf32>
    %446 = arith.addf %437, %445 : vector<16x256xf32>
    %c239_i32_104 = arith.constant 239 : i32
    %447 = tpu.dynamic_rotate %380 by %c239_i32_104 dim 1 : vector<16x256xf32>, i32 -> vector<16x256xf32>
    %cst_105 = arith.constant 0.000000e+00 : f32
    %448 = vector.shape_cast %28 : vector<1x256xi1> to vector<1x256xi1>
    %449 = vector.broadcast %448 : vector<1x256xi1> to vector<16x256xi1>
    %450 = vector.broadcast %cst_105 : f32 to vector<16x256xf32>
    %451 = arith.select %449, %447, %450 : vector<16x256xi1>, vector<16x256xf32>
    %452 = vector.extract_strided_slice %36 {offsets = [0, 8], sizes = [16, 1], strides = [1, 1]} : vector<16x9xf32> to vector<16x1xf32>
    %453 = vector.broadcast %452 : vector<16x1xf32> to vector<16x256xf32>
    %454 = arith.mulf %451, %453 : vector<16x256xf32>
    %455 = arith.addf %446, %454 : vector<16x256xf32>
    %456 = vector.broadcast %37 : vector<16x1xf32> to vector<16x256xf32>
    %457 = arith.addf %455, %456 : vector<16x256xf32>
    %cst_106 = arith.constant 0.000000e+00 : f32
    %458 = vector.broadcast %cst_106 : f32 to vector<16x256xf32>
    %459 = arith.maximumf %457, %458 : vector<16x256xf32>
    %460 = arith.truncf %459 : vector<16x256xf32> to vector<16x256xbf16>
    %c0_107 = arith.constant 0 : index
    %c0_108 = arith.constant 0 : index
    %461 = vector.load %arg13[%c0_107, %c0_108] : memref<32x256xbf16, #tpu.memory_space<vmem>>, vector<16x256xbf16>
    tpu.vector_store %arg13[%c0_107, %c0_108], %460 {strides = array<i32>} : memref<32x256xbf16, #tpu.memory_space<vmem>>, vector<16x256xbf16>,
    %462 = vector.extract_strided_slice %379 {offsets = [16, 0], sizes = [16, 256], strides = [1, 1]} : vector<32x256xf32> to vector<16x256xf32>
    %463 = vector.extract_strided_slice %38 {offsets = [0, 12], sizes = [16, 1], strides = [1, 1]} : vector<16x25xf32> to vector<16x1xf32>
    %464 = vector.broadcast %463 : vector<16x1xf32> to vector<16x256xf32>
    %465 = arith.mulf %462, %464 : vector<16x256xf32>
    %c34_i32_109 = arith.constant 34 : i32
    %466 = tpu.dynamic_rotate %462 by %c34_i32_109 dim 1 : vector<16x256xf32>, i32 -> vector<16x256xf32>
    %cst_110 = arith.constant 0.000000e+00 : f32
    %467 = vector.shape_cast %18 : vector<1x256xi1> to vector<1x256xi1>
    %468 = vector.broadcast %467 : vector<1x256xi1> to vector<16x256xi1>
    %469 = vector.broadcast %cst_110 : f32 to vector<16x256xf32>
    %470 = arith.select %468, %466, %469 : vector<16x256xi1>, vector<16x256xf32>
    %471 = vector.extract_strided_slice %38 {offsets = [0, 0], sizes = [16, 1], strides = [1, 1]} : vector<16x25xf32> to vector<16x1xf32>
    %472 = vector.broadcast %471 : vector<16x1xf32> to vector<16x256xf32>
    %473 = arith.mulf %470, %472 : vector<16x256xf32>
    %474 = arith.addf %465, %473 : vector<16x256xf32>
    %c33_i32_111 = arith.constant 33 : i32
    %475 = tpu.dynamic_rotate %462 by %c33_i32_111 dim 1 : vector<16x256xf32>, i32 -> vector<16x256xf32>
    %cst_112 = arith.constant 0.000000e+00 : f32
    %476 = vector.shape_cast %19 : vector<1x256xi1> to vector<1x256xi1>
    %477 = vector.broadcast %476 : vector<1x256xi1> to vector<16x256xi1>
    %478 = vector.broadcast %cst_112 : f32 to vector<16x256xf32>
    %479 = arith.select %477, %475, %478 : vector<16x256xi1>, vector<16x256xf32>
    %480 = vector.extract_strided_slice %38 {offsets = [0, 1], sizes = [16, 1], strides = [1, 1]} : vector<16x25xf32> to vector<16x1xf32>
    %481 = vector.broadcast %480 : vector<16x1xf32> to vector<16x256xf32>
    %482 = arith.mulf %479, %481 : vector<16x256xf32>
    %483 = arith.addf %474, %482 : vector<16x256xf32>
    %c32_i32_113 = arith.constant 32 : i32
    %484 = tpu.dynamic_rotate %462 by %c32_i32_113 dim 1 : vector<16x256xf32>, i32 -> vector<16x256xf32>
    %cst_114 = arith.constant 0.000000e+00 : f32
    %485 = vector.shape_cast %13 : vector<1x256xi1> to vector<1x256xi1>
    %486 = vector.broadcast %485 : vector<1x256xi1> to vector<16x256xi1>
    %487 = vector.broadcast %cst_114 : f32 to vector<16x256xf32>
    %488 = arith.select %486, %484, %487 : vector<16x256xi1>, vector<16x256xf32>
    %489 = vector.extract_strided_slice %38 {offsets = [0, 2], sizes = [16, 1], strides = [1, 1]} : vector<16x25xf32> to vector<16x1xf32>
    %490 = vector.broadcast %489 : vector<16x1xf32> to vector<16x256xf32>
    %491 = arith.mulf %488, %490 : vector<16x256xf32>
    %492 = arith.addf %483, %491 : vector<16x256xf32>
    %c31_i32_115 = arith.constant 31 : i32
    %493 = tpu.dynamic_rotate %462 by %c31_i32_115 dim 1 : vector<16x256xf32>, i32 -> vector<16x256xf32>
    %cst_116 = arith.constant 0.000000e+00 : f32
    %494 = vector.shape_cast %20 : vector<1x256xi1> to vector<1x256xi1>
    %495 = vector.broadcast %494 : vector<1x256xi1> to vector<16x256xi1>
    %496 = vector.broadcast %cst_116 : f32 to vector<16x256xf32>
    %497 = arith.select %495, %493, %496 : vector<16x256xi1>, vector<16x256xf32>
    %498 = vector.extract_strided_slice %38 {offsets = [0, 3], sizes = [16, 1], strides = [1, 1]} : vector<16x25xf32> to vector<16x1xf32>
    %499 = vector.broadcast %498 : vector<16x1xf32> to vector<16x256xf32>
    %500 = arith.mulf %497, %499 : vector<16x256xf32>
    %501 = arith.addf %492, %500 : vector<16x256xf32>
    %c30_i32_117 = arith.constant 30 : i32
    %502 = tpu.dynamic_rotate %462 by %c30_i32_117 dim 1 : vector<16x256xf32>, i32 -> vector<16x256xf32>
    %cst_118 = arith.constant 0.000000e+00 : f32
    %503 = vector.shape_cast %21 : vector<1x256xi1> to vector<1x256xi1>
    %504 = vector.broadcast %503 : vector<1x256xi1> to vector<16x256xi1>
    %505 = vector.broadcast %cst_118 : f32 to vector<16x256xf32>
    %506 = arith.select %504, %502, %505 : vector<16x256xi1>, vector<16x256xf32>
    %507 = vector.extract_strided_slice %38 {offsets = [0, 4], sizes = [16, 1], strides = [1, 1]} : vector<16x25xf32> to vector<16x1xf32>
    %508 = vector.broadcast %507 : vector<16x1xf32> to vector<16x256xf32>
    %509 = arith.mulf %506, %508 : vector<16x256xf32>
    %510 = arith.addf %501, %509 : vector<16x256xf32>
    %c18_i32_119 = arith.constant 18 : i32
    %511 = tpu.dynamic_rotate %462 by %c18_i32_119 dim 1 : vector<16x256xf32>, i32 -> vector<16x256xf32>
    %cst_120 = arith.constant 0.000000e+00 : f32
    %512 = vector.shape_cast %22 : vector<1x256xi1> to vector<1x256xi1>
    %513 = vector.broadcast %512 : vector<1x256xi1> to vector<16x256xi1>
    %514 = vector.broadcast %cst_120 : f32 to vector<16x256xf32>
    %515 = arith.select %513, %511, %514 : vector<16x256xi1>, vector<16x256xf32>
    %516 = vector.extract_strided_slice %38 {offsets = [0, 5], sizes = [16, 1], strides = [1, 1]} : vector<16x25xf32> to vector<16x1xf32>
    %517 = vector.broadcast %516 : vector<16x1xf32> to vector<16x256xf32>
    %518 = arith.mulf %515, %517 : vector<16x256xf32>
    %519 = arith.addf %510, %518 : vector<16x256xf32>
    %c17_i32_121 = arith.constant 17 : i32
    %520 = tpu.dynamic_rotate %462 by %c17_i32_121 dim 1 : vector<16x256xf32>, i32 -> vector<16x256xf32>
    %cst_122 = arith.constant 0.000000e+00 : f32
    %521 = vector.shape_cast %23 : vector<1x256xi1> to vector<1x256xi1>
    %522 = vector.broadcast %521 : vector<1x256xi1> to vector<16x256xi1>
    %523 = vector.broadcast %cst_122 : f32 to vector<16x256xf32>
    %524 = arith.select %522, %520, %523 : vector<16x256xi1>, vector<16x256xf32>
    %525 = vector.extract_strided_slice %38 {offsets = [0, 6], sizes = [16, 1], strides = [1, 1]} : vector<16x25xf32> to vector<16x1xf32>
    %526 = vector.broadcast %525 : vector<16x1xf32> to vector<16x256xf32>
    %527 = arith.mulf %524, %526 : vector<16x256xf32>
    %528 = arith.addf %519, %527 : vector<16x256xf32>
    %c16_i32_123 = arith.constant 16 : i32
    %529 = tpu.dynamic_rotate %462 by %c16_i32_123 dim 1 : vector<16x256xf32>, i32 -> vector<16x256xf32>
    %cst_124 = arith.constant 0.000000e+00 : f32
    %530 = vector.shape_cast %5 : vector<1x256xi1> to vector<1x256xi1>
    %531 = vector.broadcast %530 : vector<1x256xi1> to vector<16x256xi1>
    %532 = vector.broadcast %cst_124 : f32 to vector<16x256xf32>
    %533 = arith.select %531, %529, %532 : vector<16x256xi1>, vector<16x256xf32>
    %534 = vector.extract_strided_slice %38 {offsets = [0, 7], sizes = [16, 1], strides = [1, 1]} : vector<16x25xf32> to vector<16x1xf32>
    %535 = vector.broadcast %534 : vector<16x1xf32> to vector<16x256xf32>
    %536 = arith.mulf %533, %535 : vector<16x256xf32>
    %537 = arith.addf %528, %536 : vector<16x256xf32>
    %c15_i32_125 = arith.constant 15 : i32
    %538 = tpu.dynamic_rotate %462 by %c15_i32_125 dim 1 : vector<16x256xf32>, i32 -> vector<16x256xf32>
    %cst_126 = arith.constant 0.000000e+00 : f32
    %539 = vector.shape_cast %24 : vector<1x256xi1> to vector<1x256xi1>
    %540 = vector.broadcast %539 : vector<1x256xi1> to vector<16x256xi1>
    %541 = vector.broadcast %cst_126 : f32 to vector<16x256xf32>
    %542 = arith.select %540, %538, %541 : vector<16x256xi1>, vector<16x256xf32>
    %543 = vector.extract_strided_slice %38 {offsets = [0, 8], sizes = [16, 1], strides = [1, 1]} : vector<16x25xf32> to vector<16x1xf32>
    %544 = vector.broadcast %543 : vector<16x1xf32> to vector<16x256xf32>
    %545 = arith.mulf %542, %544 : vector<16x256xf32>
    %546 = arith.addf %537, %545 : vector<16x256xf32>
    %c14_i32_127 = arith.constant 14 : i32
    %547 = tpu.dynamic_rotate %462 by %c14_i32_127 dim 1 : vector<16x256xf32>, i32 -> vector<16x256xf32>
    %cst_128 = arith.constant 0.000000e+00 : f32
    %548 = vector.shape_cast %25 : vector<1x256xi1> to vector<1x256xi1>
    %549 = vector.broadcast %548 : vector<1x256xi1> to vector<16x256xi1>
    %550 = vector.broadcast %cst_128 : f32 to vector<16x256xf32>
    %551 = arith.select %549, %547, %550 : vector<16x256xi1>, vector<16x256xf32>
    %552 = vector.extract_strided_slice %38 {offsets = [0, 9], sizes = [16, 1], strides = [1, 1]} : vector<16x25xf32> to vector<16x1xf32>
    %553 = vector.broadcast %552 : vector<16x1xf32> to vector<16x256xf32>
    %554 = arith.mulf %551, %553 : vector<16x256xf32>
    %555 = arith.addf %546, %554 : vector<16x256xf32>
    %c2_i32_129 = arith.constant 2 : i32
    %556 = tpu.dynamic_rotate %462 by %c2_i32_129 dim 1 : vector<16x256xf32>, i32 -> vector<16x256xf32>
    %cst_130 = arith.constant 0.000000e+00 : f32
    %557 = vector.shape_cast %17 : vector<1x256xi1> to vector<1x256xi1>
    %558 = vector.broadcast %557 : vector<1x256xi1> to vector<16x256xi1>
    %559 = vector.broadcast %cst_130 : f32 to vector<16x256xf32>
    %560 = arith.select %558, %556, %559 : vector<16x256xi1>, vector<16x256xf32>
    %561 = vector.extract_strided_slice %38 {offsets = [0, 10], sizes = [16, 1], strides = [1, 1]} : vector<16x25xf32> to vector<16x1xf32>
    %562 = vector.broadcast %561 : vector<16x1xf32> to vector<16x256xf32>
    %563 = arith.mulf %560, %562 : vector<16x256xf32>
    %564 = arith.addf %555, %563 : vector<16x256xf32>
    %c1_i32_131 = arith.constant 1 : i32
    %565 = tpu.dynamic_rotate %462 by %c1_i32_131 dim 1 : vector<16x256xf32>, i32 -> vector<16x256xf32>
    %cst_132 = arith.constant 0.000000e+00 : f32
    %566 = vector.shape_cast %9 : vector<1x256xi1> to vector<1x256xi1>
    %567 = vector.broadcast %566 : vector<1x256xi1> to vector<16x256xi1>
    %568 = vector.broadcast %cst_132 : f32 to vector<16x256xf32>
    %569 = arith.select %567, %565, %568 : vector<16x256xi1>, vector<16x256xf32>
    %570 = vector.extract_strided_slice %38 {offsets = [0, 11], sizes = [16, 1], strides = [1, 1]} : vector<16x25xf32> to vector<16x1xf32>
    %571 = vector.broadcast %570 : vector<16x1xf32> to vector<16x256xf32>
    %572 = arith.mulf %569, %571 : vector<16x256xf32>
    %573 = arith.addf %564, %572 : vector<16x256xf32>
    %c255_i32_133 = arith.constant 255 : i32
    %574 = tpu.dynamic_rotate %462 by %c255_i32_133 dim 1 : vector<16x256xf32>, i32 -> vector<16x256xf32>
    %cst_134 = arith.constant 0.000000e+00 : f32
    %575 = vector.shape_cast %7 : vector<1x256xi1> to vector<1x256xi1>
    %576 = vector.broadcast %575 : vector<1x256xi1> to vector<16x256xi1>
    %577 = vector.broadcast %cst_134 : f32 to vector<16x256xf32>
    %578 = arith.select %576, %574, %577 : vector<16x256xi1>, vector<16x256xf32>
    %579 = vector.extract_strided_slice %38 {offsets = [0, 13], sizes = [16, 1], strides = [1, 1]} : vector<16x25xf32> to vector<16x1xf32>
    %580 = vector.broadcast %579 : vector<16x1xf32> to vector<16x256xf32>
    %581 = arith.mulf %578, %580 : vector<16x256xf32>
    %582 = arith.addf %573, %581 : vector<16x256xf32>
    %c254_i32_135 = arith.constant 254 : i32
    %583 = tpu.dynamic_rotate %462 by %c254_i32_135 dim 1 : vector<16x256xf32>, i32 -> vector<16x256xf32>
    %cst_136 = arith.constant 0.000000e+00 : f32
    %584 = vector.shape_cast %15 : vector<1x256xi1> to vector<1x256xi1>
    %585 = vector.broadcast %584 : vector<1x256xi1> to vector<16x256xi1>
    %586 = vector.broadcast %cst_136 : f32 to vector<16x256xf32>
    %587 = arith.select %585, %583, %586 : vector<16x256xi1>, vector<16x256xf32>
    %588 = vector.extract_strided_slice %38 {offsets = [0, 14], sizes = [16, 1], strides = [1, 1]} : vector<16x25xf32> to vector<16x1xf32>
    %589 = vector.broadcast %588 : vector<16x1xf32> to vector<16x256xf32>
    %590 = arith.mulf %587, %589 : vector<16x256xf32>
    %591 = arith.addf %582, %590 : vector<16x256xf32>
    %c242_i32_137 = arith.constant 242 : i32
    %592 = tpu.dynamic_rotate %462 by %c242_i32_137 dim 1 : vector<16x256xf32>, i32 -> vector<16x256xf32>
    %cst_138 = arith.constant 0.000000e+00 : f32
    %593 = vector.shape_cast %26 : vector<1x256xi1> to vector<1x256xi1>
    %594 = vector.broadcast %593 : vector<1x256xi1> to vector<16x256xi1>
    %595 = vector.broadcast %cst_138 : f32 to vector<16x256xf32>
    %596 = arith.select %594, %592, %595 : vector<16x256xi1>, vector<16x256xf32>
    %597 = vector.extract_strided_slice %38 {offsets = [0, 15], sizes = [16, 1], strides = [1, 1]} : vector<16x25xf32> to vector<16x1xf32>
    %598 = vector.broadcast %597 : vector<16x1xf32> to vector<16x256xf32>
    %599 = arith.mulf %596, %598 : vector<16x256xf32>
    %600 = arith.addf %591, %599 : vector<16x256xf32>
    %c241_i32_139 = arith.constant 241 : i32
    %601 = tpu.dynamic_rotate %462 by %c241_i32_139 dim 1 : vector<16x256xf32>, i32 -> vector<16x256xf32>
    %cst_140 = arith.constant 0.000000e+00 : f32
    %602 = vector.shape_cast %27 : vector<1x256xi1> to vector<1x256xi1>
    %603 = vector.broadcast %602 : vector<1x256xi1> to vector<16x256xi1>
    %604 = vector.broadcast %cst_140 : f32 to vector<16x256xf32>
    %605 = arith.select %603, %601, %604 : vector<16x256xi1>, vector<16x256xf32>
    %606 = vector.extract_strided_slice %38 {offsets = [0, 16], sizes = [16, 1], strides = [1, 1]} : vector<16x25xf32> to vector<16x1xf32>
    %607 = vector.broadcast %606 : vector<16x1xf32> to vector<16x256xf32>
    %608 = arith.mulf %605, %607 : vector<16x256xf32>
    %609 = arith.addf %600, %608 : vector<16x256xf32>
    %c240_i32_141 = arith.constant 240 : i32
    %610 = tpu.dynamic_rotate %462 by %c240_i32_141 dim 1 : vector<16x256xf32>, i32 -> vector<16x256xf32>
    %cst_142 = arith.constant 0.000000e+00 : f32
    %611 = vector.shape_cast %3 : vector<1x256xi1> to vector<1x256xi1>
    %612 = vector.broadcast %611 : vector<1x256xi1> to vector<16x256xi1>
    %613 = vector.broadcast %cst_142 : f32 to vector<16x256xf32>
    %614 = arith.select %612, %610, %613 : vector<16x256xi1>, vector<16x256xf32>
    %615 = vector.extract_strided_slice %38 {offsets = [0, 17], sizes = [16, 1], strides = [1, 1]} : vector<16x25xf32> to vector<16x1xf32>
    %616 = vector.broadcast %615 : vector<16x1xf32> to vector<16x256xf32>
    %617 = arith.mulf %614, %616 : vector<16x256xf32>
    %618 = arith.addf %609, %617 : vector<16x256xf32>
    %c239_i32_143 = arith.constant 239 : i32
    %619 = tpu.dynamic_rotate %462 by %c239_i32_143 dim 1 : vector<16x256xf32>, i32 -> vector<16x256xf32>
    %cst_144 = arith.constant 0.000000e+00 : f32
    %620 = vector.shape_cast %28 : vector<1x256xi1> to vector<1x256xi1>
    %621 = vector.broadcast %620 : vector<1x256xi1> to vector<16x256xi1>
    %622 = vector.broadcast %cst_144 : f32 to vector<16x256xf32>
    %623 = arith.select %621, %619, %622 : vector<16x256xi1>, vector<16x256xf32>
    %624 = vector.extract_strided_slice %38 {offsets = [0, 18], sizes = [16, 1], strides = [1, 1]} : vector<16x25xf32> to vector<16x1xf32>
    %625 = vector.broadcast %624 : vector<16x1xf32> to vector<16x256xf32>
    %626 = arith.mulf %623, %625 : vector<16x256xf32>
    %627 = arith.addf %618, %626 : vector<16x256xf32>
    %c238_i32_145 = arith.constant 238 : i32
    %628 = tpu.dynamic_rotate %462 by %c238_i32_145 dim 1 : vector<16x256xf32>, i32 -> vector<16x256xf32>
    %cst_146 = arith.constant 0.000000e+00 : f32
    %629 = vector.shape_cast %29 : vector<1x256xi1> to vector<1x256xi1>
    %630 = vector.broadcast %629 : vector<1x256xi1> to vector<16x256xi1>
    %631 = vector.broadcast %cst_146 : f32 to vector<16x256xf32>
    %632 = arith.select %630, %628, %631 : vector<16x256xi1>, vector<16x256xf32>
    %633 = vector.extract_strided_slice %38 {offsets = [0, 19], sizes = [16, 1], strides = [1, 1]} : vector<16x25xf32> to vector<16x1xf32>
    %634 = vector.broadcast %633 : vector<16x1xf32> to vector<16x256xf32>
    %635 = arith.mulf %632, %634 : vector<16x256xf32>
    %636 = arith.addf %627, %635 : vector<16x256xf32>
    %c226_i32_147 = arith.constant 226 : i32
    %637 = tpu.dynamic_rotate %462 by %c226_i32_147 dim 1 : vector<16x256xf32>, i32 -> vector<16x256xf32>
    %cst_148 = arith.constant 0.000000e+00 : f32
    %638 = vector.shape_cast %30 : vector<1x256xi1> to vector<1x256xi1>
    %639 = vector.broadcast %638 : vector<1x256xi1> to vector<16x256xi1>
    %640 = vector.broadcast %cst_148 : f32 to vector<16x256xf32>
    %641 = arith.select %639, %637, %640 : vector<16x256xi1>, vector<16x256xf32>
    %642 = vector.extract_strided_slice %38 {offsets = [0, 20], sizes = [16, 1], strides = [1, 1]} : vector<16x25xf32> to vector<16x1xf32>
    %643 = vector.broadcast %642 : vector<16x1xf32> to vector<16x256xf32>
    %644 = arith.mulf %641, %643 : vector<16x256xf32>
    %645 = arith.addf %636, %644 : vector<16x256xf32>
    %c225_i32_149 = arith.constant 225 : i32
    %646 = tpu.dynamic_rotate %462 by %c225_i32_149 dim 1 : vector<16x256xf32>, i32 -> vector<16x256xf32>
    %cst_150 = arith.constant 0.000000e+00 : f32
    %647 = vector.shape_cast %31 : vector<1x256xi1> to vector<1x256xi1>
    %648 = vector.broadcast %647 : vector<1x256xi1> to vector<16x256xi1>
    %649 = vector.broadcast %cst_150 : f32 to vector<16x256xf32>
    %650 = arith.select %648, %646, %649 : vector<16x256xi1>, vector<16x256xf32>
    %651 = vector.extract_strided_slice %38 {offsets = [0, 21], sizes = [16, 1], strides = [1, 1]} : vector<16x25xf32> to vector<16x1xf32>
    %652 = vector.broadcast %651 : vector<16x1xf32> to vector<16x256xf32>
    %653 = arith.mulf %650, %652 : vector<16x256xf32>
    %654 = arith.addf %645, %653 : vector<16x256xf32>
    %c224_i32_151 = arith.constant 224 : i32
    %655 = tpu.dynamic_rotate %462 by %c224_i32_151 dim 1 : vector<16x256xf32>, i32 -> vector<16x256xf32>
    %cst_152 = arith.constant 0.000000e+00 : f32
    %656 = vector.shape_cast %11 : vector<1x256xi1> to vector<1x256xi1>
    %657 = vector.broadcast %656 : vector<1x256xi1> to vector<16x256xi1>
    %658 = vector.broadcast %cst_152 : f32 to vector<16x256xf32>
    %659 = arith.select %657, %655, %658 : vector<16x256xi1>, vector<16x256xf32>
    %660 = vector.extract_strided_slice %38 {offsets = [0, 22], sizes = [16, 1], strides = [1, 1]} : vector<16x25xf32> to vector<16x1xf32>
    %661 = vector.broadcast %660 : vector<16x1xf32> to vector<16x256xf32>
    %662 = arith.mulf %659, %661 : vector<16x256xf32>
    %663 = arith.addf %654, %662 : vector<16x256xf32>
    %c223_i32_153 = arith.constant 223 : i32
    %664 = tpu.dynamic_rotate %462 by %c223_i32_153 dim 1 : vector<16x256xf32>, i32 -> vector<16x256xf32>
    %cst_154 = arith.constant 0.000000e+00 : f32
    %665 = vector.shape_cast %32 : vector<1x256xi1> to vector<1x256xi1>
    %666 = vector.broadcast %665 : vector<1x256xi1> to vector<16x256xi1>
    %667 = vector.broadcast %cst_154 : f32 to vector<16x256xf32>
    %668 = arith.select %666, %664, %667 : vector<16x256xi1>, vector<16x256xf32>
    %669 = vector.extract_strided_slice %38 {offsets = [0, 23], sizes = [16, 1], strides = [1, 1]} : vector<16x25xf32> to vector<16x1xf32>
    %670 = vector.broadcast %669 : vector<16x1xf32> to vector<16x256xf32>
    %671 = arith.mulf %668, %670 : vector<16x256xf32>
    %672 = arith.addf %663, %671 : vector<16x256xf32>
    %c222_i32_155 = arith.constant 222 : i32
    %673 = tpu.dynamic_rotate %462 by %c222_i32_155 dim 1 : vector<16x256xf32>, i32 -> vector<16x256xf32>
    %cst_156 = arith.constant 0.000000e+00 : f32
    %674 = vector.shape_cast %33 : vector<1x256xi1> to vector<1x256xi1>
    %675 = vector.broadcast %674 : vector<1x256xi1> to vector<16x256xi1>
    %676 = vector.broadcast %cst_156 : f32 to vector<16x256xf32>
    %677 = arith.select %675, %673, %676 : vector<16x256xi1>, vector<16x256xf32>
    %678 = vector.extract_strided_slice %38 {offsets = [0, 24], sizes = [16, 1], strides = [1, 1]} : vector<16x25xf32> to vector<16x1xf32>
    %679 = vector.broadcast %678 : vector<16x1xf32> to vector<16x256xf32>
    %680 = arith.mulf %677, %679 : vector<16x256xf32>
    %681 = arith.addf %672, %680 : vector<16x256xf32>
    %682 = vector.broadcast %39 : vector<16x1xf32> to vector<16x256xf32>
    %683 = arith.addf %681, %682 : vector<16x256xf32>
    %cst_157 = arith.constant 0.000000e+00 : f32
    %684 = vector.broadcast %cst_157 : f32 to vector<16x256xf32>
    %685 = arith.maximumf %683, %684 : vector<16x256xf32>
    %686 = arith.truncf %685 : vector<16x256xf32> to vector<16x256xbf16>
    %c16_158 = arith.constant 16 : index
    %c0_159 = arith.constant 0 : index
    %687 = vector.load %arg13[%c16_158, %c0_159] : memref<32x256xbf16, #tpu.memory_space<vmem>>, vector<16x256xbf16>
    tpu.vector_store %arg13[%c16_158, %c0_159], %686 {strides = array<i32>} : memref<32x256xbf16, #tpu.memory_space<vmem>>, vector<16x256xbf16>,
    %c0_160 = arith.constant 0 : index
    %c0_161 = arith.constant 0 : index
    %688 = vector.load %arg13[%c0_160, %c0_161] : memref<32x256xbf16, #tpu.memory_space<vmem>>, vector<32x256xbf16>
    %cst_162 = arith.constant dense<0.000000e+00> : vector<8x256xf32>
    %689 = tpu.matmul %40, %688, %cst_162 {dimension_numbers = #tpu.dot_dimension_numbers<[1], [0], [0], [1], [0, 0, 1, 1], [], []>} : vector<8x32xbf16>, vector<32x256xbf16>, vector<8x256xf32> -> vector<8x256xf32>
    %690 = vector.broadcast %41 : vector<8x1xf32> to vector<8x256xf32>
    %691 = arith.addf %689, %690 : vector<8x256xf32>
    %cst_163 = arith.constant dense<0.000000e+00> : vector<8xf32>
    %692 = vector.multi_reduction <add>, %691, %cst_163 [1] : vector<8x256xf32> to vector<8xf32>
    %693 = vector.shape_cast %692 : vector<8xf32> to vector<8x1xf32>
    %cst_164 = arith.constant 2.560000e+02 : f32
    %694 = vector.broadcast %cst_164 : f32 to vector<8x1xf32>
    %695 = arith.divf %693, %694 : vector<8x1xf32>
    %cst_165 = arith.constant dense<0.000000e+00> : vector<8x1xf32>
    %696 = tpu.matmul %42, %695, %cst_165 {dimension_numbers = #tpu.dot_dimension_numbers<[1], [0], [0], [1], [0, 0, 1, 1], [], []>} : vector<8x8xf32>, vector<8x1xf32>, vector<8x1xf32> -> vector<8x1xf32>
    %697 = arith.negf %696 : vector<8x1xf32>
    %698 = math.exp %697 : vector<8x1xf32>
    %cst_166 = arith.constant 1.000000e+00 : f32
    %699 = vector.broadcast %cst_166 : f32 to vector<8x1xf32>
    %700 = arith.addf %699, %698 : vector<8x1xf32>
    %701 = arith.divf %699, %700 : vector<8x1xf32>
    %702 = vector.broadcast %701 : vector<8x1xf32> to vector<8x256xf32>
    %703 = arith.mulf %691, %702 : vector<8x256xf32>
    %c1_167 = arith.constant 1 : index
    %c0_168 = arith.constant 0 : index
    %c0_169 = arith.constant 0 : index
    %704 = vector.load %arg12[%c1_167, %c0_168, %c0_169] : memref<2x8x256xf32, #tpu.memory_space<vmem>>, vector<1x8x256xf32>
    %705 = vector.shape_cast %704 : vector<1x8x256xf32> to vector<8x256xf32>
    %706 = vector.shape_cast %703 : vector<8x256xf32> to vector<1x8x256xf32>
    tpu.vector_store %arg12[%c1_167, %c0_168, %c0_169], %706 {strides = array<i32>} : memref<2x8x256xf32, #tpu.memory_space<vmem>>, vector<1x8x256xf32>,
    return
  }
  func.func @transform_0(%arg0: i32) -> (i32, i32, i32) {
    %c0_i32 = arith.constant 0 : i32
    %c0_i32_0 = arith.constant 0 : i32
    %c0_i32_1 = arith.constant 0 : i32
    return %arg0, %c0_i32, %c0_i32_0 : i32, i32, i32
  }
  func.func @transform_1(%arg0: i32) -> (i32, i32) {
    %c0_i32 = arith.constant 0 : i32
    %c0_i32_0 = arith.constant 0 : i32
    %c0_i32_1 = arith.constant 0 : i32
    return %c0_i32, %c0_i32_0 : i32, i32
  }
  func.func @transform_2(%arg0: i32) -> (i32, i32) {
    %c0_i32 = arith.constant 0 : i32
    %c0_i32_0 = arith.constant 0 : i32
    %c0_i32_1 = arith.constant 0 : i32
    return %c0_i32, %c0_i32_0 : i32, i32
  }
  func.func @transform_3(%arg0: i32) -> (i32, i32) {
    %c0_i32 = arith.constant 0 : i32
    %c0_i32_0 = arith.constant 0 : i32
    %c0_i32_1 = arith.constant 0 : i32
    return %c0_i32, %c0_i32_0 : i32, i32
  }
  func.func @transform_4(%arg0: i32) -> (i32, i32) {
    %c0_i32 = arith.constant 0 : i32
    %c0_i32_0 = arith.constant 0 : i32
    %c0_i32_1 = arith.constant 0 : i32
    return %c0_i32, %c0_i32_0 : i32, i32
  }
  func.func @transform_5(%arg0: i32) -> (i32, i32) {
    %c0_i32 = arith.constant 0 : i32
    %c0_i32_0 = arith.constant 0 : i32
    %c0_i32_1 = arith.constant 0 : i32
    return %c0_i32, %c0_i32_0 : i32, i32
  }
  func.func @transform_6(%arg0: i32) -> (i32, i32) {
    %c0_i32 = arith.constant 0 : i32
    %c0_i32_0 = arith.constant 0 : i32
    %c0_i32_1 = arith.constant 0 : i32
    return %c0_i32, %c0_i32_0 : i32, i32
  }
  func.func @transform_7(%arg0: i32) -> (i32, i32) {
    %c0_i32 = arith.constant 0 : i32
    %c0_i32_0 = arith.constant 0 : i32
    %c0_i32_1 = arith.constant 0 : i32
    return %c0_i32, %c0_i32_0 : i32, i32
  }
  func.func @transform_8(%arg0: i32) -> (i32, i32) {
    %c0_i32 = arith.constant 0 : i32
    %c0_i32_0 = arith.constant 0 : i32
    %c0_i32_1 = arith.constant 0 : i32
    return %c0_i32, %c0_i32_0 : i32, i32
  }
  func.func @transform_9(%arg0: i32) -> (i32, i32) {
    %c0_i32 = arith.constant 0 : i32
    %c0_i32_0 = arith.constant 0 : i32
    %c0_i32_1 = arith.constant 0 : i32
    return %c0_i32, %c0_i32_0 : i32, i32
  }
  func.func @transform_10(%arg0: i32) -> (i32, i32) {
    %c0_i32 = arith.constant 0 : i32
    %c0_i32_0 = arith.constant 0 : i32
    %c0_i32_1 = arith.constant 0 : i32
    return %c0_i32, %c0_i32_0 : i32, i32
  }
  func.func @transform_11(%arg0: i32) -> (i32, i32, i32) {
    %c0_i32 = arith.constant 0 : i32
    %c0_i32_0 = arith.constant 0 : i32
    %c0_i32_1 = arith.constant 0 : i32
    return %arg0, %c0_i32, %c0_i32_0 : i32, i32, i32
  }
}

</mosaic_0001>

<bundles_post_ra>
// kernel: feedforward_forward.1
= control target key start
LH: loop header
LB: loop body
LE: loop exit
PB: predicated region body
PF: predicated region fallthrough
CT: control target
= control target key end

     0   :  { %vm128_vm0 = vcmask 1043456   ;;  %v6937_v2 = vmov 0   ;;  %vm7095_vm1 = vcmask 64512   ;;  %v2891_v15 = vmov 12   ;;  %s2909_s19 = smov 34   ;;  %s2910_s20 = smov 33   ;;  %s6925_s0 = inlined_call_operand.vmem [shape: bf16[2,8,256], index: 0, kind: input, shape index: {}]   ;;  %s6926_s3 = inlined_call_operand.vmem [shape: f32[32,1], index: 3, kind: input, shape index: {}]   ;;  %s6927_s2 = inlined_call_operand.vmem [shape: bf16[32,8], index: 2, kind: input, shape index: {}]   ;;  %s6928_s6 = inlined_call_operand.vmem [shape: f32[16,25], index: 6, kind: input, shape index: {}]   ;;  %s6929_s4 = inlined_call_operand.vmem [shape: f32[16,9], index: 4, kind: input, shape index: {}]   ;;  %s6930_s5 = inlined_call_operand.vmem [shape: f32[16,1], index: 5, kind: input, shape index: {}]   ;;  %s6931_s7 = inlined_call_operand.vmem [shape: f32[16,1], index: 7, kind: input, shape index: {}]   ;;  %s6932_s9 = inlined_call_operand.vmem [shape: f32[8,1], index: 9, kind: input, shape index: {}]   ;;  %s6933_s1 = inlined_call_operand.vmem [shape: s32[2,256], index: 1, kind: input, shape index: {}]   ;;  %s6934_s8 = inlined_call_operand.vmem [shape: bf16[8,32], index: 8, kind: input, shape index: {}]   ;;  %s6935_s10 = inlined_call_operand.vmem [shape: f32[8,8], index: 10, kind: input, shape index: {}]   ;;  %s6936_s11 = inlined_call_operand.vmem [shape: f32[2,8,256], index: 11, kind: output, shape index: {}]  }
   0x1   :  { %v85_v0 = vld [vmem:[%s6925_s0] sm:$0xff]  ;;  %v2737_v1 = vld [vmem:[%s6925_s0 + $0x8] sm:$0xff]  ;;  %2814 = vset.pattern.permute.xlu1 %v6937_v2  ;;  %167 = vmatprep.mubr.bf16.mxu0 %v6937_v2  ;;  %v72_v11 = vld [vmem:[%s6926_s3 + $0x10] sm:$0xff]  ;;  %v2892_v18 = vmov 1   ;;  %v2893_v19 = vmov 9   ;;  %v2894_v20 = vmov 10  }
   0x2   :  { %v70_v3 = vld [vmem:[%s6926_s3] sm:$0xff]  ;;  %v2730_v4 = vcombine.high %v85_v0, %v85_v0  ;;  %v2739_v5 = vcombine.high %v2737_v1, %v2737_v1  ;;  %v2729_v6 = vcombine.low %v85_v0, %v85_v0  ;;  %v2738_v7 = vcombine.low %v2737_v1, %v2737_v1  ;;  %v71_v8 = vld [vmem:[%s6926_s3 + $0x8] sm:$0xff]  ;;  %2813 = vset.pattern.permute.xlu0 %v6937_v2  ;;  %v73_v14 = vld [vmem:[%s6926_s3 + $0x18] sm:$0xff]  ;;  %s2911_s21 = smov 31   ;;  %s2912_s22 = smov 32  }
   0x3   :  { %88 = vperm.xlu1 %2814, %v70_v3   ;;  %1619 = vmatprep.mubr.bf16.mxu1 %v6937_v2  ;;  %v2877_v10 = vld [vmem:[%s6927_s2] sm:$0xff]   ;;  %v3031_v13 = vld [vmem:[%s6928_s6 + $0x8] sm:$0xff]  ;;  %v2895_v21 = vmov 2   ;;  %v2896_v22 = vmov 11   ;;  %v6943_v23 = vmov 3   ;;  %v2898_v24 = vmov 13  }
   0x4   :  { %2731 = vmatprep.subr.msk.bf16.mxu0 %vm128_vm0, %v2730_v4  ;;  %v130_v9 = vsel %vm128_vm0, %v2729_v6, 0  ;;  %v1729_v12 = vsel %vm128_vm0, %v2738_v7, 0  ;;  %98 = vperm.xlu0 %2813, %v72_v11   ;;  %v2878_v16 = vld [vmem:[%s6927_s2 + $0x8] sm:$0xff]   ;;  %v3044_v17 = vld [vmem:[%s6928_s6] sm:$0xff]  ;;  %v2899_v25 = vmov 4   ;;  %v2900_v26 = vmov 14  }
   0x5   :  { %136 = vmatpush1.bf16.msra.mxu0 %v130_v9  ;;  %v6949_v27 = vmov 5   ;;  %v3073_v28 = vld [vmem:[%s6929_s4] sm:$0xff]  ;;  %v6945_v29 = vmov 6   ;;  %v6941_v30 = vmov 7   ;;  %v6939_v31 = vmov 8   ;;  %v3096_v33 = vld [vmem:[%s6929_s4 + $0x8] sm:$0xff] }
   0x6   :  { %2740 = vmatprep.subr.msk.bf16.mxu0 %vm128_vm0, %v2739_v5  ;;  %v2905_v32 = vmov 16   ;;  %v2906_v34 = vmov 15   ;;  %v6944_v35 = vmov 17   ;;  %s2908_s4 = smov 127   ;;  %s2913_s23 = smov 18  }
   0x7   :  { %93 = vperm.xlu1 %2814, %v71_v8   ;;  %s2914_s24 = smov 16   ;;  %s2915_s0 = smov 30  }
   0x8   :  { %2732 = vmatmul.mubr.msk.bf16.vlgmr.msra.gmra.mrb[0].mxu0 %vm7095_vm1, %v2877_v10  ;;  %103 = vperm.xlu0 %2813, %v73_v14   ;;  %s2916_s25 = smov 14   ;;  %s2917_s26 = smov 1  }
   0x9   :  { %177 = vmatprep.mubr.bf16.mxu0 %v6937_v2  ;;  %1735 = vmatpush1.bf16.msra.mxu0 %v1729_v12  ;;  %s2918_s27 = smov 17   ;;  %s7029_s28 = smov 126  }
   0xa   :  { %s2920_s29 = smov 15   ;;  %s2921_s30 = smov 2  }
   0xb   :  { %2816 = vset.pattern.permute.xlu1 %v2891_v15  ;;  %s7027_s12 = smov 114   ;;  %s2924_s13 = smov 113  }
   0xc   :  { %585 = vperm.xlu1 %2816, %v3031_v13   ;;  %2815 = vset.pattern.permute.xlu0 %v2891_v15  ;;  %s7059_s14 = smov 112   ;;  %s2928_s15 = smov 111  }
   0xd   :  { %580 = vperm.xlu0 %2815, %v3044_v17   ;;  %s7035_s16 = smov 110   ;;  %s7054_s2 = smov 98  }
   0xe   :  { %s7057_s3 = smov 97   ;;  %s2935_s17 = smov 96  }
   0xf   :  { %s2936_s18 = smov 95  }
  0x10   :  { %2817 = vset.pattern.permute.xlu1 %v6937_v2  ;;  %2733 = vmatmul.mubr.msk.bf16.gmra.mrb[4].mxu0 %vm7095_vm1, %v2878_v16 }
  0x11   :  { %621 = vperm.xlu1 %2817, %v3044_v17   ;;  %1766 = vmatprep.mubr.bf16.mxu0 %v6937_v2 }
  0x12   :  { %2827 = vset.pattern.permute.xlu0 %v2893_v19 }
  0x13   :  { %985 = vperm.xlu0 %2827, %v3031_v13  }
  0x15   :  { %2818 = vset.pattern.permute.xlu1 %v2892_v18 }
  0x16   :  { %665 = vperm.xlu1 %2818, %v3044_v17  }
  0x17   :  { %2828 = vset.pattern.permute.xlu0 %v2894_v20 }
  0x18   :  { %2741 = vmatmul.mubr.msk.bf16.vlgmr.msra.gmra.mrb[8].mxu0 %vm7095_vm1, %v2877_v10  ;;  %1025 = vperm.xlu0 %2828, %v3044_v17  }
  0x19   :  { %1776 = vmatprep.mubr.bf16.mxu0 %v6937_v2 }
  0x1a   :  { %669 = vperm.xlu1 %2818, %v3031_v13  }
  0x1c   :  { %2831 = vset.pattern.permute.xlu0 %v2896_v22 }
  0x1d   :  { %1061 = vperm.xlu0 %2831, %v3031_v13  }
  0x1e   :  { %2819 = vset.pattern.permute.xlu1 %v2895_v21 }
  0x1f   :  { %713 = vperm.xlu1 %2819, %v3031_v13  }
  0x20   :  { %2742 = vmatmul.mubr.msk.bf16.gmra.mrb[12].mxu0 %vm7095_vm1, %v2878_v16 }
  0x21   :  { %2832 = vset.pattern.permute.xlu0 %v2898_v24 }
  0x22   :  { %1089 = vperm.xlu0 %2832, %v3044_v17  }
  0x23   :  { %2820 = vset.pattern.permute.xlu1 %v6943_v23 }
  0x24   :  { %753 = vperm.xlu1 %2820, %v3044_v17  }
  0x26   :  { %2835 = vset.pattern.permute.xlu0 %v2900_v26 }
  0x27   :  { %1137 = vperm.xlu0 %2835, %v3031_v13  }
  0x28   :  { %2821 = vset.pattern.permute.xlu1 %v2899_v25 }
  0x29   :  { %801 = vperm.xlu1 %2821, %v3031_v13  }
  0x2b   :  { %2836 = vset.pattern.permute.xlu0 %v2899_v25 }
  0x2c   :  { %797 = vperm.xlu0 %2836, %v3044_v17  }
  0x2d   :  { %2822 = vset.pattern.permute.xlu1 %v6949_v27 }
  0x2e   :  { %841 = vperm.xlu1 %2822, %v3044_v17  }
  0x30   :  { %190 = vperm.xlu0 %2836, %v3073_v28  }
  0x32   :  { %2823 = vset.pattern.permute.xlu1 %v6945_v29 }
  0x33   :  { %877 = vperm.xlu1 %2823, %v3031_v13  }
  0x34   :  { %2840 = vset.pattern.permute.xlu0 %v2892_v18 }
  0x35   :  { %277 = vperm.xlu0 %2840, %v3073_v28  }
  0x37   :  { %2824 = vset.pattern.permute.xlu1 %v6941_v30 }
  0x38   :  { %905 = vperm.xlu1 %2824, %v3044_v17  }
  0x39   :  { %2843 = vset.pattern.permute.xlu0 %v2905_v32 }
  0x3a   :  { %1213 = vperm.xlu0 %2843, %v3031_v13  }
  0x3c   :  { %2825 = vset.pattern.permute.xlu1 %v6939_v31  ;;  %v6947_v31 = vmov 18  }
  0x3d   :  { %941 = vperm.xlu1 %2825, %v3031_v13  }
  0x3e   :  { %2844 = vset.pattern.permute.xlu0 %v2895_v21 }
  0x3f   :  { %709 = vperm.xlu0 %2844, %v3044_v17  }
  0x41   :  { %2826 = vset.pattern.permute.xlu1 %v2893_v19 }
  0x42   :  { %981 = vperm.xlu1 %2826, %v3044_v17  }
  0x43   :  { %321 = vperm.xlu0 %2844, %v3073_v28  }
  0x46   :  { %2829 = vset.pattern.permute.xlu1 %v2894_v20 }
  0x47   :  { %1029 = vperm.xlu1 %2829, %v3031_v13   ;;  %2847 = vset.pattern.permute.xlu0 %v6944_v35 }
  0x4b   :  { %2830 = vset.pattern.permute.xlu1 %v2896_v22 }
  0x4c   :  { %1057 = vperm.xlu1 %2830, %v3044_v17  }
  0x50   :  { %2833 = vset.pattern.permute.xlu1 %v2898_v24 }
  0x51   :  { %1093 = vperm.xlu1 %2833, %v3031_v13  }
  0x55   :  { %2834 = vset.pattern.permute.xlu1 %v2900_v26 }
  0x56   :  { %1133 = vperm.xlu1 %2834, %v3044_v17  }
  0x5a   :  { %2837 = vset.pattern.permute.xlu1 %v2899_v25 }
  0x5b   :  { %195 = vperm.xlu1 %2837, %v3096_v33  }
  0x5f   :  { %2838 = vset.pattern.permute.xlu1 %v6937_v2 }
  0x60   :  { %233 = vperm.xlu1 %2838, %v3073_v28  }
  0x64   :  { %2839 = vset.pattern.permute.xlu1 %v2906_v34 }
  0x65   :  { %1177 = vperm.xlu1 %2839, %v3044_v17  }
  0x69   :  { %1181 = vperm.xlu1 %2839, %v3031_v13  }
  0x6d   :  { %2841 = vset.pattern.permute.xlu1 %v2892_v18 }
  0x6e   :  { %281 = vperm.xlu1 %2841, %v3096_v33  }
  0x72   :  { %2842 = vset.pattern.permute.xlu1 %v2905_v32 }
  0x73   :  { %1209 = vperm.xlu1 %2842, %v3044_v17  }
  0x77   :  { %2845 = vset.pattern.permute.xlu1 %v2895_v21 }
  0x82   :  { %v3108_v36 = vpop.permute.xlu1 %88 }
  0x83   :  { %v3126_v45 = vpop.permute.xlu0 %98 }
  0x86   :  { %v3110_v37 = vpop.permute.xlu1 %93 }
  0x87   :  { %v3200_v3 = vpop.permute.xlu0 %103 }
  0x8b   :  { %v3112_v38 = vpop.permute.xlu1 %585 }
  0x8c   :  { %v3215_v6 = vpop.permute.xlu0 %580 }
  0x8d   :  { %7461 = vst [vmem:[#allocation12_spill] sm:$0xff] %v3215_v6 }
  0x90   :  { %v3116_v40 = vpop.permute.xlu1 %621 }
  0x91   :  { %7452 = vst [vmem:[#allocation3_spill] sm:$0xff] %v3116_v40 }
  0x92   :  { %v3227_v8 = vpop.permute.xlu0 %985 }
  0x93   :  { %7463 = vst [vmem:[#allocation14_spill] sm:$0xff] %v3227_v8 }
  0x95   :  { %v3124_v44 = vpop.permute.xlu1 %665 }
  0x96   :  { %7453 = vst [vmem:[#allocation4_spill] sm:$0xff] %v3124_v44 }
  0x97   :  { %v3235_v10 = vpop.permute.xlu0 %1025 }
  0x98   :  { %7465 = vst [vmem:[#allocation16_spill] sm:$0xff] %v3235_v10 }
  0x99   :  { %v3137_v51 = vpop.permute.xlu1 %669 }
  0x9a   :  { %7454 = vst [vmem:[#allocation5_spill] sm:$0xff] %v3137_v51 }
  0x9c   :  { %v3251_v14 = vpop.permute.xlu0 %1061 }
  0x9d   :  { %7467 = vst [vmem:[#allocation18_spill] sm:$0xff] %v3251_v14  ;;  %v7487_v14 = vmov 6  }
  0x9e   :  { %v3152_v56 = vpop.permute.xlu1 %713 }
  0x9f   :  { %7455 = vst [vmem:[#allocation6_spill] sm:$0xff] %v3152_v56 }
  0xa1   :  { %v3259_v16 = vpop.permute.xlu0 %1089 }
  0xa2   :  { %7469 = vst [vmem:[#allocation20_spill] sm:$0xff] %v3259_v16 }
  0xa3   :  { %v3166_v59 = vpop.permute.xlu1 %753 }
  0xa4   :  { %7456 = vst [vmem:[#allocation7_spill] sm:$0xff] %v3166_v59 }
  0xa6   :  { %v3271_v19 = vpop.permute.xlu0 %1137 }
  0xa7   :  { %7471 = vst [vmem:[#allocation22_spill] sm:$0xff] %v3271_v19 }
  0xa8   :  { %v3178_v63 = vpop.permute.xlu1 %801 }
  0xa9   :  { %7457 = vst [vmem:[#allocation8_spill] sm:$0xff] %v3178_v63 }
  0xab   :  { %v3279_v21 = vpop.permute.xlu0 %797 }
  0xac   :  { %7473 = vst [vmem:[#allocation24_spill] sm:$0xff] %v3279_v21 }
  0xad   :  { %v3188_v0 = vpop.permute.xlu1 %841 }
  0xae   :  { %7458 = vst [vmem:[#allocation9_spill] sm:$0xff] %v3188_v0 }
  0xaf   :  { %v3292_v25 = vpop.permute.xlu0 %190 }
  0xb0   :  { %7476 = vst [vmem:[#allocation27_spill] sm:$0xff] %v3292_v25 }
  0xb2   :  { %v3194_v1 = vpop.permute.xlu1 %877 }
  0xb3   :  { %7459 = vst [vmem:[#allocation10_spill] sm:$0xff] %v3194_v1  ;;  %v7492_v1 = vmov 3  }
  0xb4   :  { %v3298_v26 = vpop.permute.xlu0 %277 }
  0xb5   :  { %7477 = vst [vmem:[#allocation28_spill] sm:$0xff] %v3298_v26 }
  0xb7   :  { %v3209_v5 = vpop.permute.xlu1 %905 }
  0xb8   :  { %7460 = vst [vmem:[#allocation11_spill] sm:$0xff] %v3209_v5 }
  0xbc   :  { %v3217_v7 = vpop.permute.xlu1 %941 }
  0xbd   :  { %7462 = vst [vmem:[#allocation13_spill] sm:$0xff] %v3217_v7 }
  0xc1   :  { %v3229_v9 = vpop.permute.xlu1 %981 }
  0xc2   :  { %7464 = vst [vmem:[#allocation15_spill] sm:$0xff] %v3229_v9  ;;  %v7502_v9 = vmov 18  }
  0xc6   :  { %v3237_v11 = vpop.permute.xlu1 %1029 }
  0xc7   :  { %7466 = vst [vmem:[#allocation17_spill] sm:$0xff] %v3237_v11 }
  0xcb   :  { %v3253_v15 = vpop.permute.xlu1 %1057 }
  0xcc   :  { %7468 = vst [vmem:[#allocation19_spill] sm:$0xff] %v3253_v15  ;;  %v7500_v15 = vmov 7  }
  0xd0   :  { %v3261_v18 = vpop.permute.xlu1 %1093 }
  0xd1   :  { %7470 = vst [vmem:[#allocation21_spill] sm:$0xff] %v3261_v18 }
  0xd5   :  { %v3273_v20 = vpop.permute.xlu1 %1133 }
  0xd6   :  { %7472 = vst [vmem:[#allocation23_spill] sm:$0xff] %v3273_v20 }
  0xda   :  { %v3281_v22 = vpop.permute.xlu1 %195 }
  0xdb   :  { %v3114_v39 = vpop.f32.mrb[0].mxu0  ;;  %7474 = vst [vmem:[#allocation25_spill] sm:$0xff] %v3281_v22 }
  0xdc   :  { %v3118_v41 = vpop.f32.mrb[1].mxu0  ;;  %v3407_v7 = vadd.f32 %v3114_v39, %v3108_v36 }
  0xdd   :  { %v3120_v42 = vpop.f32.mrb[2].mxu0  ;;  %v3304_v34 = vadd.f32 %v3118_v41, %v3108_v36 }
  0xde   :  { %v3122_v43 = vpop.f32.mrb[3].mxu0  ;;  %v3420_v63 = vadd.f32 %v3120_v42, %v3110_v37 }
  0xdf   :  { %v3290_v24 = vpop.permute.xlu1 %233  ;;  %v3432_v56 = vadd.f32 %v3122_v43, %v3110_v37 }
  0xe0   :  { %7475 = vst [vmem:[#allocation26_spill] sm:$0xff] %v3290_v24  ;;  %v6961_v24 = vmov 19  }
  0xe3   :  { %v179_v46 = vpop.f32.mrb[4].mxu0 }
  0xe4   :  { %v3129_v47 = vadd.f32 %v179_v46, %v3126_v45  ;;  %v181_v48 = vpop.f32.mrb[5].mxu0  ;;  %v3300_v32 = vpop.permute.xlu1 %1177 }
  0xe5   :  { %v183_v49 = vpop.f32.mrb[6].mxu0  ;;  %v3140_v52 = vadd.f32 %v181_v48, %v3126_v45  ;;  %7478 = vst [vmem:[#allocation29_spill] sm:$0xff] %v3300_v32  ;;  %v3312_v46 = vpop.permute.xlu0 %1213 }
  0xe6   :  { %v3131_v50 = vpop.f32.mrb[7].mxu0  ;;  %1072 = vrot.lane.b32.xlu0 %v3129_v47, %s2908_s4  ;;  %592 = vrot.lane.b32.xlu1 %v3129_v47, %s2909_s19  ;;  %v3203_v4 = vadd.f32 %v183_v49, %v3200_v3  ;;  %7479 = vst [vmem:[#allocation30_spill] sm:$0xff] %v3312_v46 }
  0xe7   :  { %v3245_v12 = vadd.f32 %v3131_v50, %v3200_v3 }
  0xe8   :  { %v3314_v48 = vpop.permute.xlu1 %1181 }
  0xe9   :  { %7480 = vst [vmem:[#allocation31_spill] sm:$0xff] %v3314_v48  ;;  %v3322_v41 = vpop.permute.xlu0 %709 }
  0xea   :  { %640 = vrot.lane.b32.xlu0 %v3140_v52, %s2910_s20  ;;  %636 = vrot.lane.b32.xlu1 %v3129_v47, %s2910_s20  ;;  %7481 = vst [vmem:[#allocation32_spill] sm:$0xff] %v3322_v41 }
  0xeb   :  { %v3146_v53 = vpop.f32.mrb[8].mxu0 }
  0xec   :  { %v3148_v54 = vpop.f32.mrb[9].mxu0 }
  0xed   :  { %v3150_v55 = vpop.f32.mrb[10].mxu0  ;;  %v3324_v49 = vpop.permute.xlu1 %281 }
  0xee   :  { %728 = vrot.lane.b32.xlu0 %v3140_v52, %s2911_s21  ;;  %680 = vrot.lane.b32.xlu1 %v3129_v47, %s2912_s22  ;;  %v3158_v57 = vpop.f32.mrb[11].mxu0  ;;  %7482 = vst [vmem:[#allocation33_spill] sm:$0xff] %v3324_v49  ;;  %v3331_v50 = vpop.permute.xlu0 %321 }
  0xef   :  { %7483 = vst [vmem:[#allocation34_spill] sm:$0xff] %v3331_v50 }
  0xf2   :  { %816 = vrot.lane.b32.xlu0 %v3140_v52, %s2913_s23  ;;  %724 = vrot.lane.b32.xlu1 %v3129_v47, %s2911_s21  ;;  %v3333_v2 = vpop.permute.xlu1 %1209 }
  0xf3   :  { %v3164_v58 = vpop.f32.mrb[12].mxu0  ;;  %7484 = vst [vmem:[#allocation35_spill] sm:$0xff] %v3333_v2 }
  0xf4   :  { %v3168_v60 = vpop.f32.mrb[13].mxu0 }
  0xf5   :  { %v3170_v61 = vpop.f32.mrb[14].mxu0 }
  0xf6   :  { %v3172_v62 = vpop.f32.mrb[15].mxu0  ;;  %892 = vrot.lane.b32.xlu0 %v3140_v52, %s2914_s24  ;;  %768 = vrot.lane.b32.xlu1 %v3129_v47, %s2915_s0 }
  0xfa   :  { %956 = vrot.lane.b32.xlu0 %v3140_v52, %s2916_s25  ;;  %812 = vrot.lane.b32.xlu1 %v3129_v47, %s2913_s23 }
  0xfe   :  { %1044 = vrot.lane.b32.xlu0 %v3140_v52, %s2917_s26  ;;  %856 = vrot.lane.b32.xlu1 %v3129_v47, %s2918_s27 }
 0x102   :  { %1076 = vrot.lane.b32.xlu0 %v3140_v52, %s2908_s4  ;;  %888 = vrot.lane.b32.xlu1 %v3129_v47, %s2914_s24 }
 0x106   :  { %1108 = vrot.lane.b32.xlu0 %v3140_v52, %s7029_s28  ;;  %920 = vrot.lane.b32.xlu1 %v3129_v47, %s2920_s29 }
 0x10a   :  { %594 = vrot.lane.b32.xlu0 %v3203_v4, %s2909_s19  ;;  %952 = vrot.lane.b32.xlu1 %v3129_v47, %s2916_s25 }
 0x10e   :  { %682 = vrot.lane.b32.xlu0 %v3203_v4, %s2912_s22  ;;  %996 = vrot.lane.b32.xlu1 %v3129_v47, %s2921_s30 }
 0x112   :  { %770 = vrot.lane.b32.xlu0 %v3203_v4, %s2915_s0  ;;  %1040 = vrot.lane.b32.xlu1 %v3129_v47, %s2917_s26 }
 0x116   :  { %858 = vrot.lane.b32.xlu0 %v3203_v4, %s2918_s27  ;;  %1104 = vrot.lane.b32.xlu1 %v3129_v47, %s7029_s28 }
 0x11a   :  { %922 = vrot.lane.b32.xlu0 %v3203_v4, %s2920_s29  ;;  %596 = vrot.lane.b32.xlu1 %v3140_v52, %s2909_s19 }
 0x11e   :  { %998 = vrot.lane.b32.xlu0 %v3203_v4, %s2921_s30  ;;  %684 = vrot.lane.b32.xlu1 %v3140_v52, %s2912_s22 }
 0x122   :  { %598 = vrot.lane.b32.xlu0 %v3245_v12, %s2909_s19  ;;  %772 = vrot.lane.b32.xlu1 %v3140_v52, %s2915_s0 }
 0x126   :  { %686 = vrot.lane.b32.xlu0 %v3245_v12, %s2912_s22  ;;  %860 = vrot.lane.b32.xlu1 %v3140_v52, %s2918_s27 }
 0x12a   :  { %774 = vrot.lane.b32.xlu0 %v3245_v12, %s2915_s0  ;;  %924 = vrot.lane.b32.xlu1 %v3140_v52, %s2920_s29 }
 0x12e   :  { %862 = vrot.lane.b32.xlu0 %v3245_v12, %s2918_s27  ;;  %1000 = vrot.lane.b32.xlu1 %v3140_v52, %s2921_s30 }
 0x132   :  { %926 = vrot.lane.b32.xlu0 %v3245_v12, %s2920_s29  ;;  %638 = vrot.lane.b32.xlu1 %v3203_v4, %s2910_s20 }
 0x136   :  { %1002 = vrot.lane.b32.xlu0 %v3245_v12, %s2921_s30  ;;  %726 = vrot.lane.b32.xlu1 %v3203_v4, %s2911_s21 }
 0x13a   :  { %1245 = vperm.xlu0 %2847, %v3031_v13   ;;  %814 = vrot.lane.b32.xlu1 %v3203_v4, %s2913_s23 }
 0x13e   :  { %2848 = vset.pattern.permute.xlu0 %v6943_v23  ;;  %890 = vrot.lane.b32.xlu1 %v3203_v4, %s2914_s24 }
 0x13f   :  { %757 = vperm.xlu0 %2848, %v3031_v13  }
 0x142   :  { %954 = vrot.lane.b32.xlu1 %v3203_v4, %s2916_s25 }
 0x143   :  { %206 = vrot.lane.b32.xlu0 %v3304_v34, %s2918_s27 }
 0x146   :  { %1042 = vrot.lane.b32.xlu1 %v3203_v4, %s2917_s26 }
 0x147   :  { %1148 = vrot.lane.b32.xlu0 %v3129_v47, %s7027_s12 }
 0x14a   :  { %1074 = vrot.lane.b32.xlu1 %v3203_v4, %s2908_s4 }
 0x14b   :  { %1152 = vrot.lane.b32.xlu0 %v3140_v52, %s7027_s12 }
 0x14e   :  { %1106 = vrot.lane.b32.xlu1 %v3203_v4, %s7029_s28 }
 0x14f   :  { %365 = vperm.xlu0 %2848, %v3073_v28  }
 0x152   :  { %642 = vrot.lane.b32.xlu1 %v3245_v12, %s2910_s20 }
 0x153   :  { %2851 = vset.pattern.permute.xlu0 %v6947_v31 }
 0x154   :  { %1277 = vperm.xlu0 %2851, %v3031_v13  }
 0x156   :  { %730 = vrot.lane.b32.xlu1 %v3245_v12, %s2911_s21 }
 0x158   :  { %v3339_v30 = vpop.permute.xlu0 %1072  ;;  %v3341_v23 = vpop.permute.xlu1 %592  ;;  %2852 = vset.pattern.permute.xlu0 %v6949_v27 }
 0x159   :  { %845 = vperm.xlu0 %2852, %v3031_v13  }
 0x15a   :  { %818 = vrot.lane.b32.xlu1 %v3245_v12, %s2913_s23 }
 0x15c   :  { %v3347_v35 = vpop.permute.xlu0 %640  ;;  %v3349_v29 = vpop.permute.xlu1 %636 }
 0x15d   :  { %252 = vrot.lane.b32.xlu0 %v3304_v34, %s2914_s24 }
 0x15e   :  { %894 = vrot.lane.b32.xlu1 %v3245_v12, %s2914_s24 }
 0x160   :  { %v3355_v31 = vpop.permute.xlu0 %728  ;;  %v3357_v46 = vpop.permute.xlu1 %680 }
 0x161   :  { %1192 = vrot.lane.b32.xlu0 %v3129_v47, %s2924_s13 }
 0x162   :  { %958 = vrot.lane.b32.xlu1 %v3245_v12, %s2916_s25 }
 0x164   :  { %v3363_v27 = vpop.permute.xlu0 %816  ;;  %v3365_v49 = vpop.permute.xlu1 %724 }
 0x165   :  { %1196 = vrot.lane.b32.xlu0 %v3140_v52, %s2924_s13 }
 0x166   :  { %1046 = vrot.lane.b32.xlu1 %v3245_v12, %s2917_s26 }
 0x168   :  { %v3371_v50 = vpop.permute.xlu0 %892  ;;  %v3373_v48 = vpop.permute.xlu1 %768 }
 0x169   :  { %409 = vperm.xlu0 %2852, %v3073_v28  }
 0x16a   :  { %1078 = vrot.lane.b32.xlu1 %v3245_v12, %s2908_s4 }
 0x16c   :  { %v3378_v26 = vpop.permute.xlu0 %956  ;;  %v3380_v2 = vpop.permute.xlu1 %812 }
 0x16d   :  { %2855 = vset.pattern.permute.xlu0 %v6961_v24  ;;  %v7488_v24 = vmov 17  }
 0x16e   :  { %1110 = vrot.lane.b32.xlu1 %v3245_v12, %s7029_s28  ;;  %1321 = vperm.xlu0 %2855, %v3031_v13  }
 0x170   :  { %v3386_v19 = vpop.permute.xlu0 %1044  ;;  %v3388_v18 = vpop.permute.xlu1 %856 }
 0x171   :  { %7485 = vst [vmem:[#allocation36_spill] sm:$0xff] %v3386_v19  ;;  %7486 = vst [vmem:[#allocation37_spill] sm:$0xff] %v3388_v18  ;;  %v6975_v18 = vmov 20  }
 0x172   :  { %325 = vperm.xlu1 %2845, %v3096_v33   ;;  %2856 = vset.pattern.permute.xlu0 %v7487_v14 }
 0x173   :  { %873 = vperm.xlu0 %2856, %v3044_v17  }
 0x174   :  { %v3393_v8 = vpop.permute.xlu0 %1076  ;;  %v3395_v32 = vpop.permute.xlu1 %888 }
 0x176   :  { %2846 = vset.pattern.permute.xlu1 %v7488_v24 }
 0x177   :  { %1241 = vperm.xlu1 %2846, %v3044_v17   ;;  %296 = vrot.lane.b32.xlu0 %v3304_v34, %s2920_s29 }
 0x178   :  { %v3401_v51 = vpop.permute.xlu0 %1108  ;;  %v3403_v11 = vpop.permute.xlu1 %920 }
 0x179   :  { %7489 = vst [vmem:[#allocation38_spill] sm:$0xff] %v3401_v51  ;;  %7490 = vst [vmem:[#allocation39_spill] sm:$0xff] %v3403_v11  ;;  %v3917_v51 = vadd.f32 %v3146_v53, %v3108_v36  ;;  %v3934_v53 = vadd.f32 %v3150_v55, %v3110_v37 }
 0x17b   :  { %202 = vrot.lane.b32.xlu1 %v3407_v7, %s2918_s27  ;;  %1224 = vrot.lane.b32.xlu0 %v3129_v47, %s7059_s14  ;;  %7601 = vst [vmem:[#allocation135_spill] sm:$0xff] %v3917_v51  ;;  %7603 = vst [vmem:[#allocation137_spill] sm:$0xff] %v3934_v53  ;;  %v3938_v51 = vadd.f32 %v3158_v57, %v3110_v37  ;;  %v7630_v53 = vmov 0 }
 0x17c   :  { %v3413_v24 = vpop.permute.xlu0 %594  ;;  %v3415_v10 = vpop.permute.xlu1 %952  ;;  %2849 = vset.pattern.permute.xlu1 %v7492_v1 }
 0x17d   :  { %7491 = vst [vmem:[#allocation40_spill] sm:$0xff] %v3413_v24  ;;  %7604 = vst [vmem:[#allocation138_spill] sm:$0xff] %v3938_v51 }
 0x17f   :  { %204 = vrot.lane.b32.xlu1 %v3420_v63, %s2918_s27  ;;  %1228 = vrot.lane.b32.xlu0 %v3140_v52, %s7059_s14 }
 0x180   :  { %v3426_v39 = vpop.permute.xlu0 %682  ;;  %v3428_v11 = vpop.permute.xlu1 %996 }
 0x181   :  { %7493 = vst [vmem:[#allocation41_spill] sm:$0xff] %v3426_v39  ;;  %7494 = vst [vmem:[#allocation42_spill] sm:$0xff] %v3428_v11 }
 0x183   :  { %208 = vrot.lane.b32.xlu1 %v3432_v56, %s2918_s27  ;;  %453 = vperm.xlu0 %2856, %v3073_v28  }
 0x184   :  { %v3437_v42 = vpop.permute.xlu0 %770  ;;  %v3439_v1 = vpop.permute.xlu1 %1040 }
 0x185   :  { %7495 = vst [vmem:[#allocation43_spill] sm:$0xff] %v3437_v42  ;;  %7496 = vst [vmem:[#allocation44_spill] sm:$0xff] %v3439_v1 }
 0x187   :  { %1150 = vrot.lane.b32.xlu1 %v3203_v4, %s7027_s12  ;;  %2859 = vset.pattern.permute.xlu0 %v6975_v18 }
 0x188   :  { %v3444_v11 = vpop.permute.xlu0 %858  ;;  %v3446_v20 = vpop.permute.xlu1 %1104  ;;  %1365 = vperm.xlu0 %2859, %v3031_v13  }
 0x189   :  { %7497 = vst [vmem:[#allocation45_spill] sm:$0xff] %v3444_v11  ;;  %7498 = vst [vmem:[#allocation46_spill] sm:$0xff] %v3446_v20 }
 0x18b   :  { %1154 = vrot.lane.b32.xlu1 %v3245_v12, %s7027_s12 }
 0x18c   :  { %v3451_v43 = vpop.permute.xlu0 %922  ;;  %v3453_v42 = vpop.permute.xlu1 %596  ;;  %2860 = vset.pattern.permute.xlu0 %v7500_v15 }
 0x18d   :  { %7499 = vst [vmem:[#allocation47_spill] sm:$0xff] %v3451_v43  ;;  %909 = vperm.xlu0 %2860, %v3031_v13  }
 0x18f   :  { %369 = vperm.xlu1 %2849, %v3096_v33  }
 0x190   :  { %v3458_v18 = vpop.permute.xlu1 %684  ;;  %v3460_v11 = vpop.permute.xlu0 %998 }
 0x191   :  { %7501 = vst [vmem:[#allocation48_spill] sm:$0xff] %v3460_v11  ;;  %340 = vrot.lane.b32.xlu0 %v3304_v34, %s2917_s26  ;;  %v7505_v11 = vmov 5  }
 0x193   :  { %2850 = vset.pattern.permute.xlu1 %v7502_v9 }
 0x194   :  { %v3465_v24 = vpop.permute.xlu1 %772  ;;  %1273 = vperm.xlu1 %2850, %v3044_v17   ;;  %v3470_v43 = vpop.permute.xlu0 %598 }
 0x195   :  { %1256 = vrot.lane.b32.xlu0 %v3129_v47, %s2928_s15  ;;  %7503 = vst [vmem:[#allocation49_spill] sm:$0xff] %v3470_v43 }
 0x198   :  { %v3472_v39 = vpop.permute.xlu1 %860  ;;  %248 = vrot.lane.b32.xlu1 %v3407_v7, %s2914_s24  ;;  %v3483_v21 = vpop.permute.xlu0 %686 }
 0x199   :  { %7504 = vst [vmem:[#allocation50_spill] sm:$0xff] %v3472_v39  ;;  %2853 = vset.pattern.permute.xlu1 %v7505_v11  ;;  %1260 = vrot.lane.b32.xlu0 %v3140_v52, %s2928_s15  ;;  %7507 = vst [vmem:[#allocation52_spill] sm:$0xff] %v3483_v21  ;;  %v6989_v39 = vmov 21   ;;  %v7511_v21 = vmov 8  }
 0x19c   :  { %v3479_v9 = vpop.permute.xlu1 %924  ;;  %250 = vrot.lane.b32.xlu1 %v3420_v63, %s2914_s24  ;;  %v3491_v11 = vpop.permute.xlu0 %774 }
 0x19d   :  { %7506 = vst [vmem:[#allocation51_spill] sm:$0xff] %v3479_v9  ;;  %497 = vperm.xlu0 %2860, %v3073_v28   ;;  %7509 = vst [vmem:[#allocation54_spill] sm:$0xff] %v3491_v11 }
 0x1a0   :  { %v3486_v43 = vpop.permute.xlu1 %1000  ;;  %254 = vrot.lane.b32.xlu1 %v3432_v56, %s2914_s24  ;;  %v3504_v20 = vpop.permute.xlu0 %862 }
 0x1a1   :  { %7508 = vst [vmem:[#allocation53_spill] sm:$0xff] %v3486_v43  ;;  %2863 = vset.pattern.permute.xlu0 %v6989_v39  ;;  %7513 = vst [vmem:[#allocation57_spill] sm:$0xff] %v3504_v20 }
 0x1a2   :  { %1409 = vperm.xlu0 %2863, %v3031_v13  }
 0x1a4   :  { %v3494_v9 = vpop.permute.xlu1 %638  ;;  %1194 = vrot.lane.b32.xlu1 %v3203_v4, %s2924_s13 }
 0x1a5   :  { %7510 = vst [vmem:[#allocation55_spill] sm:$0xff] %v3494_v9  ;;  %v3511_v9 = vpop.permute.xlu0 %926 }
 0x1a6   :  { %2864 = vset.pattern.permute.xlu0 %v7511_v21  ;;  %7515 = vst [vmem:[#allocation59_spill] sm:$0xff] %v3511_v9 }
 0x1a7   :  { %937 = vperm.xlu0 %2864, %v3044_v17  }
 0x1a8   :  { %v3500_v43 = vpop.permute.xlu1 %726  ;;  %1198 = vrot.lane.b32.xlu1 %v3245_v12, %s2924_s13 }
 0x1a9   :  { %7512 = vst [vmem:[#allocation56_spill] sm:$0xff] %v3500_v43  ;;  %v7517_v43 = vmov 19  }
 0x1ab   :  { %384 = vrot.lane.b32.xlu0 %v3304_v34, %s2908_s4 }
 0x1ac   :  { %v3508_v39 = vpop.permute.xlu1 %814  ;;  %413 = vperm.xlu1 %2853, %v3096_v33  }
 0x1ad   :  { %7514 = vst [vmem:[#allocation58_spill] sm:$0xff] %v3508_v39  ;;  %v3523_v39 = vpop.permute.xlu0 %1002 }
 0x1ae   :  { %7519 = vst [vmem:[#allocation62_spill] sm:$0xff] %v3523_v39  ;;  %v3852_v39 = vmul.f32 %v3281_v22, %v3420_v63 }
 0x1af   :  { %1288 = vrot.lane.b32.xlu0 %v3129_v47, %s7035_s16 }
 0x1b0   :  { %v3515_v11 = vpop.permute.xlu1 %890  ;;  %2854 = vset.pattern.permute.xlu1 %v7517_v43  ;;  %7591 = vst [vmem:[#allocation129_spill] sm:$0xff] %v3852_v39  ;;  %v3885_v39 = vmul.f32 %v3215_v6, %v3129_v47 }
 0x1b1   :  { %7516 = vst [vmem:[#allocation60_spill] sm:$0xff] %v3515_v11  ;;  %1317 = vperm.xlu1 %2854, %v3044_v17   ;;  %v6999_v11 = vmov 22  }
 0x1b3   :  { %1292 = vrot.lane.b32.xlu0 %v3140_v52, %s7035_s16 }
 0x1b4   :  { %v3521_v20 = vpop.permute.xlu1 %954 }
 0x1b5   :  { %7518 = vst [vmem:[#allocation61_spill] sm:$0xff] %v3521_v20  ;;  %292 = vrot.lane.b32.xlu1 %v3407_v7, %s2920_s29 }
 0x1b6   :  { %2857 = vset.pattern.permute.xlu1 %v7487_v14 }
 0x1b7   :  { %541 = vperm.xlu0 %2864, %v3073_v28  }
 0x1b8   :  { %v3529_v9 = vpop.permute.xlu1 %1042 }
 0x1b9   :  { %7520 = vst [vmem:[#allocation63_spill] sm:$0xff] %v3529_v9  ;;  %294 = vrot.lane.b32.xlu1 %v3420_v63, %s2920_s29  ;;  %v3533_v43 = vpop.permute.xlu0 %1245 }
 0x1ba   :  { %7521 = vst [vmem:[#allocation64_spill] sm:$0xff] %v3533_v43 }
 0x1bb   :  { %2867 = vset.pattern.permute.xlu0 %v6999_v11  ;;  %v7004_v11 = vmov 23  }
 0x1bc   :  { %v3536_v20 = vpop.permute.xlu1 %1074  ;;  %1453 = vperm.xlu0 %2867, %v3031_v13  }
 0x1bd   :  { %7522 = vst [vmem:[#allocation65_spill] sm:$0xff] %v3536_v20  ;;  %298 = vrot.lane.b32.xlu1 %v3432_v56, %s2920_s29 }
 0x1be   :  { %v3541_v14 = vpop.permute.xlu0 %757 }
 0x1bf   :  { %7523 = vst [vmem:[#allocation66_spill] sm:$0xff] %v3541_v14 }
 0x1c0   :  { %v3543_v28 = vpop.permute.xlu1 %1106  ;;  %428 = vrot.lane.b32.xlu0 %v3304_v34, %s2924_s13 }
 0x1c1   :  { %7524 = vst [vmem:[#allocation67_spill] sm:$0xff] %v3543_v28  ;;  %1226 = vrot.lane.b32.xlu1 %v3203_v4, %s7059_s14  ;;  %2868 = vset.pattern.permute.xlu0 %v7004_v11  ;;  %v7530_v11 = vmov 20  }
 0x1c2   :  { %v3549_v43 = vpop.permute.xlu0 %206 }
 0x1c3   :  { %7525 = vst [vmem:[#allocation68_spill] sm:$0xff] %v3549_v43 }
 0x1c4   :  { %v3552_v20 = vpop.permute.xlu1 %642  ;;  %1332 = vrot.lane.b32.xlu0 %v3129_v47, %s7054_s2 }
 0x1c5   :  { %7526 = vst [vmem:[#allocation69_spill] sm:$0xff] %v3552_v20  ;;  %1230 = vrot.lane.b32.xlu1 %v3245_v12, %s7059_s14 }
 0x1c6   :  { %v3558_v28 = vpop.permute.xlu0 %1148 }
 0x1c7   :  { %7527 = vst [vmem:[#allocation70_spill] sm:$0xff] %v3558_v28  ;;  %v7533_v28 = vmov 0  }
 0x1c8   :  { %v3560_v9 = vpop.permute.xlu1 %730  ;;  %1336 = vrot.lane.b32.xlu0 %v3140_v52, %s7054_s2 }
 0x1c9   :  { %7528 = vst [vmem:[#allocation71_spill] sm:$0xff] %v3560_v9  ;;  %457 = vperm.xlu1 %2857, %v3096_v33  }
 0x1ca   :  { %v3565_v43 = vpop.permute.xlu0 %1152 }
 0x1cb   :  { %7529 = vst [vmem:[#allocation72_spill] sm:$0xff] %v3565_v43 }
 0x1cc   :  { %1493 = vperm.xlu0 %2868, %v3044_v17   ;;  %v3571_v20 = vpop.permute.xlu1 %818 }
 0x1cd   :  { %2858 = vset.pattern.permute.xlu1 %v7530_v11  ;;  %7532 = vst [vmem:[#allocation74_spill] sm:$0xff] %v3571_v20 }
 0x1ce   :  { %v3569_v14 = vpop.permute.xlu0 %365  ;;  %1361 = vperm.xlu1 %2858, %v3044_v17  }
 0x1cf   :  { %7531 = vst [vmem:[#allocation73_spill] sm:$0xff] %v3569_v14 }
 0x1d0   :  { %2869 = vset.pattern.permute.xlu0 %v7533_v28  ;;  %v3581_v43 = vpop.permute.xlu1 %894 }
 0x1d1   :  { %625 = vperm.xlu0 %2869, %v3031_v13   ;;  %7535 = vst [vmem:[#allocation76_spill] sm:$0xff] %v3581_v43 }
 0x1d2   :  { %336 = vrot.lane.b32.xlu1 %v3407_v7, %s2917_s26 }
 0x1d3   :  { %v3578_v9 = vpop.permute.xlu0 %1277  ;;  %2861 = vset.pattern.permute.xlu1 %v7500_v15 }
 0x1d4   :  { %7534 = vst [vmem:[#allocation75_spill] sm:$0xff] %v3578_v9  ;;  %v3590_v14 = vpop.permute.xlu1 %958 }
 0x1d5   :  { %237 = vperm.xlu0 %2869, %v3096_v33   ;;  %7537 = vst [vmem:[#allocation78_spill] sm:$0xff] %v3590_v14  ;;  %v7544_v14 = vmov 21  }
 0x1d6   :  { %338 = vrot.lane.b32.xlu1 %v3420_v63, %s2917_s26 }
 0x1d8   :  { %v3586_v11 = vpop.permute.xlu0 %845  ;;  %v3602_v43 = vpop.permute.xlu1 %1046 }
 0x1d9   :  { %7536 = vst [vmem:[#allocation77_spill] sm:$0xff] %v3586_v11  ;;  %470 = vrot.lane.b32.xlu0 %v3420_v63, %s7059_s14  ;;  %7540 = vst [vmem:[#allocation81_spill] sm:$0xff] %v3602_v43 }
 0x1da   :  { %342 = vrot.lane.b32.xlu1 %v3432_v56, %s2917_s26 }
 0x1dc   :  { %v3594_v9 = vpop.permute.xlu0 %252 }
 0x1dd   :  { %7538 = vst [vmem:[#allocation79_spill] sm:$0xff] %v3594_v9  ;;  %474 = vrot.lane.b32.xlu0 %v3432_v56, %s7059_s14  ;;  %v3612_v9 = vpop.permute.xlu1 %1078 }
 0x1de   :  { %1258 = vrot.lane.b32.xlu1 %v3203_v4, %s2928_s15  ;;  %7542 = vst [vmem:[#allocation83_spill] sm:$0xff] %v3612_v9 }
 0x1e0   :  { %v3600_v15 = vpop.permute.xlu0 %1192 }
 0x1e1   :  { %7539 = vst [vmem:[#allocation80_spill] sm:$0xff] %v3600_v15  ;;  %1378 = vrot.lane.b32.xlu0 %v3203_v4, %s7057_s3  ;;  %v77_v15 = vld [vmem:[%s6930_s5 + $0x8] sm:$0xff]  ;;  %v3622_v20 = vpop.permute.xlu1 %1110 }
 0x1e2   :  { %1262 = vrot.lane.b32.xlu1 %v3245_v12, %s2928_s15  ;;  %7545 = vst [vmem:[#allocation85_spill] sm:$0xff] %v3622_v20 }
 0x1e4   :  { %v3608_v11 = vpop.permute.xlu0 %1196 }
 0x1e5   :  { %7541 = vst [vmem:[#allocation82_spill] sm:$0xff] %v3608_v11  ;;  %1382 = vrot.lane.b32.xlu0 %v3245_v12, %s7057_s3 }
 0x1e6   :  { %501 = vperm.xlu1 %2861, %v3096_v33  }
 0x1e8   :  { %v3618_v43 = vpop.permute.xlu0 %409 }
 0x1e9   :  { %7543 = vst [vmem:[#allocation84_spill] sm:$0xff] %v3618_v43  ;;  %563 = vperm.xlu0 %2869, %v77_v15  }
 0x1ea   :  { %2862 = vset.pattern.permute.xlu1 %v7544_v14 }
 0x1eb   :  { %1405 = vperm.xlu1 %2862, %v3044_v17  }
 0x1ed   :  { %v3624_v11 = vpop.permute.xlu0 %1321  ;;  %512 = vrot.lane.b32.xlu0 %v3407_v7, %s2928_s15 }
 0x1ee   :  { %7546 = vst [vmem:[#allocation86_spill] sm:$0xff] %v3624_v11 }
 0x1ef   :  { %380 = vrot.lane.b32.xlu1 %v3407_v7, %s2908_s4 }
 0x1f0   :  { %2865 = vset.pattern.permute.xlu1 %v7511_v21 }
 0x1f1   :  { %v3630_v9 = vpop.permute.xlu1 %325  ;;  %516 = vrot.lane.b32.xlu0 %v3304_v34, %s2928_s15 }
 0x1f2   :  { %7547 = vst [vmem:[#allocation87_spill] sm:$0xff] %v3630_v9  ;;  %v3635_v14 = vpop.permute.xlu0 %873 }
 0x1f3   :  { %7548 = vst [vmem:[#allocation88_spill] sm:$0xff] %v3635_v14  ;;  %382 = vrot.lane.b32.xlu1 %v3420_v63, %s2908_s4 }
 0x1f5   :  { %1420 = vrot.lane.b32.xlu0 %v3129_v47, %s2935_s17 }
 0x1f6   :  { %v3641_v15 = vpop.permute.xlu1 %1241  ;;  %v3643_v11 = vpop.permute.xlu0 %296 }
 0x1f7   :  { %7549 = vst [vmem:[#allocation89_spill] sm:$0xff] %v3641_v15  ;;  %7550 = vst [vmem:[#allocation90_spill] sm:$0xff] %v3643_v11  ;;  %386 = vrot.lane.b32.xlu1 %v3432_v56, %s2908_s4 }
 0x1f9   :  { %1424 = vrot.lane.b32.xlu0 %v3140_v52, %s2935_s17 }
 0x1fa   :  { %v3649_v21 = vpop.permute.xlu0 %1224  ;;  %v3651_v43 = vpop.permute.xlu1 %202 }
 0x1fb   :  { %7551 = vst [vmem:[#allocation91_spill] sm:$0xff] %v3649_v21  ;;  %7552 = vst [vmem:[#allocation92_spill] sm:$0xff] %v3651_v43  ;;  %1290 = vrot.lane.b32.xlu1 %v3203_v4, %s7035_s16  ;;  %v80_v43 = vld [vmem:[%s6931_s7] sm:$0xff] }
 0x1fd   :  { %1464 = vrot.lane.b32.xlu0 %v3129_v47, %s2936_s18 }
 0x1fe   :  { %v3657_v9 = vpop.permute.xlu1 %204  ;;  %v3659_v11 = vpop.permute.xlu0 %1228 }
 0x1ff   :  { %7553 = vst [vmem:[#allocation93_spill] sm:$0xff] %v3657_v9  ;;  %7554 = vst [vmem:[#allocation94_spill] sm:$0xff] %v3659_v11  ;;  %1294 = vrot.lane.b32.xlu1 %v3245_v12, %s7035_s16  ;;  %v7558_v11 = vmov 22   ;;  %s2937_s16 = smov 94  }
 0x201   :  { %1468 = vrot.lane.b32.xlu0 %v3140_v52, %s2936_s18 }
 0x202   :  { %v3665_v15 = vpop.permute.xlu1 %208  ;;  %v3667_v21 = vpop.permute.xlu0 %453 }
 0x203   :  { %7555 = vst [vmem:[#allocation95_spill] sm:$0xff] %v3665_v15  ;;  %7556 = vst [vmem:[#allocation96_spill] sm:$0xff] %v3667_v21  ;;  %545 = vperm.xlu1 %2865, %v3096_v33  }
 0x205   :  { %1554 = vperm.xlu0 %2869, %v80_v43   ;;  %v7563_v43 = vmov 23  }
 0x206   :  { %v3673_v9 = vpop.permute.xlu1 %1150 }
 0x207   :  { %7557 = vst [vmem:[#allocation97_spill] sm:$0xff] %v3673_v9  ;;  %2866 = vset.pattern.permute.xlu1 %v7558_v11  ;;  %v3676_v20 = vpop.permute.xlu0 %1365  ;;  %v83_v11 = vld [vmem:[%s6932_s9] sm:$0xff]  ;;  %v3703_v9 = vadd.f32 %v3170_v61, %v3200_v3 }
 0x208   :  { %7559 = vst [vmem:[#allocation98_spill] sm:$0xff] %v3676_v20  ;;  %1449 = vperm.xlu1 %2866, %v3044_v17  }
 0x209   :  { %1508 = vrot.lane.b32.xlu0 %v3129_v47, %s2937_s16 }
 0x20a   :  { %v3681_v21 = vpop.permute.xlu1 %1154 }
 0x20b   :  { %7560 = vst [vmem:[#allocation99_spill] sm:$0xff] %v3681_v21 }
 0x20c   :  { %v3683_v15 = vpop.permute.xlu0 %909  ;;  %424 = vrot.lane.b32.xlu1 %v3407_v7, %s2924_s13 }
 0x20d   :  { %7561 = vst [vmem:[#allocation100_spill] sm:$0xff] %v3683_v15  ;;  %1512 = vrot.lane.b32.xlu0 %v3140_v52, %s2937_s16  ;;  %2870 = vset.pattern.permute.xlu1 %v7563_v43 }
 0x20e   :  { %v3689_v33 = vpop.permute.xlu1 %369 }
 0x20f   :  { %7562 = vst [vmem:[#allocation101_spill] sm:$0xff] %v3689_v33  ;;  %v3715_v33 = vadd.f32 %v3172_v62, %v3200_v3 }
 0x210   :  { %v3695_v20 = vpop.permute.xlu0 %340  ;;  %426 = vrot.lane.b32.xlu1 %v3420_v63, %s2924_s13 }
 0x211   :  { %7564 = vst [vmem:[#allocation102_spill] sm:$0xff] %v3695_v20  ;;  %1580 = vperm.xlu0 %2869, %v83_v11  }
 0x213   :  { %v3699_v15 = vpop.permute.xlu1 %1273 }
 0x214   :  { %7565 = vst [vmem:[#allocation103_spill] sm:$0xff] %v3699_v15  ;;  %v3705_v21 = vpop.permute.xlu0 %1256  ;;  %430 = vrot.lane.b32.xlu1 %v3432_v56, %s2924_s13 }
 0x215   :  { %7566 = vst [vmem:[#allocation104_spill] sm:$0xff] %v3705_v21  ;;  %2001 = vrot.lane.b32.xlu0 %v3703_v9, %s2909_s19  ;;  %v210_v21 = vlaneseq }
 0x217   :  { %v3711_v43 = vpop.permute.xlu1 %248 }
 0x218   :  { %7567 = vst [vmem:[#allocation105_spill] sm:$0xff] %v3711_v43  ;;  %v3717_v11 = vpop.permute.xlu0 %1260  ;;  %1334 = vrot.lane.b32.xlu1 %v3203_v4, %s7054_s2 }
 0x219   :  { %7568 = vst [vmem:[#allocation106_spill] sm:$0xff] %v3717_v11  ;;  %2005 = vrot.lane.b32.xlu0 %v3715_v33, %s2909_s19 }
 0x21b   :  { %v3723_v61 = vpop.permute.xlu1 %250 }
 0x21c   :  { %7569 = vst [vmem:[#allocation107_spill] sm:$0xff] %v3723_v61  ;;  %1338 = vrot.lane.b32.xlu1 %v3245_v12, %s7054_s2  ;;  %v3727_v20 = vpop.permute.xlu0 %497 }
 0x21d   :  { %7570 = vst [vmem:[#allocation108_spill] sm:$0xff] %v3727_v20  ;;  %2025 = vrot.lane.b32.xlu0 %v3703_v9, %s2910_s20 }
 0x21f   :  { %v3731_v62 = vpop.permute.xlu1 %254 }
 0x220   :  { %7571 = vst [vmem:[#allocation109_spill] sm:$0xff] %v3731_v62  ;;  %1497 = vperm.xlu1 %2870, %v3031_v13  }
 0x221   :  { %2029 = vrot.lane.b32.xlu0 %v3715_v33, %s2910_s20  ;;  %v3736_v3 = vpop.permute.xlu0 %1409 }
 0x222   :  { %7572 = vst [vmem:[#allocation110_spill] sm:$0xff] %v3736_v3 }
 0x223   :  { %v3738_v15 = vpop.permute.xlu1 %1194 }
 0x224   :  { %7573 = vst [vmem:[#allocation111_spill] sm:$0xff] %v3738_v15  ;;  %468 = vrot.lane.b32.xlu1 %v3407_v7, %s7059_s14 }
 0x225   :  { %2049 = vrot.lane.b32.xlu0 %v3703_v9, %s2912_s22  ;;  %2871 = vset.pattern.permute.xlu1 %v7533_v28 }
 0x226   :  { %v3745_v20 = vpop.permute.xlu0 %937 }
 0x227   :  { %7574 = vst [vmem:[#allocation112_spill] sm:$0xff] %v3745_v20  ;;  %v3747_v61 = vpop.permute.xlu1 %1198 }
 0x228   :  { %7575 = vst [vmem:[#allocation113_spill] sm:$0xff] %v3747_v61  ;;  %472 = vrot.lane.b32.xlu1 %v3304_v34, %s7059_s14 }
 0x229   :  { %2053 = vrot.lane.b32.xlu0 %v3715_v33, %s2912_s22 }
 0x22a   :  { %v3753_v13 = vpop.permute.xlu0 %384 }
 0x22b   :  { %7576 = vst [vmem:[#allocation114_spill] sm:$0xff] %v3753_v13  ;;  %v3755_v3 = vpop.permute.xlu1 %413 }
 0x22c   :  { %7577 = vst [vmem:[#allocation115_spill] sm:$0xff] %v3755_v3  ;;  %1376 = vrot.lane.b32.xlu1 %v3129_v47, %s7057_s3  ;;  %v76_v3 = vld [vmem:[%s6930_s5] sm:$0xff]  ;;  %v3909_v47 = vmul.f32 %v3112_v38, %v3203_v4 }
 0x22d   :  { %2073 = vrot.lane.b32.xlu0 %v3703_v9, %s2911_s21 }
 0x22e   :  { %v3761_v15 = vpop.permute.xlu0 %1288  ;;  %7599 = vst [vmem:[#allocation133_spill] sm:$0xff] %v3909_v47 }
 0x22f   :  { %7578 = vst [vmem:[#allocation116_spill] sm:$0xff] %v3761_v15  ;;  %v3786_v15 = vld [vmem:[%s6933_s1 + $0x1] ss:$2 sm:$0x3] }
 0x230   :  { %v3763_v62 = vpop.permute.xlu1 %1317  ;;  %1380 = vrot.lane.b32.xlu1 %v3140_v52, %s7057_s3  ;;  %7582 = vst [vmem:[#allocation120_spill] sm:$0xff] %v3786_v15  ;;  %vm7098_vm2 = vcmp.ge.s32.totalorder %v3786_v15, 1  ;;  %vm7097_vm4 = vcmp.lt.s32.totalorder %v3786_v15, 15  ;;  %vm7105_vm7 = vcmp.ge.s32.totalorder %v3786_v15, 2  ;;  %vm7096_vm10 = vcmp.lt.s32.totalorder %v3786_v15, 14 }
 0x231   :  { %7579 = vst [vmem:[#allocation117_spill] sm:$0xff] %v3763_v62  ;;  %2077 = vrot.lane.b32.xlu0 %v3715_v33, %s2911_s21  ;;  %v3781_v62 = vld [vmem:[%s6933_s1] ss:$2 sm:$0x3]  ;;  %v4133_v19 = vsel %vm7105_vm7, 1, %v7533_v28 }
 0x232   :  { %v3772_v13 = vpop.permute.xlu0 %1292  ;;  %vm47_vm3 = vcmp.ge.s32.totalorder %v3781_v62, 2  ;;  %vm43_vm6 = vcmp.ge.s32.totalorder %v3781_v62, 1  ;;  %vm7104_vm1 = vcmp.lt.s32.totalorder %v3781_v62, 15 }
 0x233   :  { %7580 = vst [vmem:[#allocation118_spill] sm:$0xff] %v3772_v13  ;;  %vm51_vm5 = vmand %vm47_vm3, %vm7098_vm2  ;;  %v693_v57 = vsel %vm47_vm3, 1, %v7533_v28 }
 0x234   :  { %v3774_v61 = vpop.permute.xlu1 %292  ;;  %558 = vperm.xlu1 %2871, %v76_v3   ;;  %v219_v3 = vshrl.u32 %v210_v21, 7  ;;  %vm52_vm8 = vmand %vm47_vm3, %vm7097_vm4 }
 0x235   :  { %7581 = vst [vmem:[#allocation119_spill] sm:$0xff] %v3774_v61  ;;  %2097 = vrot.lane.b32.xlu0 %v3703_v9, %s2915_s0  ;;  %v2938_v61 = vmov 24   ;;  %vm54_vm9 = vmand %vm43_vm6, %vm7105_vm7  ;;  %v3833_v14 = vsel %vm52_vm8, 1, %v7533_v28 }
 0x236   :  { %v3788_v11 = vpop.permute.xlu0 %541  ;;  %vm3865_vm11 = vmand %vm47_vm3, %vm7105_vm7 }
 0x237   :  { %7583 = vst [vmem:[#allocation121_spill] sm:$0xff] %v3788_v11  ;;  %v649_v11 = vsel %vm51_vm5, 1, %v7533_v28  ;;  %vm3897_vm13 = vmand %vm43_vm6, %vm7096_vm10 }
 0x238   :  { %v3790_v13 = vpop.permute.xlu1 %294  ;;  %2872 = vset.pattern.permute.xlu1 %v2938_v61  ;;  %v3810_v61 = vsub.s32 0, %v219_v3  ;;  %v3961_v55 = vsel %vm3897_vm13, 1, %v7533_v28  ;;  %vm3995_vm5 = vmand %vm47_vm3, %vm7096_vm10 }
 0x239   :  { %7584 = vst [vmem:[#allocation122_spill] sm:$0xff] %v3790_v13  ;;  %2101 = vrot.lane.b32.xlu0 %v3715_v33, %s2915_s0  ;;  %1537 = vperm.xlu1 %2872, %v3044_v17   ;;  %v3812_v17 = vsub.s32 1, %v219_v3  ;;  %v3830_v3 = vand.u32 127, %v210_v21  ;;  %v3848_v21 = vmul.f32 %v3292_v25, %v3304_v34  ;;  %vm4014_vm3 = vmand %vm43_vm6, %vm7098_vm2 }
 0x23a   :  { %vm4037_vm13 = vmand %vm43_vm6, %vm7097_vm4 }
 0x23b   :  { %v3798_v43 = vpop.permute.xlu0 %1453  ;;  %7590 = vst [vmem:[#allocation128_spill] sm:$0xff] %v3848_v21  ;;  %vm7103_vm12 = vcmp.lt.s32.totalorder %v3830_v3, 33  ;;  %v3913_v21 = vmul.f32 %v3112_v38, %v3245_v12 }
 0x23c   :  { %7585 = vst [vmem:[#allocation123_spill] sm:$0xff] %v3798_v43  ;;  %v3800_v20 = vpop.permute.xlu1 %298  ;;  %v2888_v43 = vld [vmem:[%s6928_s6 + $0x8] sm:$0xff] }
 0x23d   :  { %7586 = vst [vmem:[#allocation124_spill] sm:$0xff] %v3800_v20  ;;  %2121 = vrot.lane.b32.xlu0 %v3703_v9, %s2913_s23  ;;  %1541 = vperm.xlu1 %2872, %v2888_v43   ;;  %v3839_v43 = vmul.f32 %v3292_v25, %v3407_v7  ;;  %v3856_v7 = vmul.f32 %v3281_v22, %v3432_v56  ;;  %7600 = vst [vmem:[#allocation134_spill] sm:$0xff] %v3913_v21 }
 0x23e   :  { %v745_v22 = vrot.slane %v3833_v14, %v3812_v17  ;;  %v3930_v21 = vadd.f32 %v3148_v54, %v3108_v36  ;;  %v7610_v36 = vmov 0 }
 0x23f   :  { %v3822_v20 = vpop.permute.xlu0 %428  ;;  %7589 = vst [vmem:[#allocation127_spill] sm:$0xff] %v3839_v43  ;;  %7592 = vst [vmem:[#allocation130_spill] sm:$0xff] %v3856_v7  ;;  %v3859_v43 = vsel %vm54_vm9, 1, %v7533_v28  ;;  %v3881_v7 = vsel %vm7097_vm4, 1, %v7533_v28  ;;  %vm7099_vm9 = vcmp.lt.s32.totalorder %v3830_v3, 34 }
 0x240   :  { %7587 = vst [vmem:[#allocation125_spill] sm:$0xff] %v3822_v20  ;;  %v3824_v13 = vpop.permute.xlu1 %1226  ;;  %v653_v20 = vrot.slane %v649_v11, %v3810_v61  ;;  %v829_v1 = vrot.slane %v3859_v43, %v3810_v61  ;;  %7602 = vst [vmem:[#allocation136_spill] sm:$0xff] %v3930_v21  ;;  %v401_v54 = vrot.slane %v3881_v7, %v3812_v17 }
 0x241   :  { %7588 = vst [vmem:[#allocation126_spill] sm:$0xff] %v3824_v13  ;;  %2125 = vrot.lane.b32.xlu0 %v3715_v33, %s2913_s23  ;;  %v657_v13 = vrot.slane %v649_v11, %v3812_v17  ;;  %514 = vrot.lane.b32.xlu1 %v3420_v63, %s2928_s15  ;;  %v741_v63 = vrot.slane %v3833_v14, %v3810_v61 }
 0x242   :  { %2873 = vset.pattern.permute.xlu1 %v7533_v28  ;;  %vm3946_vm14 = vcmp.eq.s32.totalorder %v653_v20, 1  ;;  %v3968_v20 = vadd.f32 %v3164_v58, %v3126_v45  ;;  %v3983_v21 = vadd.f32 %v3168_v60, %v3126_v45  ;;  %v3988_v58 = vsel %vm7096_vm10, 1, %v7533_v28 }
 0x243   :  { %v3869_v34 = vpop.permute.xlu0 %1332  ;;  %vm3950_vm15 = vcmp.eq.s32.totalorder %v657_v13, 1  ;;  %v4003_v45 = vmul.f32 %v3703_v9, %v3112_v38  ;;  %v7622_v60 = vmov 0  ;;  %vm4042_vm10 = vcmp.eq.s32.totalorder %v745_v22, 1 }
 0x244   :  { %7595 = vst [vmem:[#allocation131_spill] sm:$0xff] %v3869_v34  ;;  %v3871_v25 = vpop.permute.xlu1 %1230  ;;  %v3891_v34 = vsel %vm43_vm6, 1, %v7533_v28  ;;  %v7611_v36 = vsel %vm3950_vm15, 4294967295, %v7610_v36  ;;  %7613 = vst [vmem:[#allocation143_spill] sm:$0xff] %v3968_v20  ;;  %v701_v20 = vrot.slane %v693_v57, %v3812_v17  ;;  %vm4061_vm4 = vcmp.eq.s32.totalorder %v829_v1, 1 }
 0x245   :  { %7596 = vst [vmem:[#allocation132_spill] sm:$0xff] %v3871_v25  ;;  %v3903_v25 = vmul.f32 %v3215_v6, %v3140_v52  ;;  %2145 = vrot.lane.b32.xlu0 %v3703_v9, %s2918_s27  ;;  %v833_v52 = vrot.slane %v3859_v43, %v3812_v17  ;;  %v605_v6 = vsel %vm3865_vm11, 1, %v7533_v28  ;;  %518 = vrot.lane.b32.xlu1 %v3432_v56, %s2928_s15  ;;  %v7607_v56 = vmov 0  ;;  %7612 = vst [vmem:[#allocation142_spill] sm:$0xff] %v7611_v36 }
 0x246   :  { %v397_v43 = vrot.slane %v3881_v7, %v3810_v61  ;;  %v7608_v56 = vsel %vm3946_vm14, 4294967295, %v7607_v56  ;;  %v265_v37 = vrot.slane %v3891_v34, %v3810_v61  ;;  %v269_v13 = vrot.slane %v3891_v34, %v3812_v17  ;;  %7614 = vst [vmem:[#allocation144_spill] sm:$0xff] %v3983_v21  ;;  %7617 = vst [vmem:[#allocation145_spill] sm:$0xff] %v4003_v45 }
 0x247   :  { %v3942_v11 = vpop.permute.xlu0 %1336  ;;  %7609 = vst [vmem:[#allocation141_spill] sm:$0xff] %v7608_v56  ;;  %v3976_v7 = vsel %vm7098_vm2, 1, %v7533_v28  ;;  %v609_v14 = vrot.slane %v605_v6, %v3810_v61  ;;  %v613_v34 = vrot.slane %v605_v6, %v3812_v17  ;;  %v697_v6 = vrot.slane %v693_v57, %v3810_v61 }
 0x248   :  { %7605 = vst [vmem:[#allocation139_spill] sm:$0xff] %v3942_v11  ;;  %v3944_v47 = vpop.permute.xlu1 %457  ;;  %v4022_v45 = vmul.f32 %v3715_v33, %v3112_v38  ;;  %vm4024_vm11 = vcmp.eq.s32.totalorder %v741_v63, 1  ;;  %v7627_v38 = vmov 0  ;;  %v7637_v57 = vmov 0 }
 0x249   :  { %7606 = vst [vmem:[#allocation140_spill] sm:$0xff] %v3944_v47  ;;  %2149 = vrot.lane.b32.xlu0 %v3715_v33, %s2918_s27  ;;  %1422 = vrot.lane.b32.xlu1 %v3203_v4, %s2935_s17  ;;  %v7623_v60 = vsel %vm4024_vm11, 4294967295, %v7622_v60  ;;  %v7628_v38 = vsel %vm4042_vm10, 4294967295, %v7627_v38  ;;  %vm4053_vm6 = vcmp.eq.s32.totalorder %v609_v14, 1  ;;  %vm4066_vm0 = vcmp.eq.s32.totalorder %v613_v34, 1 }
 0x24a   :  { %7621 = vst [vmem:[#allocation147_spill] sm:$0xff] %v4022_v45  ;;  %7624 = vst [vmem:[#allocation148_spill] sm:$0xff] %v7623_v60  ;;  %v7631_v53 = vsel %vm4053_vm6, 4294967295, %v7630_v53  ;;  %v7634_v45 = vmov 0  ;;  %v7638_v57 = vsel %vm4066_vm0, 4294967295, %v7637_v57  ;;  %v603_v14 = vsel %vm7099_vm9, %v3453_v42, %v3341_v23 }
 0x24b   :  { %v4018_v51 = vpop.permute.xlu0 %1493  ;;  %7629 = vst [vmem:[#allocation149_spill] sm:$0xff] %v7628_v38  ;;  %7632 = vst [vmem:[#allocation150_spill] sm:$0xff] %v7631_v53  ;;  %v7635_v45 = vsel %vm4061_vm4, 4294967295, %v7634_v45  ;;  %v781_v21 = vsel %vm3995_vm5, 1, %v7533_v28  ;;  %v4080_v1 = vsel %vm4014_vm3, 1, %v7533_v28  ;;  %vm4084_vm8 = vcmp.eq.s32.totalorder %v833_v52, 1 }
 0x24c   :  { %7620 = vst [vmem:[#allocation146_spill] sm:$0xff] %v4018_v51  ;;  %7636 = vst [vmem:[#allocation152_spill] sm:$0xff] %v7635_v45  ;;  %v7640_v34 = vmov 0  ;;  %v601_v63 = vsel %vm7099_vm9, %v3341_v23, %v3453_v42  ;;  %vm4093_vm5 = vcmp.eq.s32.totalorder %v697_v6, 1  ;;  %v7643_v47 = vmov 0 }
 0x24d   :  { %2169 = vrot.lane.b32.xlu0 %v3703_v9, %s2914_s24  ;;  %v4059_v22 = vpop.permute.xlu1 %1361  ;;  %7639 = vst [vmem:[#allocation153_spill] sm:$0xff] %v7638_v57  ;;  %1426 = vrot.lane.b32.xlu1 %v3245_v12, %s2935_s17  ;;  %v7641_v34 = vsel %vm4084_vm8, 4294967295, %v7640_v34  ;;  %v7644_v47 = vsel %vm4093_vm5, 4294967295, %v7643_v47  ;;  %v4100_v11 = vsel %vm4037_vm13, 1, %v7533_v28  ;;  %vm4106_vm3 = vmand %vm7104_vm1, %vm7105_vm7  ;;  %v645_v23 = vsel %vm7103_vm12, %v3349_v29, %v3347_v35 }
 0x24e   :  { %7633 = vst [vmem:[#allocation151_spill] sm:$0xff] %v4059_v22  ;;  %7642 = vst [vmem:[#allocation154_spill] sm:$0xff] %v7641_v34  ;;  %v647_v51 = vsel %vm7103_vm12, %v3347_v35, %v3349_v29  ;;  %vm4118_vm13 = vcmp.eq.s32.totalorder %v397_v43, 1  ;;  %v7648_v42 = vmov 0  ;;  %vm4122_vm9 = vcmp.eq.s32.totalorder %v401_v54, 1 }
 0x24f   :  { %7645 = vst [vmem:[#allocation155_spill] sm:$0xff] %v7644_v47  ;;  %v7649_v42 = vsel %vm4118_vm13, 4294967295, %v7648_v42  ;;  %v7651_v6 = vmov 0  ;;  %vm4126_vm2 = vcmp.eq.s32.totalorder %v701_v20, 1  ;;  %v7654_v22 = vmov 0 }
 0x250   :  { %7650 = vst [vmem:[#allocation156_spill] sm:$0xff] %v7649_v42  ;;  %v7652_v6 = vsel %vm4122_vm9, 4294967295, %v7651_v6  ;;  %v7655_v22 = vsel %vm4126_vm2, 4294967295, %v7654_v22  ;;  %v4135_v5 = vpop.permute.xlu0 %625  ;;  %vm4137_vm12 = vcmp.eq.s32.totalorder %v265_v37, 1  ;;  %v7658_v29 = vmov 0 }
 0x251   :  { %7653 = vst [vmem:[#allocation157_spill] sm:$0xff] %v7652_v6  ;;  %7656 = vst [vmem:[#allocation158_spill] sm:$0xff] %v7655_v22  ;;  %v7659_v29 = vsel %vm4137_vm12, 4294967295, %v7658_v29  ;;  %v616_v35 = vsel %vm4053_vm6, %v603_v14, 0.0  ;;  %v785_v43 = vrot.slane %v781_v21, %v3810_v61  ;;  %v789_v54 = vrot.slane %v781_v21, %v3812_v17  ;;  %2173 = vrot.lane.b32.xlu0 %v3715_v33, %s2914_s24  ;;  %v4157_v37 = vpop.permute.xlu1 %336  ;;  %v7787_v22 = vld [vmem:[#allocation54_spill] sm:$0xff] }
 0x252   :  { %7657 = vst [vmem:[#allocation159_spill] sm:$0xff] %v4135_v5  ;;  %7660 = vst [vmem:[#allocation160_spill] sm:$0xff] %v7659_v29  ;;  %vm7661_vm1 = vcmp.ge.s32.totalorder %v3786_v15, 1  ;;  %vm7662_vm7 = vcmp.lt.s32.totalorder %v3781_v62, 15  ;;  %vm4159_vm6 = vcmp.eq.s32.totalorder %v269_v13, 1  ;;  %v7666_v14 = vmov 0  ;;  %1466 = vrot.lane.b32.xlu1 %v3203_v4, %s2936_s18 }
 0x253   :  { %vm4151_vm9 = vmand %vm7662_vm7, %vm7661_vm1  ;;  %7665 = vst [vmem:[#allocation161_spill] sm:$0xff] %v4157_v37  ;;  %v7667_v14 = vsel %vm4159_vm6, 4294967295, %v7666_v14  ;;  %v617_v21 = vsel %vm4066_vm0, %v601_v63, 0.0  ;;  %v4172_v15 = vsel %vm4106_vm3, 1, %v7533_v28  ;;  %v660_v13 = vsel %vm3946_vm14, %v647_v51, 0.0 }
 0x254   :  { %7668 = vst [vmem:[#allocation162_spill] sm:$0xff] %v7667_v14  ;;  %v661_v63 = vsel %vm3950_vm15, %v645_v23, 0.0  ;;  %vm7669_vm3 = vcmp.lt.s32.totalorder %v3830_v3, 31  ;;  %v628_v51 = vmul.f32 %v3116_v40, %v616_v35  ;;  %v4196_v37 = vsel %vm4151_vm9, 1, %v7533_v28  ;;  %v4198_v36 = vpop.permute.xlu0 %237 }
 0x255   :  { %v735_v20 = vsel %vm7669_vm3, %v3355_v31, %v3365_v49  ;;  %7670 = vst [vmem:[#allocation163_spill] sm:$0xff] %v4198_v36  ;;  %vm7671_vm7 = vmmov %vm7669_vm3  ;;  %v629_v35 = vmul.f32 %v3116_v40, %v617_v21  ;;  %2193 = vrot.lane.b32.xlu0 %v3703_v9, %s2920_s29  ;;  %v4213_v53 = vpop.permute.xlu1 %338  ;;  %v672_v36 = vmul.f32 %v3124_v44, %v660_v13  ;;  %vm7673_vm9 = vcmp.lt.s32.totalorder %v3830_v3, 18 }
 0x256   :  { %v733_v52 = vsel %vm7671_vm7, %v3365_v49, %v3355_v31  ;;  %7672 = vst [vmem:[#allocation164_spill] sm:$0xff] %v4213_v53  ;;  %v673_v31 = vmul.f32 %v3124_v44, %v661_v63  ;;  %v823_v49 = vsel %vm7673_vm9, %v3363_v27, %v3380_v2  ;;  %v7674_v21 = vrot.slane %v3961_v55, %v3810_v61 }
 0x257   :  { %v7675_v23 = vmov 0  ;;  %vm7678_vm3 = vcmp.lt.s32.totalorder %v3830_v3, 32  ;;  %vm4232_vm1 = vcmp.eq.s32.totalorder %v785_v43, 1  ;;  %v7679_v13 = vmov 0  ;;  %1470 = vrot.lane.b32.xlu1 %v3245_v12, %s2936_s18 }
 0x258   :  { %vm4224_vm7 = vcmp.eq.s32.totalorder %v7674_v21, 1  ;;  %v691_v5 = vsel %vm7678_vm3, %v3458_v18, %v3357_v46  ;;  %v7680_v13 = vsel %vm4232_vm1, 4294967295, %v7679_v13  ;;  %v748_v63 = vsel %vm4024_vm11, %v735_v20, 0.0 }
 0x259   :  { %v7676_v23 = vsel %vm4224_vm7, 4294967295, %v7675_v23  ;;  %7681 = vst [vmem:[#allocation166_spill] sm:$0xff] %v7680_v13  ;;  %v821_v21 = vsel %vm7673_vm9, %v3380_v2, %v3363_v27  ;;  %v7682_v44 = vrot.slane %v3961_v55, %v3812_v17  ;;  %v7683_v40 = vmov 0  ;;  %v81_v2 = vld [vmem:[%s6931_s7 + $0x8] sm:$0xff]  ;;  %2197 = vrot.lane.b32.xlu0 %v3715_v33, %s2920_s29  ;;  %v4309_v60 = vpop.permute.xlu1 %342  ;;  %s7885_s7 = smov 126  }
 0x25a   :  { %7677 = vst [vmem:[#allocation165_spill] sm:$0xff] %v7676_v23  ;;  %v689_v43 = vsel %vm7678_vm3, %v3357_v46, %v3458_v18  ;;  %vm4255_vm14 = vcmp.eq.s32.totalorder %v789_v54, 1  ;;  %v7686_v53 = vmov 0  ;;  %v749_v27 = vsel %vm4042_vm10, %v733_v52, 0.0  ;;  %7705 = vst [vmem:[#allocation173_spill] sm:$0xff] %v4309_v60 }
 0x25b   :  { %vm4247_vm15 = vcmp.eq.s32.totalorder %v7682_v44, 1  ;;  %v7687_v53 = vsel %vm4255_vm14, 4294967295, %v7686_v53  ;;  %vm7689_vm9 = vcmp.lt.s32.totalorder %v3830_v3, 127  ;;  %v7691_v46 = vrot.slane %v3976_v7, %v3810_v61  ;;  %1559 = vperm.xlu1 %2873, %v81_v2  }
 0x25c   :  { %v7684_v40 = vsel %vm4247_vm15, 4294967295, %v7683_v40  ;;  %7688 = vst [vmem:[#allocation168_spill] sm:$0xff] %v7687_v53  ;;  %v1080_v44 = vsel %vm7689_vm9, %v3339_v30, %v3393_v8  ;;  %vm7690_vm3 = vmmov %vm7689_vm9  ;;  %v7692_v55 = vmov 0  ;;  %v7695_v54 = vrot.slane %v3976_v7, %v3812_v17 }
 0x25d   :  { %7685 = vst [vmem:[#allocation167_spill] sm:$0xff] %v7684_v40  ;;  %v1082_v18 = vsel %vm7690_vm3, %v3393_v8, %v3339_v30  ;;  %vm4277_vm11 = vcmp.eq.s32.totalorder %v7691_v46, 1  ;;  %v7696_v52 = vmov 0  ;;  %v7699_v20 = vrot.slane %v3988_v58, %v3810_v61  ;;  %v4296_v8 = vpop.permute.xlu0 %470  ;;  %2217 = vrot.lane.b32.xlu0 %v3703_v9, %s2916_s25 }
 0x25e   :  { %v7693_v55 = vsel %vm4277_vm11, 4294967295, %v7692_v55  ;;  %vm4284_vm10 = vcmp.eq.s32.totalorder %v7695_v54, 1  ;;  %v7700_v38 = vmov 0  ;;  %v632_v30 = vadd.f32 %v628_v51, %v3885_v39  ;;  %7703 = vst [vmem:[#allocation172_spill] sm:$0xff] %v4296_v8 }
 0x25f   :  { %7694 = vst [vmem:[#allocation169_spill] sm:$0xff] %v7693_v55  ;;  %v7697_v52 = vsel %vm4284_vm10, 4294967295, %v7696_v52  ;;  %vm4291_vm9 = vcmp.eq.s32.totalorder %v7699_v20, 1  ;;  %v836_v46 = vsel %vm4061_vm4, %v823_v49, 0.0  ;;  %vm7704_vm3 = vcmp.lt.s32.totalorder %v3830_v3, 16  ;;  %1510 = vrot.lane.b32.xlu1 %v3203_v4, %s2937_s16  ;;  %v7723_v4 = vld [vmem:[#allocation44_spill] sm:$0xff] }
 0x260   :  { %7698 = vst [vmem:[#allocation170_spill] sm:$0xff] %v7697_v52  ;;  %v7701_v38 = vsel %vm4291_vm9, 4294967295, %v7700_v38  ;;  %v898_v7 = vsel %vm7704_vm3, %v3371_v50, %v3395_v32  ;;  %v633_v54 = vadd.f32 %v629_v35, %v3903_v25  ;;  %v704_v20 = vsel %vm4093_vm5, %v691_v5, 0.0  ;;  %vm7706_vm4 = vmmov %vm7704_vm3 }
 0x261   :  { %7702 = vst [vmem:[#allocation171_spill] sm:$0xff] %v7701_v38  ;;  %v837_v39 = vsel %vm4084_vm8, %v821_v21, 0.0  ;;  %v896_v51 = vsel %vm7706_vm4, %v3395_v32, %v3371_v50  ;;  %v7707_v49 = vrot.slane %v3988_v58, %v3812_v17  ;;  %v7708_v25 = vmov 0  ;;  %v4340_v2 = vpop.permute.xlu0 %474  ;;  %2221 = vrot.lane.b32.xlu0 %v3715_v33, %s2916_s25 }
 0x262   :  { %v705_v35 = vsel %vm4126_vm2, %v689_v43, 0.0  ;;  %v760_v21 = vmul.f32 %v3166_v59, %v748_v63  ;;  %v761_v8 = vmul.f32 %v3166_v59, %v749_v27  ;;  %v1084_v32 = vsel %vm4118_vm13, %v1080_v44, 0.0  ;;  %7712 = vst [vmem:[#allocation175_spill] sm:$0xff] %v4340_v2 }
 0x263   :  { %vm4320_vm3 = vcmp.eq.s32.totalorder %v7707_v49, 1  ;;  %vm7711_vm4 = vnez %v7652_v6  ;;  %v4335_v58 = vmul.f32 %v3188_v0, %v836_v46  ;;  %v900_v43 = vsel %vm4137_vm12, %v898_v7, 0.0  ;;  %v4351_v46 = vpop.permute.xlu1 %1258  ;;  %1514 = vrot.lane.b32.xlu1 %v3245_v12, %s2937_s16 }
 0x264   :  { %v7709_v25 = vsel %vm4320_vm3, 4294967295, %v7708_v25  ;;  %v1085_v50 = vsel %vm7711_vm4, %v1082_v18, 0.0  ;;  %v676_v49 = vadd.f32 %v672_v36, %v632_v30  ;;  %v716_v5 = vmul.f32 %v3322_v41, %v704_v20  ;;  %7713 = vst [vmem:[#allocation176_spill] sm:$0xff] %v4351_v46 }
 0x265   :  { %7710 = vst [vmem:[#allocation174_spill] sm:$0xff] %v7709_v25  ;;  %v4343_v63 = vmul.f32 %v3188_v0, %v837_v39  ;;  %v901_v27 = vsel %vm4159_vm6, %v896_v51, 0.0  ;;  %v677_v44 = vadd.f32 %v673_v31, %v633_v54  ;;  %v717_v18 = vmul.f32 %v3322_v41, %v705_v35  ;;  %v7718_v54 = vld [vmem:[#allocation11_spill] sm:$0xff]  ;;  %v4405_v59 = vpop.permute.xlu0 %1378  ;;  %2241 = vrot.lane.b32.xlu0 %v3703_v9, %s2921_s30  ;;  %v7802_v25 = vld [vmem:[#allocation53_spill] sm:$0xff] }
 0x266   :  { %v4354_v36 = vmul.f32 %v3259_v16, %v1084_v32  ;;  %v4357_v30 = vmul.f32 %v3259_v16, %v1085_v50  ;;  %vm7716_vm13 = vcmp.lt.s32.totalorder %v3830_v3, 14  ;;  %vm7717_vm4 = vcmp.lt.s32.totalorder %v3830_v3, 30  ;;  %v7722_v32 = vld [vmem:[#allocation36_spill] sm:$0xff]  ;;  %7733 = vst [vmem:[#allocation44_spill] sm:$0xff] %v4405_v59  ;;  %v7749_v59 = vld [vmem:[#allocation41_spill] sm:$0xff] }
 0x267   :  { %v963_v31 = vsel %vm7716_vm13, %v3378_v26, %v3415_v10  ;;  %v779_v7 = vsel %vm7717_vm4, %v3465_v24, %v3373_v48  ;;  %v4370_v20 = vmul.f32 %v7718_v54, %v900_v43  ;;  %vm7719_vm6 = vmmov %vm7716_vm13  ;;  %vm7721_vm12 = vcmp.lt.s32.totalorder %v3781_v62, 15  ;;  %v7727_v43 = vld [vmem:[#allocation46_spill] sm:$0xff] }
 0x268   :  { %7714 = vst [vmem:[#allocation177_spill] sm:$0xff] %v4354_v36  ;;  %7715 = vst [vmem:[#allocation178_spill] sm:$0xff] %v4357_v30  ;;  %v961_v39 = vsel %vm7719_vm6, %v3415_v10, %v3378_v26  ;;  %v4383_v35 = vsel %vm7721_vm12, 1, %v7533_v28  ;;  %v7726_v26 = vld [vmem:[#allocation38_spill] sm:$0xff]  ;;  %vm7728_vm6 = vcmp.lt.s32.totalorder %v3830_v3, 126  ;;  %v7729_v16 = vrot.slane %v4080_v1, %v3810_v61 }
 0x269   :  { %vm7720_vm13 = vmmov %vm7717_vm4  ;;  %vm7724_vm4 = vcmp.lt.s32.totalorder %v3830_v3, 1  ;;  %v7730_v0 = vmov 0  ;;  %v4408_v41 = vmul.f32 %v7718_v54, %v901_v27  ;;  %v4424_v27 = vpop.permute.xlu1 %1262  ;;  %v7744_v12 = vmov 0  ;;  %v7748_v54 = vld [vmem:[#allocation52_spill] sm:$0xff]  ;;  %2245 = vrot.lane.b32.xlu0 %v3715_v33, %s2921_s30 }
 0x26a   :  { %v777_v51 = vsel %vm7720_vm13, %v3373_v48, %v3465_v24  ;;  %v1048_v50 = vsel %vm7724_vm4, %v7723_v4, %v7722_v32  ;;  %vm7725_vm8 = vmmov %vm7724_vm4  ;;  %v1113_v48 = vsel %vm7728_vm6, %v7727_v43, %v7726_v26  ;;  %v720_v24 = vadd.f32 %v716_v5, %v676_v49  ;;  %7738 = vst [vmem:[#allocation46_spill] sm:$0xff] %v4424_v27 }
 0x26b   :  { %v1050_v10 = vsel %vm7725_vm8, %v7722_v32, %v7723_v4  ;;  %vm4400_vm12 = vcmp.eq.s32.totalorder %v7729_v16, 1  ;;  %v976_v32 = vsel %vm4224_vm7, %v963_v31, 0.0  ;;  %v721_v4 = vadd.f32 %v717_v18, %v677_v44  ;;  %v7747_v31 = vld [vmem:[#allocation24_spill] sm:$0xff] }
 0x26c   :  { %v7731_v0 = vsel %vm4400_vm12, 4294967295, %v7730_v0  ;;  %v792_v5 = vsel %vm4232_vm1, %v779_v7, 0.0  ;;  %v7734_v16 = vrot.slane %v4080_v1, %v3812_v17  ;;  %v7735_v49 = vmov 0 }
 0x26d   :  { %7732 = vst [vmem:[#allocation36_spill] sm:$0xff] %v7731_v0  ;;  %v977_v44 = vsel %vm4247_vm15, %v961_v39, 0.0  ;;  %v1115_v18 = vsel %vm7728_vm6, %v7726_v26, %v7727_v43  ;;  %v793_v1 = vsel %vm4255_vm14, %v777_v51, 0.0  ;;  %v1052_v7 = vsel %vm4277_vm11, %v1050_v10, 0.0  ;;  %2265 = vrot.lane.b32.xlu0 %v3703_v9, %s2917_s26  ;;  %v7850_v0 = vld [vmem:[#allocation17_spill] sm:$0xff] }
 0x26e   :  { %vm4417_vm8 = vcmp.eq.s32.totalorder %v7734_v16, 1  ;;  %v1053_v39 = vsel %vm4284_vm10, %v1048_v50, 0.0  ;;  %v1128_v16 = vsel %vm4291_vm9, %v1113_v48, 0.0  ;;  %v7739_v26 = vrot.slane %v4100_v11, %v3810_v61  ;;  %v7758_v50 = vld [vmem:[#allocation49_spill] sm:$0xff] }
 0x26f   :  { %v7736_v49 = vsel %vm4417_vm8, 4294967295, %v7735_v49  ;;  %v7740_v51 = vmov 0  ;;  %v7743_v43 = vrot.slane %v4100_v11, %v3812_v17  ;;  %v764_v10 = vadd.f32 %v760_v21, %v720_v24  ;;  %v4476_v21 = vpop.permute.xlu0 %1382 }
 0x270   :  { %7737 = vst [vmem:[#allocation38_spill] sm:$0xff] %v7736_v49  ;;  %vm4447_vm6 = vcmp.eq.s32.totalorder %v7739_v26, 1  ;;  %v804_v48 = vmul.f32 %v7747_v31, %v792_v5  ;;  %vm7750_vm13 = vcmp.lt.s32.totalorder %v3830_v3, 32  ;;  %v7753_v2 = vmov 0  ;;  %7756 = vst [vmem:[#allocation41_spill] sm:$0xff] %v4476_v21  ;;  %v7757_v5 = vld [vmem:[#allocation40_spill] sm:$0xff] }
 0x271   :  { %v7741_v51 = vsel %vm4447_vm6, 4294967295, %v7740_v51  ;;  %vm4454_vm4 = vcmp.eq.s32.totalorder %v7743_v43, 1  ;;  %v690_v26 = vsel %vm7750_vm13, %v7749_v59, %v7748_v54  ;;  %vm7751_vm9 = vmmov %vm7750_vm13  ;;  %v7752_v43 = vrot.slane %v4133_v19, %v3810_v61  ;;  %2269 = vrot.lane.b32.xlu0 %v3715_v33, %s2917_s26 }
 0x272   :  { %7742 = vst [vmem:[#allocation179_spill] sm:$0xff] %v7741_v51  ;;  %v7745_v12 = vsel %vm4454_vm4, 4294967295, %v7744_v12  ;;  %v692_v11 = vsel %vm7751_vm9, %v7748_v54, %v7749_v59  ;;  %v1129_v24 = vsel %vm4320_vm3, %v1115_v18, 0.0  ;;  %vm7759_vm13 = vcmp.lt.s32.totalorder %v3830_v3, 34  ;;  %v4489_v54 = vpop.permute.xlu1 %501  ;;  %v7762_v18 = vld [vmem:[#allocation19_spill] sm:$0xff] }
 0x273   :  { %7746 = vst [vmem:[#allocation180_spill] sm:$0xff] %v7745_v12  ;;  %vm4472_vm10 = vcmp.eq.s32.totalorder %v7752_v43, 1  ;;  %v4484_v46 = vsel %vm7759_vm13, %v7758_v50, %v7757_v5  ;;  %v765_v27 = vadd.f32 %v761_v8, %v721_v4  ;;  %v805_v59 = vmul.f32 %v7747_v31, %v793_v1  ;;  %7760 = vst [vmem:[#allocation40_spill] sm:$0xff] %v4489_v54  ;;  %v7761_v43 = vld [vmem:[#allocation15_spill] sm:$0xff]  ;;  %v7777_v31 = vld [vmem:[#allocation150_spill] sm:$0xff] }
 0x274   :  { %v7754_v2 = vsel %vm4472_vm10, 4294967295, %v7753_v2  ;;  %v4492_v60 = vmul.f32 %v7761_v43, %v976_v32  ;;  %v4495_v21 = vmul.f32 %v7761_v43, %v977_v44  ;;  %v4498_v30 = vmul.f32 %v7762_v18, %v1052_v7  ;;  %vm7764_vm9 = vmmov %vm7759_vm13  ;;  %v7769_v32 = vld [vmem:[#allocation120_spill] sm:$0xff]  ;;  %v7772_v44 = vld [vmem:[#allocation143_spill] sm:$0xff] }
 0x275   :  { %7755 = vst [vmem:[#allocation52_spill] sm:$0xff] %v7754_v2  ;;  %v4504_v8 = vsel %vm7764_vm9, %v7757_v5, %v7758_v50  ;;  %v7765_v4 = vrot.slane %v4133_v19, %v3812_v17  ;;  %v7766_v1 = vmov 0  ;;  %vm7770_vm3 = vcmp.lt.s32.totalorder %v7769_v32, 15  ;;  %1999 = vrot.lane.b32.xlu1 %v7772_v44, %s2909_s19  ;;  %v7774_v50 = vld [vmem:[#allocation23_spill] sm:$0xff]  ;;  %v7843_v2 = vld [vmem:[#allocation88_spill] sm:$0xff]  ;;  %2289 = vrot.lane.b32.xlu0 %v3703_v9, %s2908_s4 }
 0x276   :  { %7763 = vst [vmem:[#allocation49_spill] sm:$0xff] %v4498_v30  ;;  %vm7771_vm11 = vcmp.lt.s32.totalorder %v3781_v62, 15  ;;  %v4520_v7 = vmul.f32 %v7762_v18, %v1053_v39  ;;  %v4523_v5 = vmul.f32 %v7774_v50, %v1128_v16  ;;  %v706_v19 = vsel %vm4093_vm5, %v692_v11, 0.0  ;;  %v7779_v30 = vld [vmem:[#allocation37_spill] sm:$0xff]  ;;  %v7780_v39 = vld [vmem:[#allocation50_spill] sm:$0xff]  ;;  %v4541_v18 = vpop.permute.xlu0 %563 }
 0x277   :  { %vm4509_vm13 = vcmp.eq.s32.totalorder %v7765_v4, 1  ;;  %vm60_vm15 = vmand %vm7771_vm11, %vm7770_vm3  ;;  %v707_v4 = vsel %vm4126_vm2, %v690_v26, 0.0  ;;  %v4530_v43 = vmul.f32 %v7774_v50, %v1129_v24  ;;  %vm7778_vm11 = vnez %v7777_v31  ;;  %7782 = vst [vmem:[#allocation37_spill] sm:$0xff] %v4541_v18  ;;  %v7788_v26 = vld [vmem:[#allocation43_spill] sm:$0xff]  ;;  %v7798_v18 = vld [vmem:[#allocation57_spill] sm:$0xff] }
 0x278   :  { %v7767_v1 = vsel %vm4509_vm13, 4294967295, %v7766_v1  ;;  %7773 = vst [vmem:[#allocation120_spill] sm:$0xff] %v4520_v7  ;;  %7775 = vst [vmem:[#allocation143_spill] sm:$0xff] %v4523_v5  ;;  %v808_v36 = vadd.f32 %v804_v48, %v764_v10  ;;  %vm7781_vm3 = vcmp.lt.s32.totalorder %v3830_v3, 17  ;;  %v809_v11 = vadd.f32 %v805_v59, %v765_v27  ;;  %v7785_v48 = vld [vmem:[#allocation6_spill] sm:$0xff]  ;;  %v7791_v59 = vld [vmem:[#allocation144_spill] sm:$0xff] }
 0x279   :  { %7768 = vst [vmem:[#allocation181_spill] sm:$0xff] %v7767_v1  ;;  %7776 = vst [vmem:[#allocation182_spill] sm:$0xff] %v4530_v43  ;;  %v4539_v16 = vsel %vm7781_vm3, %v7780_v39, %v7779_v30  ;;  %v4551_v10 = vsel %vm60_vm15, 1, %v7533_v28  ;;  %v4556_v54 = vmul.f32 %v7785_v48, %v706_v19  ;;  %v4559_v50 = vmul.f32 %v7785_v48, %v707_v4  ;;  %v7793_v4 = vld [vmem:[#allocation51_spill] sm:$0xff]  ;;  %v7801_v7 = vld [vmem:[#allocation42_spill] sm:$0xff] }
 0x27a   :  { %vm7783_vm9 = vmmov %vm7781_vm3  ;;  %7784 = vst [vmem:[#allocation50_spill] sm:$0xff] %v4551_v10  ;;  %vm7789_vm3 = vcmp.lt.s32.totalorder %v3830_v3, 30  ;;  %2003 = vrot.lane.b32.xlu1 %v7791_v59, %s2909_s19  ;;  %v868_v19 = vsel %vm4400_vm12, %v4539_v16, 0.0  ;;  %v7794_v48 = vld [vmem:[#allocation39_spill] sm:$0xff]  ;;  %vm7795_vm15 = vcmp.lt.s32.totalorder %v3830_v3, 15  ;;  %v4593_v43 = vadd.f32 %v4335_v58, %v808_v36  ;;  %2293 = vrot.lane.b32.xlu0 %v3715_v33, %s2908_s4  ;;  %s7982_s19 = smov 114  }
 0x27b   :  { %v864_v24 = vsel %vm7783_vm9, %v7779_v30, %v7780_v39  ;;  %7786 = vst [vmem:[#allocation183_spill] sm:$0xff] %v4559_v50  ;;  %v778_v27 = vsel %vm7789_vm3, %v7788_v26, %v7787_v22  ;;  %vm7790_vm9 = vmmov %vm7789_vm3  ;;  %v4571_v39 = vpop.permute.xlu1 %1405  ;;  %v4580_v47 = vsel %vm7795_vm15, %v7794_v48, %v7793_v4  ;;  %v4608_v50 = vadd.f32 %v4343_v63, %v809_v11  ;;  %v7807_v63 = vld [vmem:[#allocation59_spill] sm:$0xff] }
 0x27c   :  { %v780_v30 = vsel %vm7790_vm9, %v7787_v22, %v7788_v26  ;;  %7792 = vst [vmem:[#allocation54_spill] sm:$0xff] %v4571_v39  ;;  %vm7796_vm3 = vmmov %vm7795_vm15  ;;  %v7797_v26 = vld [vmem:[#allocation45_spill] sm:$0xff]  ;;  %vm7799_vm9 = vcmp.lt.s32.totalorder %v3830_v3, 17  ;;  %v869_v16 = vsel %vm4417_vm8, %v864_v24, 0.0  ;;  %v795_v36 = vsel %vm4255_vm14, %v778_v27, 0.0  ;;  %v7808_v24 = vld [vmem:[#allocation47_spill] sm:$0xff] }
 0x27d   :  { %v4586_v22 = vsel %vm7796_vm3, %v7793_v4, %v7794_v48  ;;  %v867_v39 = vsel %vm7799_vm9, %v7798_v18, %v7797_v26  ;;  %vm7800_vm15 = vmmov %vm7799_vm9  ;;  %vm7803_vm3 = vcmp.lt.s32.totalorder %v3830_v3, 2  ;;  %v4605_v4 = vpop.permute.xlu0 %512  ;;  %v794_v58 = vsel %vm4232_vm1, %v780_v30, 0.0  ;;  %v7841_v10 = vld [vmem:[#allocation71_spill] sm:$0xff] }
 0x27e   :  { %v865_v5 = vsel %vm7800_vm15, %v7797_v26, %v7798_v18  ;;  %v1007_v48 = vsel %vm7803_vm3, %v7802_v25, %v7801_v7  ;;  %7804 = vst [vmem:[#allocation43_spill] sm:$0xff] %v4605_v4  ;;  %v870_v11 = vsel %vm4400_vm12, %v867_v39, 0.0  ;;  %vm7805_vm15 = vmmov %vm7803_vm3  ;;  %2023 = vrot.lane.b32.xlu1 %v7772_v44, %s2910_s20  ;;  %vm7809_vm3 = vcmp.lt.s32.totalorder %v3830_v3, 15  ;;  %v7815_v4 = vld [vmem:[#allocation48_spill] sm:$0xff]  ;;  %2313 = vrot.lane.b32.xlu0 %v3703_v9, %s7885_s7 }
 0x27f   :  { %v1005_v27 = vsel %vm7805_vm15, %v7801_v7, %v7802_v25  ;;  %v4633_v30 = vpop.permute.xlu1 %380  ;;  %v871_v26 = vsel %vm4417_vm8, %v865_v5, 0.0  ;;  %v1020_v18 = vsel %vm4472_vm10, %v1007_v48, 0.0  ;;  %v929_v39 = vsel %vm7809_vm3, %v7808_v24, %v7807_v63  ;;  %vm7810_vm15 = vmmov %vm7809_vm3  ;;  %v7811_v7 = vld [vmem:[#allocation8_spill] sm:$0xff]  ;;  %v7814_v5 = vld [vmem:[#allocation62_spill] sm:$0xff] }
 0x280   :  { %7806 = vst [vmem:[#allocation144_spill] sm:$0xff] %v4633_v30  ;;  %v931_v25 = vsel %vm7810_vm15, %v7807_v63, %v7808_v24  ;;  %v4648_v53 = vmul.f32 %v7811_v7, %v794_v58  ;;  %v4651_v13 = vmul.f32 %v7811_v7, %v795_v36  ;;  %vm7816_vm9 = vcmp.lt.s32.totalorder %v3830_v3, 2  ;;  %v7823_v36 = vld [vmem:[#allocation10_spill] sm:$0xff] }
 0x281   :  { %v1006_v48 = vsel %vm7816_vm9, %v7815_v4, %v7814_v5  ;;  %vm7817_vm3 = vmmov %vm7816_vm9  ;;  %v7818_v49 = vrot.slane %v4172_v15, %v3810_v61  ;;  %v7819_v24 = vmov 0  ;;  %v4668_v58 = vpop.permute.xlu0 %516  ;;  %v4671_v63 = vmul.f32 %v7823_v36, %v870_v11 }
 0x282   :  { %7812 = vst [vmem:[#allocation51_spill] sm:$0xff] %v4648_v53  ;;  %7813 = vst [vmem:[#allocation39_spill] sm:$0xff] %v4651_v13  ;;  %v1008_v30 = vsel %vm7817_vm3, %v7814_v5, %v7815_v4  ;;  %v1021_v7 = vsel %vm4509_vm13, %v1005_v27, 0.0  ;;  %v7825_v13 = vrot.slane %v4172_v15, %v3812_v17  ;;  %v7826_v4 = vmov 0  ;;  %2027 = vrot.lane.b32.xlu1 %v7791_v59, %s2910_s20  ;;  %2317 = vrot.lane.b32.xlu0 %v3715_v33, %s7885_s7  ;;  %s8124_s20 = smov 112  }
 0x283   :  { %vm4664_vm15 = vcmp.eq.s32.totalorder %v7818_v49, 1  ;;  %7822 = vst [vmem:[#allocation57_spill] sm:$0xff] %v4668_v58  ;;  %7824 = vst [vmem:[#allocation42_spill] sm:$0xff] %v4671_v63  ;;  %vm7829_vm3 = vcmp.lt.s32.totalorder %v7769_v32, 14  ;;  %vm7830_vm14 = vcmp.lt.s32.totalorder %v3781_v62, 15  ;;  %v4696_v15 = vmul.f32 %v7823_v36, %v871_v26  ;;  %v4707_v58 = vpop.permute.xlu1 %382  ;;  %v7836_v36 = vld [vmem:[#allocation69_spill] sm:$0xff] }
 0x284   :  { %v7820_v24 = vsel %vm4664_vm15, 4294967295, %v7819_v24  ;;  %vm4678_vm9 = vcmp.eq.s32.totalorder %v7825_v13, 1  ;;  %vm4688_vm1 = vmand %vm7830_vm14, %vm7829_vm3  ;;  %v7834_v13 = vld [vmem:[#allocation16_spill] sm:$0xff]  ;;  %v934_v5 = vsel %vm4447_vm6, %v931_v25, 0.0  ;;  %v935_v49 = vsel %vm4454_vm4, %v929_v39, 0.0  ;;  %7835 = vst [vmem:[#allocation47_spill] sm:$0xff] %v4707_v58 }
 0x285   :  { %7821 = vst [vmem:[#allocation45_spill] sm:$0xff] %v7820_v24  ;;  %v7827_v4 = vsel %vm4678_vm9, 4294967295, %v7826_v4  ;;  %7833 = vst [vmem:[#allocation59_spill] sm:$0xff] %v4696_v15  ;;  %v4699_v27 = vmul.f32 %v7834_v13, %v1020_v18  ;;  %v1022_v63 = vsel %vm4472_vm10, %v1008_v30, 0.0  ;;  %v1023_v26 = vsel %vm4509_vm13, %v1006_v48, 0.0  ;;  %v7837_v18 = vld [vmem:[#allocation55_spill] sm:$0xff] }
 0x286   :  { %7828 = vst [vmem:[#allocation53_spill] sm:$0xff] %v7827_v4  ;;  %vm7838_vm14 = vcmp.lt.s32.totalorder %v3830_v3, 33  ;;  %v7840_v25 = vld [vmem:[#allocation56_spill] sm:$0xff]  ;;  %vm7842_vm2 = vcmp.lt.s32.totalorder %v3830_v3, 31  ;;  %v880_v30 = vmul.f32 %v7843_v2, %v868_v19  ;;  %v881_v1 = vmul.f32 %v7843_v2, %v869_v16  ;;  %v7849_v19 = vld [vmem:[#allocation13_spill] sm:$0xff]  ;;  %2047 = vrot.lane.b32.xlu1 %v7772_v44, %s2912_s22 }
 0x287   :  { %v646_v15 = vsel %vm7838_vm14, %v7837_v18, %v7836_v36  ;;  %vm7839_vm3 = vmmov %vm7838_vm14  ;;  %v736_v58 = vsel %vm7842_vm2, %v7841_v10, %v7840_v25  ;;  %v4730_v48 = vsel %vm4688_vm1, 1, %v7533_v28  ;;  %vm7844_vm14 = vcmp.ge.s32.totalorder %v7769_v32, 2 }
 0x288   :  { %v648_v39 = vsel %vm7839_vm3, %v7836_v36, %v7837_v18  ;;  %vm7845_vm13 = vcmp.lt.s32.totalorder %v3781_v62, 14  ;;  %v4740_v18 = vpop.permute.xlu0 %1420  ;;  %v4743_v53 = vmul.f32 %v7834_v13, %v1021_v7  ;;  %v4746_v16 = vmul.f32 %v7849_v19, %v934_v5  ;;  %v7854_v13 = vld [vmem:[#allocation142_spill] sm:$0xff] }
 0x289   :  { %vm4736_vm10 = vmand %vm7845_vm13, %vm7844_vm14  ;;  %7848 = vst [vmem:[#allocation62_spill] sm:$0xff] %v4740_v18  ;;  %v4749_v11 = vmul.f32 %v7849_v19, %v935_v49  ;;  %v734_v2 = vsel %vm7842_vm2, %v7840_v25, %v7841_v10  ;;  %v4758_v38 = vmul.f32 %v7850_v0, %v1022_v63  ;;  %v4761_v7 = vmul.f32 %v7850_v0, %v1023_v26  ;;  %v4769_v19 = vpop.permute.xlu1 %386  ;;  %v7857_v10 = vld [vmem:[#allocation148_spill] sm:$0xff]  ;;  %v7865_v26 = vld [vmem:[#allocation5_spill] sm:$0xff] }
 0x28a   :  { %vm7853_vm1 = vnez %v7608_v56  ;;  %vm7855_vm13 = vnez %v7854_v13  ;;  %7856 = vst [vmem:[#allocation55_spill] sm:$0xff] %v4769_v19  ;;  %vm7858_vm3 = vnez %v7857_v10  ;;  %v7861_v13 = vld [vmem:[#allocation72_spill] sm:$0xff]  ;;  %v7862_v56 = vld [vmem:[#allocation70_spill] sm:$0xff]  ;;  %vm7863_vm2 = vcmp.lt.s32.totalorder %v3830_v3, 114  ;;  %2051 = vrot.lane.b32.xlu1 %v7791_v59, %s2912_s22  ;;  %s8313_s22 = smov 98  }
 0x28b   :  { %7851 = vst [vmem:[#allocation48_spill] sm:$0xff] %v4758_v38  ;;  %7852 = vst [vmem:[#allocation69_spill] sm:$0xff] %v4761_v7  ;;  %v662_v5 = vsel %vm7853_vm1, %v648_v39, 0.0  ;;  %v663_v49 = vsel %vm7855_vm13, %v646_v15, 0.0  ;;  %v750_v25 = vsel %vm7858_vm3, %v736_v58, 0.0  ;;  %v4780_v39 = vsel %vm4736_vm10, 1, %v7533_v28 }
 0x28c   :  { %v7859_v15 = vld [vmem:[#allocation149_spill] sm:$0xff]  ;;  %v1157_v10 = vsel %vm7863_vm2, %v7862_v56, %v7861_v13  ;;  %v884_v58 = vadd.f32 %v880_v30, %v4593_v43  ;;  %v885_v63 = vadd.f32 %v881_v1, %v4608_v50  ;;  %v4790_v18 = vpop.permute.xlu0 %1424  ;;  %v674_v19 = vmul.f32 %v7865_v26, %v662_v5  ;;  %vm7866_vm10 = vmmov %vm7863_vm2  ;;  %v7868_v7 = vld [vmem:[#allocation159_spill] sm:$0xff] }
 0x28d   :  { %vm7860_vm14 = vnez %v7859_v15  ;;  %7864 = vst [vmem:[#allocation56_spill] sm:$0xff] %v4790_v18  ;;  %v675_v36 = vmul.f32 %v7865_v26, %v663_v49  ;;  %v7867_v15 = vsel %vm7778_vm11, %v4484_v46, 0.0  ;;  %v7869_v43 = vsel %vm4447_vm6, %v4586_v22, 0.0  ;;  %v7870_v1 = vld [vmem:[#allocation112_spill] sm:$0xff]  ;;  %v4821_v5 = vpop.permute.xlu1 %1290  ;;  %v7873_v22 = vld [vmem:[#allocation66_spill] sm:$0xff] }
 0x28e   :  { %v751_v0 = vsel %vm7860_vm14, %v734_v2, 0.0  ;;  %v1159_v2 = vsel %vm7866_vm10, %v7861_v13, %v7862_v56  ;;  %v630_v38 = vmul.f32 %v7868_v7, %v7867_v15  ;;  %v944_v50 = vmul.f32 %v7870_v1, %v7869_v43  ;;  %7872 = vst [vmem:[#allocation71_spill] sm:$0xff] %v4821_v5  ;;  %v7875_v46 = vld [vmem:[#allocation74_spill] sm:$0xff]  ;;  %2071 = vrot.lane.b32.xlu1 %v7772_v44, %s2911_s21  ;;  %v7893_v5 = vld [vmem:[#allocation81_spill] sm:$0xff] }
 0x28f   :  { %v7871_v30 = vsel %vm4454_vm4, %v4580_v47, 0.0  ;;  %v4824_v49 = vmul.f32 %v7873_v22, %v750_v25  ;;  %v4827_v15 = vmul.f32 %v7873_v22, %v751_v0  ;;  %v1172_v47 = vsel %vm4664_vm15, %v1157_v10, 0.0  ;;  %v7880_v10 = vld [vmem:[#allocation78_spill] sm:$0xff] }
 0x290   :  { %v945_v56 = vmul.f32 %v7870_v1, %v7871_v30  ;;  %v7874_v43 = vsel %vm4066_vm0, %v4504_v8, 0.0  ;;  %v1173_v13 = vsel %vm4678_vm9, %v1159_v2, 0.0  ;;  %v7876_v1 = vld [vmem:[#allocation58_spill] sm:$0xff]  ;;  %vm7877_vm2 = vcmp.lt.s32.totalorder %v3830_v3, 18  ;;  %v4844_v26 = vpop.permute.xlu0 %1464 }
 0x291   :  { %v631_v30 = vmul.f32 %v7868_v7, %v7874_v43  ;;  %v822_v25 = vsel %vm7877_vm2, %v7876_v1, %v7875_v46  ;;  %v916_v0 = vadd.f32 %v4370_v20, %v884_v58  ;;  %v917_v22 = vadd.f32 %v4408_v41, %v885_v63  ;;  %7878 = vst [vmem:[#allocation72_spill] sm:$0xff] %v4844_v26  ;;  %vm7879_vm10 = vmmov %vm7877_vm2  ;;  %v7881_v43 = vld [vmem:[#allocation61_spill] sm:$0xff]  ;;  %v7886_v63 = vld [vmem:[#allocation76_spill] sm:$0xff] }
 0x292   :  { %v824_v8 = vsel %vm7879_vm10, %v7875_v46, %v7876_v1  ;;  %vm7882_vm14 = vcmp.lt.s32.totalorder %v3830_v3, 14  ;;  %v7884_v41 = vld [vmem:[#allocation133_spill] sm:$0xff]  ;;  %v7887_v58 = vld [vmem:[#allocation60_spill] sm:$0xff]  ;;  %vm7888_vm10 = vcmp.lt.s32.totalorder %v3830_v3, 16  ;;  %v7892_v26 = vld [vmem:[#allocation63_spill] sm:$0xff]  ;;  %vm7898_vm3 = vnez %v7684_v40  ;;  %2075 = vrot.lane.b32.xlu1 %v7791_v59, %s2911_s21  ;;  %s8240_s21 = smov 110  }
 0x293   :  { %v962_v2 = vsel %vm7882_vm14, %v7881_v43, %v7880_v10  ;;  %vm7883_vm2 = vmmov %vm7882_vm14  ;;  %v634_v20 = vadd.f32 %v630_v38, %v7884_v41  ;;  %v4866_v1 = vsel %vm7888_vm10, %v7887_v58, %v7886_v63  ;;  %v4876_v38 = vpop.permute.xlu1 %1294  ;;  %v7891_v41 = vld [vmem:[#allocation29_spill] sm:$0xff]  ;;  %vm7914_vm13 = vcmp.lt.s32.totalorder %v3830_v3, 127 }
 0x294   :  { %v964_v7 = vsel %vm7883_vm2, %v7880_v10, %v7881_v43  ;;  %vm7889_vm14 = vmmov %vm7888_vm10  ;;  %v948_v10 = vadd.f32 %v944_v50, %v916_v0  ;;  %v949_v43 = vadd.f32 %v945_v56, %v917_v22  ;;  %7890 = vst [vmem:[#allocation70_spill] sm:$0xff] %v4876_v38  ;;  %v4879_v57 = vmul.f32 %v7891_v41, %v1172_v47 }
 0x295   :  { %v4872_v46 = vsel %vm7889_vm14, %v7886_v63, %v7887_v58  ;;  %v4882_v31 = vmul.f32 %v7891_v41, %v1173_v13  ;;  %vm7894_vm2 = vcmp.lt.s32.totalorder %v3830_v3, 1  ;;  %v7895_v63 = vld [vmem:[#allocation134_spill] sm:$0xff]  ;;  %vm7896_vm10 = vnez %v7635_v45  ;;  %v7913_v41 = vld [vmem:[#allocation65_spill] sm:$0xff] }
 0x296   :  { %v1051_v18 = vsel %vm7894_vm2, %v7893_v5, %v7892_v26  ;;  %v635_v58 = vadd.f32 %v631_v30, %v7895_v63  ;;  %v838_v50 = vsel %vm7896_vm10, %v824_v8, 0.0  ;;  %vm7897_vm14 = vnez %v7641_v34  ;;  %v7938_v45 = vld [vmem:[#allocation137_spill] sm:$0xff]  ;;  %2095 = vrot.lane.b32.xlu1 %v7772_v44, %s2915_s0 }
 0x297   :  { %v839_v56 = vsel %vm7897_vm14, %v822_v25, 0.0  ;;  %v978_v22 = vsel %vm4224_vm7, %v964_v7, 0.0  ;;  %v979_v13 = vsel %vm7898_vm3, %v962_v2, 0.0  ;;  %v7899_v47 = vrot.slane %v4196_v37, %v3810_v61  ;;  %v4911_v25 = vpop.permute.xlu0 %1468  ;;  %1793 = vrot.lane.b32.xlu0 %v7938_v45, %s2918_s27 }
 0x298   :  { %v7900_v0 = vmov 0  ;;  %v7903_v30 = vrot.slane %v4196_v37, %v3812_v17  ;;  %v7904_v8 = vmov 0  ;;  %7907 = vst [vmem:[#allocation78_spill] sm:$0xff] %v4911_v25  ;;  %vm7908_vm7 = vnez %v7659_v29  ;;  %v7952_v25 = vld [vmem:[#allocation80_spill] sm:$0xff] }
 0x299   :  { %vm4900_vm5 = vcmp.eq.s32.totalorder %v7899_v47, 1  ;;  %vm7909_vm3 = vnez %v7667_v14  ;;  %vm7910_vm14 = vcmp.lt.s32.totalorder %v3830_v3, 1  ;;  %v678_v37 = vadd.f32 %v674_v19, %v634_v20  ;;  %v4936_v19 = vpop.permute.xlu1 %545  ;;  %v7917_v20 = vld [vmem:[#allocation77_spill] sm:$0xff] }
 0x29a   :  { %v7901_v0 = vsel %vm4900_vm5, 4294967295, %v7900_v0  ;;  %vm4907_vm2 = vcmp.eq.s32.totalorder %v7903_v30, 1  ;;  %v1049_v63 = vsel %vm7910_vm14, %v7892_v26, %v7893_v5  ;;  %vm7911_vm10 = vnez %v7693_v55  ;;  %v7912_v30 = vld [vmem:[#allocation83_spill] sm:$0xff]  ;;  %7915 = vst [vmem:[#allocation61_spill] sm:$0xff] %v4936_v19  ;;  %v7916_v26 = vld [vmem:[#allocation14_spill] sm:$0xff]  ;;  %2099 = vrot.lane.b32.xlu1 %v7791_v59, %s2915_s0  ;;  %s8368_s0 = smov 97  }
 0x29b   :  { %7902 = vst [vmem:[#allocation74_spill] sm:$0xff] %v7901_v0  ;;  %v7905_v8 = vsel %vm4907_vm2, 4294967295, %v7904_v8  ;;  %v1054_v47 = vsel %vm7911_vm10, %v1051_v18, 0.0  ;;  %v1081_v7 = vsel %vm7914_vm13, %v7913_v41, %v7912_v30  ;;  %v992_v2 = vadd.f32 %v4492_v60, %v948_v10  ;;  %v8009_v55 = vld [vmem:[#allocation143_spill] sm:$0xff] }
 0x29c   :  { %7906 = vst [vmem:[#allocation58_spill] sm:$0xff] %v7905_v8  ;;  %v993_v40 = vadd.f32 %v4495_v21, %v949_v43  ;;  %v4939_v5 = vmul.f32 %v7916_v26, %v978_v22  ;;  %v4942_v18 = vmul.f32 %v7916_v26, %v979_v13  ;;  %v4945_v23 = vmul.f32 %v7917_v20, %v838_v50  ;;  %v7920_v43 = vld [vmem:[#allocation85_spill] sm:$0xff]  ;;  %v7921_v22 = vld [vmem:[#allocation67_spill] sm:$0xff]  ;;  %v4960_v26 = vpop.permute.xlu0 %1554  ;;  %v7924_v50 = vld [vmem:[#allocation18_spill] sm:$0xff] }
 0x29d   :  { %v679_v34 = vadd.f32 %v675_v36, %v635_v58  ;;  %vm7918_vm13 = vnez %v7697_v52  ;;  %v4950_v21 = vmul.f32 %v7917_v20, %v839_v56  ;;  %vm7919_vm14 = vcmp.lt.s32.totalorder %v3830_v3, 127  ;;  %7923 = vst [vmem:[#allocation133_spill] sm:$0xff] %v4960_v26  ;;  %v7927_v56 = vld [vmem:[#allocation92_spill] sm:$0xff]  ;;  %v8204_v8 = vld [vmem:[#allocation121_spill] sm:$0xff] }
 0x29e   :  { %v1055_v60 = vsel %vm7918_vm13, %v1049_v63, 0.0  ;;  %v1083_v10 = vsel %vm7919_vm14, %v7912_v30, %v7913_v41  ;;  %vm7922_vm1 = vcmp.lt.s32.totalorder %v3830_v3, 126  ;;  %v4963_v36 = vmul.f32 %v7924_v50, %v1054_v47  ;;  %v7928_v63 = vld [vmem:[#allocation68_spill] sm:$0xff]  ;;  %2119 = vrot.lane.b32.xlu1 %v7772_v44, %s2913_s23 }
 0x29f   :  { %v1114_v13 = vsel %vm7922_vm1, %v7921_v22, %v7920_v43  ;;  %vm7926_vm0 = vnez %v7649_v42  ;;  %vm7929_vm11 = vcmp.lt.s32.totalorder %v3830_v3, 17  ;;  %v7930_v41 = vrot.slane %v4383_v35, %v3810_v61  ;;  %v7961_v42 = vld [vmem:[#allocation138_spill] sm:$0xff] }
 0x2a0   :  { %7925 = vst [vmem:[#allocation76_spill] sm:$0xff] %v4963_v36  ;;  %v1086_v58 = vsel %vm7926_vm0, %v1081_v7, 0.0  ;;  %v215_v20 = vsel %vm7929_vm11, %v7928_v63, %v7927_v56  ;;  %v7931_v30 = vmov 0  ;;  %v7934_v26 = vrot.slane %v4383_v35, %v3812_v17  ;;  %1797 = vrot.lane.b32.xlu0 %v7961_v42, %s2918_s27 }
 0x2a1   :  { %vm4974_vm14 = vcmp.eq.s32.totalorder %v7930_v41, 1  ;;  %v7935_v47 = vmov 0  ;;  %v722_v7 = vadd.f32 %v4556_v54, %v678_v37  ;;  %vm7939_vm11 = vcmp.lt.s32.totalorder %v3830_v3, 126 }
 0x2a2   :  { %v7932_v30 = vsel %vm4974_vm14, 4294967295, %v7931_v30  ;;  %vm4981_vm1 = vcmp.eq.s32.totalorder %v7934_v26, 1  ;;  %v1116_v41 = vsel %vm7939_vm11, %v7920_v43, %v7921_v22  ;;  %vm7940_vm0 = vcmp.lt.s32.totalorder %v3830_v3, 17  ;;  %v7945_v43 = vld [vmem:[#allocation171_spill] sm:$0xff]  ;;  %2123 = vrot.lane.b32.xlu1 %v7791_v59, %s2913_s23 }
 0x2a3   :  { %7933 = vst [vmem:[#allocation60_spill] sm:$0xff] %v7932_v30  ;;  %v7936_v47 = vsel %vm4981_vm1, 4294967295, %v7935_v47  ;;  %v213_v19 = vsel %vm7940_vm0, %v7927_v56, %v7928_v63  ;;  %v1036_v35 = vadd.f32 %v4699_v27, %v992_v2  ;;  %v1037_v26 = vadd.f32 %v4743_v53, %v993_v40  ;;  %v7947_v27 = vld [vmem:[#allocation183_spill] sm:$0xff]  ;;  %v5012_v40 = vpop.permute.xlu1 %1449  ;;  %v7949_v53 = vld [vmem:[#allocation21_spill] sm:$0xff]  ;;  %v7951_v63 = vld [vmem:[#allocation82_spill] sm:$0xff] }
 0x2a4   :  { %7937 = vst [vmem:[#allocation63_spill] sm:$0xff] %v7936_v47  ;;  %vm7941_vm13 = vcmp.ge.s32.totalorder %v7769_v32, 1  ;;  %vm7942_vm10 = vcmp.lt.s32.totalorder %v3781_v62, 14  ;;  %v5005_v54 = vmul.f32 %v7924_v50, %v1055_v60  ;;  %vm7944_vm11 = vnez %v7652_v6  ;;  %7948 = vst [vmem:[#allocation134_spill] sm:$0xff] %v5012_v40  ;;  %2337 = vrot.lane.b32.xlu0 %v3703_v9, %s7982_s19 }
 0x2a5   :  { %vm63_vm4 = vmand %vm7942_vm10, %vm7941_vm13  ;;  %v1087_v37 = vsel %vm7944_vm11, %v1083_v10, 0.0  ;;  %vm7946_vm0 = vnez %v7945_v43  ;;  %v723_v2 = vadd.f32 %v7947_v27, %v679_v34  ;;  %v5015_v56 = vmul.f32 %v7949_v53, %v1086_v58  ;;  %v5027_v43 = vpop.permute.xlu0 %1508  ;;  %v7957_v34 = vld [vmem:[#allocation174_spill] sm:$0xff]  ;;  %v8101_v58 = vld [vmem:[#allocation173_spill] sm:$0xff] }
 0x2a6   :  { %7943 = vst [vmem:[#allocation81_spill] sm:$0xff] %v5005_v54  ;;  %v1130_v22 = vsel %vm7946_vm0, %v1114_v13, 0.0  ;;  %vm7953_vm10 = vcmp.lt.s32.totalorder %v3830_v3, 113  ;;  %v228_v13 = vsel %vm4400_vm12, %v215_v20, 0.0  ;;  %7956 = vst [vmem:[#allocation65_spill] sm:$0xff] %v5027_v43  ;;  %vm7958_vm0 = vnez %v7957_v34  ;;  %v7963_v20 = vld [vmem:[#allocation22_spill] sm:$0xff]  ;;  %2143 = vrot.lane.b32.xlu1 %v7772_v44, %s2918_s27 }
 0x2a7   :  { %7950 = vst [vmem:[#allocation83_spill] sm:$0xff] %v5015_v56  ;;  %v1200_v38 = vsel %vm7953_vm10, %v7952_v25, %v7951_v63  ;;  %vm7954_vm13 = vmmov %vm7953_vm10  ;;  %v1131_v27 = vsel %vm7958_vm0, %v1116_v41, 0.0  ;;  %v229_v50 = vsel %vm4417_vm8, %v213_v19, 0.0  ;;  %v766_v40 = vadd.f32 %v4824_v49, %v722_v7  ;;  %v7965_v43 = vld [vmem:[#allocation49_spill] sm:$0xff]  ;;  %v7966_v41 = vld [vmem:[#allocation120_spill] sm:$0xff] }
 0x2a8   :  { %v1202_v60 = vsel %vm7954_vm13, %v7951_v63, %v7952_v25  ;;  %v5035_v6 = vsel %vm63_vm4, 1, %v7533_v28  ;;  %v5040_v25 = vmul.f32 %v7949_v53, %v1087_v37  ;;  %v5043_v63 = vmul.f32 %v7963_v20, %v1130_v22  ;;  %v7967_v7 = vld [vmem:[#allocation26_spill] sm:$0xff]  ;;  %v5055_v53 = vpop.permute.xlu1 %424  ;;  %2341 = vrot.lane.b32.xlu0 %v3715_v33, %s7982_s19 }
 0x2a9   :  { %7960 = vst [vmem:[#allocation85_spill] sm:$0xff] %v5035_v6  ;;  %v1068_v34 = vadd.f32 %v7965_v43, %v1036_v35  ;;  %v1069_v56 = vadd.f32 %v7966_v41, %v1037_v26  ;;  %v1204_v49 = vsel %vm4900_vm5, %v1200_v38, 0.0  ;;  %v1205_v19 = vsel %vm4907_vm2, %v1202_v60, 0.0  ;;  %7968 = vst [vmem:[#allocation68_spill] sm:$0xff] %v5055_v53  ;;  %v5069_v43 = vpop.permute.xlu0 %1512  ;;  %v8010_v6 = vld [vmem:[#allocation182_spill] sm:$0xff] }
 0x2aa   :  { %7962 = vst [vmem:[#allocation67_spill] sm:$0xff] %v5040_v25  ;;  %7964 = vst [vmem:[#allocation92_spill] sm:$0xff] %v5043_v63  ;;  %v240_v54 = vmul.f32 %v7967_v7, %v228_v13  ;;  %v767_v37 = vadd.f32 %v4827_v15, %v723_v2  ;;  %v5058_v22 = vmul.f32 %v7963_v20, %v1131_v27  ;;  %vm7970_vm10 = vcmp.lt.s32.totalorder %v3781_v62, 14  ;;  %v7973_v15 = vld [vmem:[#allocation94_spill] sm:$0xff]  ;;  %v7974_v2 = vld [vmem:[#allocation91_spill] sm:$0xff] }
 0x2ab   :  { %v241_v35 = vmul.f32 %v7967_v7, %v229_v50  ;;  %v5067_v38 = vsel %vm7970_vm10, 1, %v7533_v28  ;;  %7972 = vst [vmem:[#allocation82_spill] sm:$0xff] %v5069_v43  ;;  %vm7975_vm13 = vcmp.lt.s32.totalorder %v3830_v3, 112  ;;  %v7977_v13 = vld [vmem:[#allocation51_spill] sm:$0xff]  ;;  %vm7978_vm10 = vcmp.lt.s32.totalorder %v7769_v32, 15  ;;  %2147 = vrot.lane.b32.xlu1 %v7791_v59, %s2918_s27 }
 0x2ac   :  { %7969 = vst [vmem:[#allocation137_spill] sm:$0xff] %v5058_v22  ;;  %7971 = vst [vmem:[#allocation183_spill] sm:$0xff] %v5067_v38  ;;  %v1232_v60 = vsel %vm7975_vm13, %v7974_v2, %v7973_v15  ;;  %v810_v27 = vadd.f32 %v7977_v13, %v766_v40  ;;  %vm7979_vm4 = vcmp.lt.s32.totalorder %v3781_v62, 14  ;;  %v7983_v7 = vld [vmem:[#allocation35_spill] sm:$0xff]  ;;  %v7984_v40 = vld [vmem:[#allocation177_spill] sm:$0xff]  ;;  %v7989_v25 = vmov 0  ;;  %1817 = vrot.lane.b32.xlu0 %v7938_v45, %s2914_s24 }
 0x2ad   :  { %vm7976_vm0 = vmmov %vm7975_vm13  ;;  %v5093_v20 = vmul.f32 %v7983_v7, %v1204_v49  ;;  %v7985_v13 = vld [vmem:[#allocation178_spill] sm:$0xff]  ;;  %v7986_v43 = vld [vmem:[#allocation127_spill] sm:$0xff]  ;;  %vm8000_vm13 = vcmp.lt.s32.totalorder %v3830_v3, 17  ;;  %v8068_v14 = vrot.slane %v4780_v39, %v3812_v17 }
 0x2ae   :  { %v1234_v50 = vsel %vm7976_vm0, %v7973_v15, %v7974_v2  ;;  %vm5086_vm11 = vmand %vm7979_vm4, %vm7978_vm10  ;;  %v5096_v15 = vmul.f32 %v7983_v7, %v1205_v19  ;;  %v1100_v2 = vadd.f32 %v7984_v40, %v1068_v34  ;;  %v1101_v41 = vadd.f32 %v7985_v13, %v1069_v56  ;;  %v7987_v22 = vld [vmem:[#allocation50_spill] sm:$0xff]  ;;  %v7994_v56 = vld [vmem:[#allocation39_spill] sm:$0xff]  ;;  %v5124_v40 = vpop.permute.xlu1 %426 }
 0x2af   :  { %v5103_v53 = vadd.f32 %v240_v54, %v7986_v43  ;;  %v7988_v63 = vrot.slane %v7987_v22, %v3810_v61  ;;  %v7991_v49 = vrot.slane %v7987_v22, %v3812_v17  ;;  %v7992_v34 = vmov 0  ;;  %7995 = vst [vmem:[#allocation80_spill] sm:$0xff] %v5124_v40  ;;  %v7998_v54 = vld [vmem:[#allocation93_spill] sm:$0xff]  ;;  %v7999_v43 = vld [vmem:[#allocation95_spill] sm:$0xff]  ;;  %2167 = vrot.lane.b32.xlu1 %v7772_v44, %s2914_s24 }
 0x2b0   :  { %v811_v19 = vadd.f32 %v7994_v56, %v767_v37  ;;  %v1236_v22 = vsel %vm4974_vm14, %v1232_v60, 0.0  ;;  %v5136_v37 = vsel %vm5086_vm11, 1, %v7533_v28  ;;  %v5138_v56 = vpop.permute.xlu0 %1580  ;;  %v5144_v7 = vsel %vm8000_vm13, %v7999_v43, %v7998_v54  ;;  %v8004_v38 = vld [vmem:[#allocation105_spill] sm:$0xff]  ;;  %1821 = vrot.lane.b32.xlu0 %v7961_v42, %s2914_s24 }
 0x2b1   :  { %vm5108_vm0 = vcmp.eq.s32.totalorder %v7988_v63, 1  ;;  %vm5115_vm4 = vcmp.eq.s32.totalorder %v7991_v49, 1  ;;  %v7996_v63 = vld [vmem:[#allocation128_spill] sm:$0xff]  ;;  %v1237_v49 = vsel %vm4981_vm1, %v1234_v50, 0.0  ;;  %7997 = vst [vmem:[#allocation138_spill] sm:$0xff] %v5138_v56  ;;  %vm8003_vm10 = vcmp.lt.s32.totalorder %v3830_v3, 114 }
 0x2b2   :  { %v7990_v25 = vsel %vm5108_vm0, 4294967295, %v7989_v25  ;;  %v7993_v34 = vsel %vm5115_vm4, 4294967295, %v7992_v34  ;;  %v5127_v13 = vadd.f32 %v241_v35, %v7996_v63  ;;  %v8001_v35 = vld [vmem:[#allocation99_spill] sm:$0xff]  ;;  %v8002_v63 = vld [vmem:[#allocation97_spill] sm:$0xff]  ;;  %vm8006_vm1 = vcmp.lt.s32.totalorder %v3830_v3, 16  ;;  %vm8007_vm11 = vmmov %vm8003_vm10 }
 0x2b3   :  { %v1158_v60 = vsel %vm8003_vm10, %v8002_v63, %v8001_v35  ;;  %v8005_v50 = vld [vmem:[#allocation79_spill] sm:$0xff]  ;;  %v854_v40 = vadd.f32 %v4945_v23, %v810_v27  ;;  %v1160_v56 = vsel %vm8007_vm11, %v8001_v35, %v8002_v63  ;;  %vm8008_vm13 = vmmov %vm8006_vm1  ;;  %v1144_v47 = vadd.f32 %v8009_v55, %v1100_v2  ;;  %v8011_v23 = vld [vmem:[#allocation89_spill] sm:$0xff]  ;;  %v5183_v55 = vpop.permute.xlu1 %430  ;;  %2171 = vrot.lane.b32.xlu1 %v7791_v59, %s2914_s24 }
 0x2b4   :  { %v259_v26 = vsel %vm8006_vm1, %v8005_v50, %v8004_v38  ;;  %v257_v52 = vsel %vm8008_vm13, %v8004_v38, %v8005_v50  ;;  %v1145_v36 = vadd.f32 %v8010_v6, %v1101_v41  ;;  %v1248_v27 = vmul.f32 %v8011_v23, %v1236_v22  ;;  %v5198_v41 = vpop.permute.xlu0 %2001  ;;  %2361 = vrot.lane.b32.xlu0 %v3703_v9, %s2924_s13 }
 0x2b5   :  { %v1249_v30 = vmul.f32 %v8011_v23, %v1237_v49  ;;  %v855_v35 = vadd.f32 %v4950_v21, %v811_v19  ;;  %vm8012_vm10 = vcmp.lt.s32.totalorder %v7769_v32, 14  ;;  %vm8013_vm11 = vcmp.lt.s32.totalorder %v3781_v62, 14  ;;  %8017 = vst [vmem:[#allocation49_spill] sm:$0xff] %v5198_v41  ;;  %v8022_v49 = vld [vmem:[#allocation42_spill] sm:$0xff]  ;;  %v8037_v21 = vld [vmem:[#allocation31_spill] sm:$0xff] }
 0x2b6   :  { %vm5179_vm13 = vmand %vm8013_vm11, %vm8012_vm10  ;;  %vm8016_vm1 = vcmp.lt.s32.totalorder %v3830_v3, 17  ;;  %v272_v32 = vsel %vm7908_vm7, %v259_v26, 0.0  ;;  %v1174_v2 = vsel %vm4664_vm15, %v1158_v60, 0.0  ;;  %v1175_v19 = vsel %vm4678_vm9, %v1160_v56, 0.0  ;;  %v8024_v56 = vld [vmem:[#allocation100_spill] sm:$0xff] }
 0x2b7   :  { %v5189_v38 = vsel %vm8016_vm1, %v7998_v54, %v7999_v43  ;;  %v273_v54 = vsel %vm7909_vm3, %v257_v52, 0.0  ;;  %v8018_v43 = vrot.slane %v4730_v48, %v3810_v61  ;;  %v8019_v22 = vmov 0  ;;  %v5247_v6 = vpop.permute.xlu1 %1334  ;;  %2191 = vrot.lane.b32.xlu1 %v7772_v44, %s2920_s29 }
 0x2b8   :  { %v886_v50 = vadd.f32 %v8022_v49, %v854_v40  ;;  %v8023_v60 = vsel %vm7908_vm7, %v4872_v46, 0.0  ;;  %v1188_v52 = vadd.f32 %v4879_v57, %v1144_v47  ;;  %v1189_v62 = vadd.f32 %v4882_v31, %v1145_v36  ;;  %v8030_v46 = vld [vmem:[#allocation28_spill] sm:$0xff]  ;;  %v8031_v57 = vld [vmem:[#allocation106_spill] sm:$0xff]  ;;  %v8035_v36 = vld [vmem:[#allocation59_spill] sm:$0xff]  ;;  %8036 = vst [vmem:[#allocation51_spill] sm:$0xff] %v5247_v6  ;;  %v5259_v4 = vpop.permute.xlu0 %2005  ;;  %2365 = vrot.lane.b32.xlu0 %v3715_v33, %s2924_s13 }
 0x2b9   :  { %vm5209_vm1 = vcmp.eq.s32.totalorder %v8018_v43, 1  ;;  %v914_v26 = vmul.f32 %v8024_v56, %v8023_v60  ;;  %v8025_v43 = vrot.slane %v4730_v48, %v3812_v17  ;;  %v8026_v63 = vmov 0  ;;  %v8032_v47 = vld [vmem:[#allocation104_spill] sm:$0xff]  ;;  %8038 = vst [vmem:[#allocation177_spill] sm:$0xff] %v5259_v4 }
 0x2ba   :  { %v8020_v22 = vsel %vm5209_vm1, 4294967295, %v8019_v22  ;;  %v5233_v40 = vsel %vm5179_vm13, 1, %v7533_v28  ;;  %v284_v49 = vmul.f32 %v8030_v46, %v272_v32  ;;  %vm8033_vm11 = vcmp.lt.s32.totalorder %v3830_v3, 111 }
 0x2bb   :  { %8021 = vst [vmem:[#allocation120_spill] sm:$0xff] %v8020_v22  ;;  %vm5226_vm10 = vcmp.eq.s32.totalorder %v8025_v43, 1  ;;  %8029 = vst [vmem:[#allocation91_spill] sm:$0xff] %v5233_v40  ;;  %v1264_v31 = vsel %vm8033_vm11, %v8032_v47, %v8031_v57  ;;  %v887_v60 = vadd.f32 %v8035_v36, %v855_v35  ;;  %v5253_v32 = vmul.f32 %v8037_v21, %v1174_v2  ;;  %v8041_v2 = vld [vmem:[#allocation119_spill] sm:$0xff]  ;;  %v5289_v43 = vpop.permute.xlu1 %1338 }
 0x2bc   :  { %v8027_v63 = vsel %vm5226_vm10, 4294967295, %v8026_v63  ;;  %vm8034_vm9 = vmmov %vm8033_vm11  ;;  %v5256_v28 = vmul.f32 %v8037_v21, %v1175_v19  ;;  %v285_v23 = vmul.f32 %v8030_v46, %v273_v54  ;;  %v8039_v35 = vsel %vm7909_vm3, %v4866_v1, 0.0  ;;  %8044 = vst [vmem:[#allocation178_spill] sm:$0xff] %v5289_v43  ;;  %v8050_v46 = vld [vmem:[#allocation111_spill] sm:$0xff]  ;;  %1841 = vrot.lane.b32.xlu0 %v7938_v45, %s2920_s29  ;;  %2195 = vrot.lane.b32.xlu1 %v7791_v59, %s2920_s29  ;;  %v8122_v43 = vld [vmem:[#allocation64_spill] sm:$0xff] }
 0x2bd   :  { %8028 = vst [vmem:[#allocation94_spill] sm:$0xff] %v8027_v63  ;;  %v1266_v48 = vsel %vm8034_vm9, %v8031_v57, %v8032_v47  ;;  %v915_v57 = vmul.f32 %v8024_v56, %v8039_v35  ;;  %v918_v47 = vadd.f32 %v914_v26, %v886_v50  ;;  %v1268_v19 = vsel %vm5108_vm0, %v1264_v31, 0.0  ;;  %v8040_v26 = vld [vmem:[#allocation90_spill] sm:$0xff]  ;;  %v8059_v56 = vld [vmem:[#allocation103_spill] sm:$0xff] }
 0x2be   :  { %v1269_v54 = vsel %vm5115_vm4, %v1266_v48, 0.0  ;;  %v1220_v1 = vadd.f32 %v5093_v20, %v1188_v52  ;;  %v1221_v35 = vadd.f32 %v5096_v15, %v1189_v62  ;;  %v288_v50 = vadd.f32 %v284_v49, %v5103_v53  ;;  %v8045_v15 = vld [vmem:[#allocation109_spill] sm:$0xff]  ;;  %v8046_v62 = vld [vmem:[#allocation107_spill] sm:$0xff] }
 0x2bf   :  { %vm8042_vm9 = vcmp.lt.s32.totalorder %v3830_v3, 15  ;;  %v919_v48 = vadd.f32 %v915_v57, %v887_v60  ;;  %v289_v20 = vadd.f32 %v285_v23, %v5127_v13  ;;  %vm8047_vm11 = vcmp.lt.s32.totalorder %v3830_v3, 16  ;;  %v8049_v49 = vld [vmem:[#allocation113_spill] sm:$0xff]  ;;  %v5305_v60 = vpop.permute.xlu0 %2025  ;;  %v8054_v23 = vld [vmem:[#allocation118_spill] sm:$0xff]  ;;  %v8055_v57 = vld [vmem:[#allocation116_spill] sm:$0xff] }
 0x2c0   :  { %v301_v36 = vsel %vm8042_vm9, %v8041_v2, %v8040_v26  ;;  %vm8043_vm13 = vmmov %vm8042_vm9  ;;  %v258_v53 = vsel %vm8047_vm11, %v8046_v62, %v8045_v15  ;;  %vm8051_vm9 = vcmp.lt.s32.totalorder %v3830_v3, 113  ;;  %8052 = vst [vmem:[#allocation127_spill] sm:$0xff] %v5305_v60  ;;  %v1252_v21 = vadd.f32 %v1248_v27, %v1220_v1  ;;  %1845 = vrot.lane.b32.xlu0 %v7961_v42, %s2920_s29 }
 0x2c1   :  { %v303_v31 = vsel %vm8043_vm13, %v8040_v26, %v8041_v2  ;;  %vm8048_vm15 = vmmov %vm8047_vm11  ;;  %v1201_v2 = vsel %vm8051_vm9, %v8050_v46, %v8049_v49  ;;  %vm8056_vm11 = vcmp.lt.s32.totalorder %v3830_v3, 110  ;;  %v1253_v24 = vadd.f32 %v1249_v30, %v1221_v35  ;;  %2215 = vrot.lane.b32.xlu1 %v7772_v44, %s2916_s25 }
 0x2c2   :  { %v260_v52 = vsel %vm8048_vm15, %v8045_v15, %v8046_v62  ;;  %vm8053_vm4 = vmmov %vm8051_vm9  ;;  %v1297_v26 = vsel %vm8056_vm11, %v8055_v57, %v8054_v23  ;;  %v950_v62 = vadd.f32 %v4746_v16, %v918_v47  ;;  %v1280_v60 = vmul.f32 %v8059_v56, %v1268_v19 }
 0x2c3   :  { %v1203_v13 = vsel %vm8053_vm4, %v8049_v49, %v8050_v46  ;;  %vm8057_vm15 = vmmov %vm8056_vm11  ;;  %v316_v46 = vsel %vm4447_vm6, %v303_v31, 0.0  ;;  %vm8058_vm4 = vnez %v7745_v12  ;;  %v275_v16 = vsel %vm7909_vm3, %v258_v53, 0.0  ;;  %v5350_v53 = vpop.permute.xlu0 %2029 }
 0x2c4   :  { %v1299_v15 = vsel %vm8057_vm15, %v8054_v23, %v8055_v57  ;;  %v317_v49 = vsel %vm8058_vm4, %v301_v36, 0.0  ;;  %v274_v23 = vsel %vm7908_vm7, %v260_v52, 0.0  ;;  %v8060_v30 = vrot.slane %v4780_v39, %v3810_v61  ;;  %v5341_v36 = vpop.permute.xlu1 %1497  ;;  %8065 = vst [vmem:[#allocation128_spill] sm:$0xff] %v5350_v53  ;;  %v8066_v57 = vld [vmem:[#allocation34_spill] sm:$0xff]  ;;  %vm8075_vm15 = vmmov %vm8043_vm13  ;;  %v8077_v39 = vld [vmem:[#allocation163_spill] sm:$0xff]  ;;  %2385 = vrot.lane.b32.xlu0 %v3703_v9, %s8124_s20 }
 0x2c5   :  { %v8061_v27 = vmov 0  ;;  %v951_v47 = vadd.f32 %v4749_v11, %v919_v48  ;;  %8064 = vst [vmem:[#allocation39_spill] sm:$0xff] %v5341_v36  ;;  %v1281_v1 = vmul.f32 %v8059_v56, %v1269_v54  ;;  %v1206_v19 = vsel %vm4900_vm5, %v1201_v2, 0.0  ;;  %v8067_v2 = vld [vmem:[#allocation33_spill] sm:$0xff]  ;;  %v8103_v36 = vld [vmem:[#allocation76_spill] sm:$0xff]  ;;  %2219 = vrot.lane.b32.xlu1 %v7791_v59, %s2916_s25 }
 0x2c6   :  { %vm5336_vm9 = vcmp.eq.s32.totalorder %v8060_v30, 1  ;;  %v1207_v35 = vsel %vm4907_vm2, %v1203_v13, 0.0  ;;  %v1312_v31 = vsel %vm5209_vm1, %v1297_v26, 0.0  ;;  %v1313_v52 = vsel %vm5226_vm10, %v1299_v15, 0.0  ;;  %v8104_v53 = vld [vmem:[#allocation85_spill] sm:$0xff] }
 0x2c7   :  { %v8062_v27 = vsel %vm5336_vm9, 4294967295, %v8061_v27  ;;  %v328_v11 = vmul.f32 %v8066_v57, %v316_v46  ;;  %v329_v48 = vmul.f32 %v8066_v57, %v317_v49  ;;  %v994_v54 = vadd.f32 %v4939_v5, %v950_v62  ;;  %v8072_v5 = vld [vmem:[#allocation30_spill] sm:$0xff]  ;;  %v8074_v49 = vld [vmem:[#allocation124_spill] sm:$0xff] }
 0x2c8   :  { %8063 = vst [vmem:[#allocation50_spill] sm:$0xff] %v8062_v27  ;;  %v286_v30 = vmul.f32 %v8067_v2, %v274_v23  ;;  %v287_v13 = vmul.f32 %v8067_v2, %v275_v16  ;;  %v1284_v56 = vadd.f32 %v1280_v60, %v1252_v21  ;;  %v1285_v26 = vadd.f32 %v1281_v1, %v1253_v24  ;;  %v8073_v46 = vld [vmem:[#allocation122_spill] sm:$0xff]  ;;  %v5383_v60 = vpop.permute.xlu1 %468  ;;  %v8078_v1 = vld [vmem:[#allocation117_spill] sm:$0xff] }
 0x2c9   :  { %vm5364_vm11 = vcmp.eq.s32.totalorder %v8068_v14, 1  ;;  %v8069_v15 = vmov 0  ;;  %v5371_v62 = vmul.f32 %v8072_v5, %v1206_v19  ;;  %v304_v23 = vsel %vm8075_vm15, %v8074_v49, %v8073_v46  ;;  %vm8081_vm15 = vmmov %vm8043_vm13  ;;  %2389 = vrot.lane.b32.xlu0 %v3715_v33, %s8124_s20  ;;  %2239 = vrot.lane.b32.xlu1 %v7772_v44, %s2921_s30 }
 0x2ca   :  { %v8070_v15 = vsel %vm5364_vm11, 4294967295, %v8069_v15  ;;  %v8076_v24 = vsel %vm4400_vm12, %v5144_v7, 0.0  ;;  %v995_v21 = vadd.f32 %v4942_v18, %v951_v47  ;;  %v5386_v16 = vmul.f32 %v8072_v5, %v1207_v35  ;;  %v5395_v7 = vpop.permute.xlu0 %2049  ;;  %v8082_v35 = vld [vmem:[#allocation48_spill] sm:$0xff]  ;;  %v8093_v5 = vld [vmem:[#allocation161_spill] sm:$0xff] }
 0x2cb   :  { %8071 = vst [vmem:[#allocation93_spill] sm:$0xff] %v8070_v15  ;;  %v242_v14 = vmul.f32 %v8077_v39, %v8076_v24  ;;  %v1324_v19 = vmul.f32 %v8078_v1, %v1312_v31  ;;  %v1325_v57 = vmul.f32 %v8078_v1, %v1313_v52  ;;  %v8079_v2 = vsel %vm4417_vm8, %v5189_v38, 0.0  ;;  %8080 = vst [vmem:[#allocation95_spill] sm:$0xff] %v5395_v7  ;;  %v8092_v1 = vld [vmem:[#allocation102_spill] sm:$0xff]  ;;  %v8265_v15 = vld [vmem:[#allocation145_spill] sm:$0xff] }
 0x2cc   :  { %v243_v29 = vmul.f32 %v8077_v39, %v8079_v2  ;;  %v5397_v24 = vadd.f32 %v328_v11, %v288_v50  ;;  %v5399_v18 = vadd.f32 %v329_v48, %v289_v20  ;;  %v302_v47 = vsel %vm8081_vm15, %v8073_v46, %v8074_v49  ;;  %v8083_v50 = vld [vmem:[#allocation132_spill] sm:$0xff]  ;;  %v8084_v11 = vld [vmem:[#allocation126_spill] sm:$0xff]  ;;  %v8088_v48 = vld [vmem:[#allocation131_spill] sm:$0xff] }
 0x2cd   :  { %v1038_v31 = vadd.f32 %v8082_v35, %v994_v54  ;;  %v1328_v52 = vadd.f32 %v1324_v19, %v1284_v56  ;;  %v5408_v38 = vadd.f32 %v1325_v57, %v1285_v26  ;;  %v318_v2 = vsel %vm4447_vm6, %v304_v23, 0.0  ;;  %v8087_v57 = vld [vmem:[#allocation139_spill] sm:$0xff]  ;;  %v8090_v26 = vld [vmem:[#allocation129_spill] sm:$0xff]  ;;  %v5429_v19 = vpop.permute.xlu1 %472  ;;  %1865 = vrot.lane.b32.xlu0 %v7938_v45, %s2917_s26  ;;  %2243 = vrot.lane.b32.xlu1 %v7791_v59, %s2921_s30 }
 0x2ce   :  { %vm8085_vm13 = vcmp.lt.s32.totalorder %v3830_v3, 112  ;;  %vm8089_vm7 = vcmp.lt.s32.totalorder %v3830_v3, 98  ;;  %v246_v46 = vadd.f32 %v242_v14, %v8090_v26  ;;  %v8091_v49 = vld [vmem:[#allocation69_spill] sm:$0xff]  ;;  %v319_v35 = vsel %vm8058_vm4, %v302_v47, 0.0  ;;  %v5442_v14 = vpop.permute.xlu0 %2053  ;;  %v8100_v47 = vld [vmem:[#allocation164_spill] sm:$0xff] }
 0x2cf   :  { %v1233_v20 = vsel %vm8085_vm13, %v8084_v11, %v8083_v50  ;;  %vm8086_vm15 = vmmov %vm8085_vm13  ;;  %v1341_v54 = vsel %vm8089_vm7, %v8088_v48, %v8087_v57  ;;  %v1039_v23 = vadd.f32 %v8091_v49, %v995_v21  ;;  %vm8094_vm13 = vcmp.lt.s32.totalorder %v3830_v3, 1  ;;  %8097 = vst [vmem:[#allocation99_spill] sm:$0xff] %v5442_v14  ;;  %v8098_v21 = vld [vmem:[#allocation87_spill] sm:$0xff]  ;;  %v8120_v14 = vld [vmem:[#allocation81_spill] sm:$0xff] }
 0x2d0   :  { %v1235_v56 = vsel %vm8086_vm15, %v8083_v50, %v8084_v11  ;;  %v345_v39 = vsel %vm8094_vm13, %v8093_v5, %v8092_v1  ;;  %vm8095_vm15 = vmmov %vm8094_vm13  ;;  %v8096_v11 = vld [vmem:[#allocation130_spill] sm:$0xff]  ;;  %v330_v26 = vmul.f32 %v8098_v21, %v318_v2  ;;  %v1238_v12 = vsel %vm4974_vm14, %v1233_v20, 0.0 }
 0x2d1   :  { %v347_v50 = vsel %vm8095_vm15, %v8092_v1, %v8093_v5  ;;  %v247_v51 = vadd.f32 %v243_v29, %v8096_v11  ;;  %vm8102_vm7 = vmmov %vm8094_vm13  ;;  %v1070_v7 = vadd.f32 %v8103_v36, %v1038_v31  ;;  %v8105_v41 = vrot.slane %v8104_v53, %v3810_v61  ;;  %v8109_v29 = vld [vmem:[#allocation63_spill] sm:$0xff]  ;;  %1869 = vrot.lane.b32.xlu0 %v7961_v42, %s2917_s26 }
 0x2d2   :  { %v348_v10 = vsel %vm8102_vm7, %v8101_v58, %v8100_v47  ;;  %v8106_v5 = vmov 0  ;;  %vm8110_vm15 = vnez %v8109_v29  ;;  %vm8111_vm3 = vcmp.lt.s32.totalorder %v3830_v3, 98  ;;  %v5493_v6 = vpop.permute.xlu0 %2073  ;;  %2263 = vrot.lane.b32.xlu1 %v7772_v44, %s2917_s26  ;;  %v8186_v29 = vld [vmem:[#allocation140_spill] sm:$0xff] }
 0x2d3   :  { %vm5455_vm13 = vcmp.eq.s32.totalorder %v8105_v41, 1  ;;  %v1239_v1 = vsel %vm8110_vm15, %v1235_v56, 0.0  ;;  %v1343_v2 = vsel %vm8111_vm3, %v8087_v57, %v8088_v48  ;;  %v1356_v36 = vsel %vm5336_vm9, %v1341_v54, 0.0  ;;  %v8116_v56 = vld [vmem:[#allocation169_spill] sm:$0xff]  ;;  %v8118_v48 = vld [vmem:[#allocation170_spill] sm:$0xff] }
 0x2d4   :  { %v8107_v5 = vsel %vm5455_vm13, 4294967295, %v8106_v5  ;;  %v346_v41 = vsel %vm8102_vm7, %v8100_v47, %v8101_v58  ;;  %v8112_v31 = vrot.slane %v8104_v53, %v3812_v17  ;;  %v8113_v20 = vmov 0  ;;  %v5487_v58 = vpop.permute.xlu1 %1376  ;;  %v8121_v47 = vld [vmem:[#allocation151_spill] sm:$0xff] }
 0x2d5   :  { %8108 = vst [vmem:[#allocation97_spill] sm:$0xff] %v8107_v5  ;;  %vm8117_vm3 = vnez %v8116_v56  ;;  %vm8119_vm6 = vnez %v8118_v48  ;;  %v290_v11 = vadd.f32 %v286_v30, %v246_v46  ;;  %v1071_v27 = vadd.f32 %v8120_v14, %v1039_v23  ;;  %v8123_v46 = vld [vmem:[#allocation83_spill] sm:$0xff]  ;;  %2409 = vrot.lane.b32.xlu0 %v3703_v9, %s2928_s15 }
 0x2d6   :  { %vm5476_vm4 = vcmp.eq.s32.totalorder %v8112_v31, 1  ;;  %v360_v57 = vsel %vm8117_vm3, %v347_v50, 0.0  ;;  %v361_v54 = vsel %vm8119_vm6, %v345_v39, 0.0  ;;  %v331_v53 = vmul.f32 %v8098_v21, %v319_v35  ;;  %v8129_v21 = vld [vmem:[#allocation176_spill] sm:$0xff]  ;;  %2267 = vrot.lane.b32.xlu1 %v7791_v59, %s2917_s26 }
 0x2d7   :  { %v8114_v20 = vsel %vm5476_vm4, 4294967295, %v8113_v20  ;;  %v1368_v31 = vmul.f32 %v8121_v47, %v1356_v36  ;;  %v291_v4 = vadd.f32 %v287_v13, %v247_v51  ;;  %v362_v40 = vsel %vm8117_vm3, %v348_v10, 0.0  ;;  %v8125_v13 = vld [vmem:[#allocation73_spill] sm:$0xff] }
 0x2d8   :  { %8115 = vst [vmem:[#allocation105_spill] sm:$0xff] %v8114_v20  ;;  %v5496_v50 = vmul.f32 %v8122_v43, %v1238_v12  ;;  %v1357_v30 = vsel %vm5364_vm11, %v1343_v2, 0.0  ;;  %v363_v39 = vsel %vm8119_vm6, %v346_v41, 0.0  ;;  %v1102_v23 = vadd.f32 %v8123_v46, %v1070_v7  ;;  %v8126_v2 = vld [vmem:[#allocation101_spill] sm:$0xff]  ;;  %v8127_v41 = vld [vmem:[#allocation67_spill] sm:$0xff]  ;;  %v8128_v46 = vld [vmem:[#allocation46_spill] sm:$0xff] }
 0x2d9   :  { %v5506_v51 = vmul.f32 %v8122_v43, %v1239_v1  ;;  %v1369_v10 = vmul.f32 %v8121_v47, %v1357_v30  ;;  %v372_v35 = vmul.f32 %v8125_v13, %v360_v57  ;;  %v373_v12 = vmul.f32 %v8125_v13, %v361_v54  ;;  %v5519_v43 = vpop.permute.xlu1 %1380  ;;  %v8137_v47 = vld [vmem:[#allocation41_spill] sm:$0xff]  ;;  %v8138_v13 = vld [vmem:[#allocation44_spill] sm:$0xff]  ;;  %2413 = vrot.lane.b32.xlu0 %v3715_v33, %s2928_s15 }
 0x2da   :  { %v334_v14 = vadd.f32 %v330_v26, %v290_v11  ;;  %v374_v36 = vmul.f32 %v8126_v2, %v362_v40  ;;  %v1103_v7 = vadd.f32 %v8127_v41, %v1071_v27  ;;  %vm8130_vm7 = vcmp.lt.s32.totalorder %v3830_v3, 111  ;;  %v5528_v40 = vpop.permute.xlu0 %2077  ;;  %v8132_v27 = vld [vmem:[#allocation175_spill] sm:$0xff]  ;;  %v8133_v11 = vld [vmem:[#allocation172_spill] sm:$0xff]  ;;  %2287 = vrot.lane.b32.xlu1 %v7772_v44, %s2908_s4 }
 0x2db   :  { %v1265_v1 = vsel %vm8130_vm7, %v8129_v21, %v8128_v46  ;;  %v335_v30 = vadd.f32 %v331_v53, %v291_v4  ;;  %v375_v57 = vmul.f32 %v8126_v2, %v363_v39  ;;  %vm8131_vm6 = vmmov %vm8130_vm7  ;;  %v5526_v26 = vadd.f32 %v1368_v31, %v1328_v52  ;;  %v8136_v53 = vld [vmem:[#allocation92_spill] sm:$0xff] }
 0x2dc   :  { %v1267_v54 = vsel %vm8131_vm6, %v8128_v46, %v8129_v21  ;;  %vm8134_vm3 = vcmp.lt.s32.totalorder %v3830_v3, 112  ;;  %v1146_v39 = vadd.f32 %v8136_v53, %v1102_v23  ;;  %vm8139_vm6 = vcmp.lt.s32.totalorder %v3830_v3, 97 }
 0x2dd   :  { %v478_v41 = vsel %vm8134_vm3, %v8133_v11, %v8132_v27  ;;  %vm8135_vm7 = vmmov %vm8134_vm3  ;;  %v1386_v52 = vsel %vm8139_vm6, %v8138_v13, %v8137_v47  ;;  %v5546_v21 = vadd.f32 %v372_v35, %v5397_v24  ;;  %v1270_v31 = vsel %vm5108_vm0, %v1265_v1, 0.0  ;;  %v8141_v24 = vld [vmem:[#allocation137_spill] sm:$0xff]  ;;  %v5567_v53 = vpop.permute.xlu1 %558  ;;  %1889 = vrot.lane.b32.xlu0 %v7938_v45, %s2908_s4 }
 0x2de   :  { %v480_v4 = vsel %vm8135_vm7, %v8132_v27, %v8133_v11  ;;  %vm8140_vm3 = vmmov %vm8139_vm6  ;;  %v5555_v23 = vadd.f32 %v1369_v10, %v5408_v38  ;;  %v5560_v27 = vadd.f32 %v373_v12, %v5399_v18  ;;  %v5562_v11 = vadd.f32 %v374_v36, %v334_v14  ;;  %8143 = vst [vmem:[#allocation79_spill] sm:$0xff] %v5567_v53  ;;  %v5577_v10 = vpop.permute.xlu0 %2097  ;;  %v8145_v12 = vld [vmem:[#allocation75_spill] sm:$0xff] }
 0x2df   :  { %v1388_v46 = vsel %vm8140_vm3, %v8137_v47, %v8138_v13  ;;  %v1147_v35 = vadd.f32 %v8141_v24, %v1103_v7  ;;  %vm8142_vm7 = vnez %v7993_v34  ;;  %v5569_v2 = vadd.f32 %v375_v57, %v335_v30  ;;  %8144 = vst [vmem:[#allocation143_spill] sm:$0xff] %v5577_v10  ;;  %v8146_v7 = vld [vmem:[#allocation114_spill] sm:$0xff]  ;;  %v8147_v30 = vld [vmem:[#allocation144_spill] sm:$0xff]  ;;  %v8153_v24 = vld [vmem:[#allocation55_spill] sm:$0xff]  ;;  %2291 = vrot.lane.b32.xlu1 %v7791_v59, %s2908_s4 }
 0x2e0   :  { %v1271_v1 = vsel %vm8142_vm7, %v1267_v54, 0.0  ;;  %v494_v38 = vsel %vm4974_vm14, %v478_v41, 0.0  ;;  %v495_v47 = vsel %vm8110_vm15, %v480_v4, 0.0  ;;  %v1402_v18 = vsel %vm5455_vm13, %v1386_v52, 0.0  ;;  %v8149_v41 = vld [vmem:[#allocation40_spill] sm:$0xff] }
 0x2e1   :  { %v1190_v13 = vadd.f32 %v5253_v32, %v1146_v39  ;;  %v5581_v14 = vmul.f32 %v8145_v12, %v1270_v31  ;;  %v1403_v36 = vsel %vm5476_vm4, %v1388_v46, 0.0  ;;  %vm8148_vm6 = vcmp.lt.s32.totalorder %v3830_v3, 127  ;;  %v8151_v31 = vld [vmem:[#allocation110_spill] sm:$0xff]  ;;  %v5645_v10 = vpop.permute.xlu1 %1537  ;;  %1893 = vrot.lane.b32.xlu0 %v7961_v42, %s2908_s4 }
 0x2e2   :  { %v389_v57 = vsel %vm8148_vm6, %v8147_v30, %v8146_v7  ;;  %v5592_v54 = vmul.f32 %v8145_v12, %v1271_v1  ;;  %v5595_v4 = vmul.f32 %v8149_v41, %v494_v38  ;;  %vm8150_vm3 = vmmov %vm8148_vm6  ;;  %v5605_v39 = vmul.f32 %v8149_v41, %v495_v47  ;;  %v8154_v1 = vld [vmem:[#allocation47_spill] sm:$0xff]  ;;  %v8157_v47 = vld [vmem:[#allocation156_spill] sm:$0xff]  ;;  %v5632_v48 = vpop.permute.xlu0 %2101  ;;  %8169 = vst [vmem:[#allocation104_spill] sm:$0xff] %v5645_v10 }
 0x2e3   :  { %v391_v32 = vsel %vm8150_vm3, %v8146_v7, %v8147_v30  ;;  %v1191_v52 = vadd.f32 %v5256_v28, %v1147_v35  ;;  %v5609_v46 = vmul.f32 %v8151_v31, %v1402_v18  ;;  %vm8155_vm6 = vmmov %vm8150_vm3  ;;  %v392_v7 = vsel %vm8150_vm3, %v8153_v24, %v8154_v1  ;;  %v8159_v28 = vld [vmem:[#allocation125_spill] sm:$0xff]  ;;  %v8160_v35 = vld [vmem:[#allocation68_spill] sm:$0xff]  ;;  %8163 = vst [vmem:[#allocation106_spill] sm:$0xff] %v5632_v48 }
 0x2e4   :  { %v390_v38 = vsel %vm8155_vm6, %v8154_v1, %v8153_v24  ;;  %v5620_v30 = vmul.f32 %v8151_v31, %v1403_v36  ;;  %vm8158_vm8 = vnez %v8157_v47  ;;  %vm8161_vm12 = vcmp.lt.s32.totalorder %v3830_v3, 113  ;;  %v8164_v1 = vld [vmem:[#allocation157_spill] sm:$0xff]  ;;  %v8166_v31 = vld [vmem:[#allocation80_spill] sm:$0xff]  ;;  %2311 = vrot.lane.b32.xlu1 %v7772_v44, %s7885_s7 }
 0x2e5   :  { %8152 = vst [vmem:[#allocation182_spill] sm:$0xff] %v5609_v46  ;;  %v404_v41 = vsel %vm8158_vm8, %v389_v57, 0.0  ;;  %v433_v18 = vsel %vm8161_vm12, %v8160_v35, %v8159_v28  ;;  %vm8162_vm6 = vmmov %vm8161_vm12  ;;  %v1222_v24 = vadd.f32 %v5371_v62, %v1190_v13  ;;  %vm8165_vm3 = vnez %v8164_v1  ;;  %v8178_v48 = vld [vmem:[#allocation57_spill] sm:$0xff]  ;;  %2433 = vrot.lane.b32.xlu0 %v3703_v9, %s8240_s21 }
 0x2e6   :  { %8156 = vst [vmem:[#allocation42_spill] sm:$0xff] %v5620_v30  ;;  %v435_v12 = vsel %vm8162_vm6, %v8159_v28, %v8160_v35  ;;  %v405_v36 = vsel %vm8165_vm3, %v391_v32, 0.0  ;;  %vm8167_vm4 = vmmov %vm8162_vm6  ;;  %v406_v62 = vsel %vm8158_vm8, %v390_v38, 0.0  ;;  %v407_v13 = vsel %vm8165_vm3, %v392_v7, 0.0  ;;  %v8170_v32 = vld [vmem:[#allocation183_spill] sm:$0xff]  ;;  %v8177_v7 = vld [vmem:[#allocation84_spill] sm:$0xff] }
 0x2e7   :  { %v434_v57 = vsel %vm8167_vm4, %v8166_v31, %v5183_v55  ;;  %vm8168_vm12 = vmmov %vm8167_vm4  ;;  %v8171_v28 = vrot.slane %v8170_v32, %v3810_v61  ;;  %v8172_v35 = vmov 0  ;;  %vm8175_vm6 = vcmp.lt.s32.totalorder %v3830_v3, 112  ;;  %v8179_v30 = vld [vmem:[#allocation43_spill] sm:$0xff] }
 0x2e8   :  { %v436_v56 = vsel %vm8168_vm12, %v5183_v55, %v8166_v31  ;;  %v477_v55 = vsel %vm8175_vm6, %v5383_v60, %v5429_v19  ;;  %vm8176_vm12 = vmmov %vm8175_vm6  ;;  %v1223_v38 = vadd.f32 %v5386_v16, %v1191_v52  ;;  %v448_v1 = vsel %vm4900_vm5, %v433_v18, 0.0  ;;  %v8182_v52 = vld [vmem:[#allocation115_spill] sm:$0xff]  ;;  %2315 = vrot.lane.b32.xlu1 %v7791_v59, %s7885_s7 }
 0x2e9   :  { %vm5656_vm4 = vcmp.eq.s32.totalorder %v8171_v28, 1  ;;  %v479_v31 = vsel %vm8176_vm12, %v5429_v19, %v5383_v60  ;;  %v416_v28 = vmul.f32 %v8177_v7, %v404_v41  ;;  %v449_v47 = vsel %vm4907_vm2, %v435_v12, 0.0  ;;  %v5686_v41 = vpop.permute.xlu0 %2121  ;;  %2437 = vrot.lane.b32.xlu0 %v3715_v33, %s8240_s21  ;;  %v8292_v63 = vld [vmem:[#allocation104_spill] sm:$0xff] }
 0x2ea   :  { %v8173_v35 = vsel %vm5656_vm4, 4294967295, %v8172_v35  ;;  %v417_v10 = vmul.f32 %v8177_v7, %v405_v36  ;;  %vm8180_vm6 = vcmp.lt.s32.totalorder %v3830_v3, 111  ;;  %v450_v16 = vsel %vm4900_vm5, %v434_v57, 0.0  ;;  %8181 = vst [vmem:[#allocation90_spill] sm:$0xff] %v5686_v41  ;;  %v5694_v7 = vpop.permute.xlu1 %1541 }
 0x2eb   :  { %8174 = vst [vmem:[#allocation59_spill] sm:$0xff] %v8173_v35  ;;  %v521_v60 = vsel %vm8180_vm6, %v8179_v30, %v8178_v48  ;;  %v451_v19 = vsel %vm4907_vm2, %v436_v56, 0.0  ;;  %v418_v18 = vmul.f32 %v8182_v52, %v406_v62  ;;  %v419_v46 = vmul.f32 %v8182_v52, %v407_v13  ;;  %8183 = vst [vmem:[#allocation119_spill] sm:$0xff] %v5694_v7  ;;  %v8185_v62 = vld [vmem:[#allocation96_spill] sm:$0xff] }
 0x2ec   :  { %v492_v12 = vsel %vm4974_vm14, %v477_v55, 0.0  ;;  %v493_v36 = vsel %vm8110_vm15, %v479_v31, 0.0  ;;  %v1254_v57 = vadd.f32 %v5496_v50, %v1222_v24  ;;  %vm8184_vm12 = vmmov %vm8180_vm6  ;;  %v460_v13 = vmul.f32 %v8185_v62, %v448_v1  ;;  %v8195_v1 = vld [vmem:[#allocation108_spill] sm:$0xff] }
 0x2ed   :  { %v523_v56 = vsel %vm8184_vm12, %v8178_v48, %v8179_v30  ;;  %v461_v52 = vmul.f32 %v8185_v62, %v449_v47  ;;  %v1255_v55 = vadd.f32 %v5506_v51, %v1223_v38  ;;  %v420_v31 = vadd.f32 %v416_v28, %v5546_v21 }
 0x2ee   :  { %v462_v49 = vmul.f32 %v8186_v29, %v450_v16  ;;  %v463_v50 = vmul.f32 %v8186_v29, %v451_v19  ;;  %v421_v24 = vadd.f32 %v417_v10, %v5560_v27  ;;  %v536_v48 = vsel %vm5108_vm0, %v521_v60, 0.0  ;;  %v5730_v10 = vpop.permute.xlu0 %2125  ;;  %v8197_v19 = vld [vmem:[#allocation56_spill] sm:$0xff] }
 0x2ef   :  { %v8187_v30 = vrot.slane %v5136_v37, %v3810_v61  ;;  %v8188_v47 = vmov 0  ;;  %v8191_v51 = vrot.slane %v5136_v37, %v3812_v17  ;;  %v8192_v21 = vmov 0  ;;  %8196 = vst [vmem:[#allocation113_spill] sm:$0xff] %v5730_v10 }
 0x2f0   :  { %v504_v38 = vmul.f32 %v8195_v1, %v492_v12  ;;  %v505_v27 = vmul.f32 %v8195_v1, %v493_v36  ;;  %v537_v28 = vsel %vm8142_vm7, %v523_v56, 0.0  ;;  %v422_v60 = vadd.f32 %v418_v18, %v5562_v11  ;;  %v8200_v12 = vld [vmem:[#allocation70_spill] sm:$0xff]  ;;  %v8201_v36 = vld [vmem:[#allocation71_spill] sm:$0xff] }
 0x2f1   :  { %vm5717_vm6 = vcmp.eq.s32.totalorder %v8187_v30, 1  ;;  %vm5724_vm12 = vcmp.eq.s32.totalorder %v8191_v51, 1  ;;  %v423_v16 = vadd.f32 %v419_v46, %v5569_v2  ;;  %v8198_v30 = vld [vmem:[#allocation62_spill] sm:$0xff]  ;;  %vm8199_vm3 = vcmp.lt.s32.totalorder %v3830_v3, 96  ;;  %v515_v51 = vpop.permute.xlu1 %514 }
 0x2f2   :  { %v8189_v47 = vsel %vm5717_vm6, 4294967295, %v8188_v47  ;;  %v8193_v21 = vsel %vm5724_vm12, 4294967295, %v8192_v21  ;;  %v5740_v37 = vsel %vm8199_vm3, %v8198_v30, %v8197_v19  ;;  %vm8202_vm15 = vcmp.lt.s32.totalorder %v3830_v3, 110  ;;  %v5762_v41 = vpop.permute.xlu0 %2145 }
 0x2f3   :  { %8190 = vst [vmem:[#allocation109_spill] sm:$0xff] %v8189_v47  ;;  %8194 = vst [vmem:[#allocation107_spill] sm:$0xff] %v8193_v21  ;;  %v1298_v1 = vsel %vm8202_vm15, %v8201_v36, %v8200_v12  ;;  %v464_v11 = vadd.f32 %v460_v13, %v420_v31  ;;  %v465_v46 = vadd.f32 %v461_v52, %v421_v24  ;;  %v8207_v31 = vld [vmem:[#allocation72_spill] sm:$0xff]  ;;  %vm8273_vm2 = vcmp.lt.s32.totalorder %v3830_v3, 96  ;;  %v8298_v21 = vld [vmem:[#allocation90_spill] sm:$0xff] }
 0x2f4   :  { %vm8203_vm14 = vmmov %vm8202_vm15  ;;  %v5755_v18 = vadd.f32 %v5581_v14, %v1254_v57  ;;  %v5758_v56 = vadd.f32 %v5592_v54, %v1255_v55  ;;  %v466_v29 = vadd.f32 %v462_v49, %v422_v60  ;;  %v467_v62 = vadd.f32 %v463_v50, %v423_v16  ;;  %v8206_v55 = vld [vmem:[#allocation78_spill] sm:$0xff]  ;;  %v8246_v14 = vld [vmem:[#allocation128_spill] sm:$0xff] }
 0x2f5   :  { %v1300_v2 = vsel %vm8203_vm14, %v8200_v12, %v8201_v36  ;;  %v548_v0 = vmul.f32 %v8204_v8, %v536_v48  ;;  %v549_v7 = vmul.f32 %v8204_v8, %v537_v28  ;;  %v508_v10 = vadd.f32 %v504_v38, %v464_v11  ;;  %vm8205_vm14 = vmmov %vm8199_vm3  ;;  %v519_v57 = vpop.permute.xlu1 %518  ;;  %v8217_v11 = vld [vmem:[#allocation178_spill] sm:$0xff] }
 0x2f6   :  { %v509_v13 = vadd.f32 %v505_v27, %v465_v46  ;;  %v5768_v52 = vsel %vm8205_vm14, %v8197_v19, %v8198_v30  ;;  %v1314_v49 = vsel %vm5209_vm1, %v1298_v1, 0.0  ;;  %v1315_v54 = vsel %vm5226_vm10, %v1300_v2, 0.0  ;;  %v8216_v30 = vld [vmem:[#allocation61_spill] sm:$0xff]  ;;  %v5811_v12 = vpop.permute.xlu0 %2149  ;;  %v8218_v46 = vld [vmem:[#allocation51_spill] sm:$0xff]  ;;  %vm8274_vm5 = vmmov %vm8273_vm2 }
 0x2f7   :  { %vm8208_vm15 = vcmp.lt.s32.totalorder %v3830_v3, 95  ;;  %vm8210_vm14 = vcmp.lt.s32.totalorder %v3830_v3, 111  ;;  %v8212_v38 = vrot.slane %v8170_v32, %v3812_v17  ;;  %v8213_v27 = vmov 0  ;;  %v8299_v47 = vld [vmem:[#allocation113_spill] sm:$0xff] }
 0x2f8   :  { %v1473_v50 = vsel %vm8208_vm15, %v8207_v31, %v8206_v55  ;;  %vm8209_vm3 = vmmov %vm8208_vm15  ;;  %v522_v48 = vsel %vm8210_vm14, %v515_v51, %v519_v57  ;;  %v511_v16 = vadd.f32 %v5605_v39, %v467_v62  ;;  %v510_v19 = vadd.f32 %v5595_v4, %v466_v29 }
 0x2f9   :  { %v5787_v24 = vsel %vm8209_vm3, %v8206_v55, %v8207_v31  ;;  %vm8211_vm10 = vmmov %vm8210_vm14  ;;  %vm5798_vm1 = vcmp.eq.s32.totalorder %v8212_v38, 1  ;;  %v538_v28 = vsel %vm5108_vm0, %v522_v48, 0.0  ;;  %v553_v36 = vadd.f32 %v549_v7, %v509_v13  ;;  %v5829_v4 = vpop.permute.xlu1 %1422  ;;  %v8223_v7 = vld [vmem:[#allocation91_spill] sm:$0xff] }
 0x2fa   :  { %v524_v1 = vsel %vm8211_vm10, %v519_v57, %v515_v51  ;;  %v8214_v27 = vsel %vm5798_vm1, 4294967295, %v8213_v27  ;;  %v550_v51 = vmul.f32 %v8216_v30, %v538_v28  ;;  %v552_v2 = vadd.f32 %v548_v0, %v508_v10 }
 0x2fb   :  { %8215 = vst [vmem:[#allocation111_spill] sm:$0xff] %v8214_v27  ;;  %v539_v60 = vsel %vm8142_vm7, %v524_v1, 0.0  ;;  %vm8219_vm10 = vcmp.lt.s32.totalorder %v3830_v3, 98  ;;  %vm8221_vm14 = vcmp.lt.s32.totalorder %v3830_v3, 97  ;;  %v8224_v62 = vrot.slane %v8223_v7, %v3810_v61 }
 0x2fc   :  { %v551_v32 = vmul.f32 %v8216_v30, %v539_v60  ;;  %v1342_v57 = vsel %vm8219_vm10, %v8218_v46, %v8217_v11  ;;  %vm8220_vm3 = vmmov %vm8219_vm10  ;;  %v1385_v29 = vsel %vm8221_vm14, %v5487_v58, %v5519_v43  ;;  %v8225_v10 = vmov 0 }
 0x2fd   :  { %v1344_v39 = vsel %vm8220_vm3, %v8217_v11, %v8218_v46  ;;  %vm8222_vm15 = vmmov %vm8221_vm14  ;;  %vm5836_vm10 = vcmp.eq.s32.totalorder %v8224_v62, 1  ;;  %v567_v55 = vadd.f32 %v5567_v53, %v553_v36  ;;  %v554_v31 = vadd.f32 %v550_v51, %v510_v19  ;;  %v8234_v19 = vld [vmem:[#allocation49_spill] sm:$0xff] }
 0x2fe   :  { %v1387_v0 = vsel %vm8222_vm15, %v5519_v43, %v5487_v58  ;;  %v8226_v10 = vsel %vm5836_vm10, 4294967295, %v8225_v10  ;;  %v555_v13 = vadd.f32 %v551_v32, %v511_v16  ;;  %v566_v43 = vadd.f32 %v5567_v53, %v552_v2  ;;  %v8228_v58 = vld [vmem:[#allocation86_spill] sm:$0xff]  ;;  %v8233_v16 = vld [vmem:[#allocation177_spill] sm:$0xff] }
 0x2ff   :  { %8227 = vst [vmem:[#allocation118_spill] sm:$0xff] %v8226_v10  ;;  %v1326_v48 = vmul.f32 %v8228_v58, %v1314_v49  ;;  %v1327_v1 = vmul.f32 %v8228_v58, %v1315_v54  ;;  %v1488_v61 = vsel %vm5717_vm6, %v1473_v50, 0.0  ;;  %v1489_v38 = vsel %vm5724_vm12, %v5787_v24, 0.0  ;;  %v5866_v50 = vpop.permute.xlu0 %2169  ;;  %v8237_v24 = vld [vmem:[#allocation37_spill] sm:$0xff] }
 0x300   :  { %v8229_v28 = vrot.slane %v8223_v7, %v3812_v17  ;;  %v8230_v60 = vmov 0  ;;  %vm8235_vm3 = vcmp.lt.s32.totalorder %v3830_v3, 34  ;;  %v569_v51 = vadd.f32 %v8237_v24, %v555_v13  ;;  %v1427_v7 = vpop.permute.xlu1 %1426 }
 0x301   :  { %v2008_v49 = vsel %vm8235_vm3, %v8234_v19, %v8233_v16  ;;  %vm8236_vm14 = vmmov %vm8235_vm3  ;;  %v568_v17 = vadd.f32 %v8237_v24, %v554_v31  ;;  %v1358_v36 = vsel %vm5336_vm9, %v1342_v57, 0.0  ;;  %v1359_v2 = vsel %vm5364_vm11, %v1344_v39, 0.0  ;;  %v8241_v39 = vld [vmem:[#allocation150_spill] sm:$0xff] }
 0x302   :  { %vm5854_vm15 = vcmp.eq.s32.totalorder %v8229_v28, 1  ;;  %v2010_v54 = vsel %vm8236_vm14, %v8233_v16, %v8234_v19  ;;  %v1400_v11 = vsel %vm5455_vm13, %v1385_v29, 0.0  ;;  %vm8239_vm3 = vnez %v8114_v20  ;;  %v8243_v29 = vld [vmem:[#allocation153_spill] sm:$0xff]  ;;  %v8248_v24 = vld [vmem:[#allocation54_spill] sm:$0xff] }
 0x303   :  { %v8231_v60 = vsel %vm5854_vm15, 4294967295, %v8230_v60  ;;  %v1401_v46 = vsel %vm8239_vm3, %v1387_v0, 0.0  ;;  %v571_v62 = vmax.f32 %v567_v55, 0.0  ;;  %v573_v13 = vmax.f32 %v569_v51, 0.0  ;;  %v8245_v0 = vld [vmem:[#allocation127_spill] sm:$0xff]  ;;  %v5893_v51 = vpop.permute.xlu0 %2173  ;;  %v8250_v20 = vld [vmem:[#allocation98_spill] sm:$0xff] }
 0x304   :  { %8232 = vst [vmem:[#allocation116_spill] sm:$0xff] %v8231_v60  ;;  %v570_v31 = vmax.f32 %v566_v43, 0.0  ;;  %v572_v57 = vmax.f32 %v568_v17, 0.0  ;;  %v1330_v28 = vadd.f32 %v1326_v48, %v5755_v18  ;;  %vm8242_vm14 = vnez %v8241_v39  ;;  %v8249_v48 = vld [vmem:[#allocation146_spill] sm:$0xff]  ;;  %v1467_v30 = vpop.permute.xlu1 %1466  ;;  %v8356_v60 = vld [vmem:[#allocation17_spill] sm:$0xff] }
 0x305   :  { %v2013_v16 = vsel %vm8242_vm14, %v2010_v54, 0.0  ;;  %vm8244_vm13 = vnez %v8243_v29  ;;  %vm8247_vm3 = vcmp.lt.s32.totalorder %v3830_v3, 33  ;;  %v1412_v8 = vmul.f32 %v8248_v24, %v1400_v11 }
 0x306   :  { %v2014_v19 = vsel %vm8244_vm13, %v2008_v49, 0.0  ;;  %v2034_v53 = vsel %vm8247_vm3, %v8246_v14, %v8245_v0  ;;  %v1413_v55 = vmul.f32 %v8248_v24, %v1401_v46  ;;  %v575_v43 = vpack.c.bf16 %v573_v13, %v571_v62  ;;  %v8251_v62 = vld [vmem:[#allocation82_spill] sm:$0xff]  ;;  %v8252_v13 = vld [vmem:[#allocation65_spill] sm:$0xff]  ;;  %v8262_v24 = vld [vmem:[#allocation99_spill] sm:$0xff] }
 0x307   :  { %v574_v17 = vpack.c.bf16 %v572_v57, %v570_v31  ;;  %v1331_v18 = vadd.f32 %v1327_v1, %v5758_v56  ;;  %v1500_v54 = vmul.f32 %v8249_v48, %v1488_v61  ;;  %v1370_v5 = vmul.f32 %v8250_v20, %v1358_v36  ;;  %v8254_v1 = vld [vmem:[#allocation159_spill] sm:$0xff] }
 0x308   :  { %v1371_v49 = vmul.f32 %v8250_v20, %v1359_v2  ;;  %v1445_v11 = vsel %vm5798_vm1, %v5768_v52, 0.0  ;;  %v1501_v46 = vmul.f32 %v8249_v48, %v1489_v38  ;;  %vm8253_vm3 = vcmp.lt.s32.totalorder %v3830_v3, 94  ;;  %1587 = vmatprep.subr.bf16.mxu1 %v575_v43  ;;  %v8257_v2 = vld [vmem:[#allocation141_spill] sm:$0xff]  ;;  %v8261_v48 = vld [vmem:[#allocation95_spill] sm:$0xff] }
 0x309   :  { %v1517_v56 = vsel %vm8253_vm3, %v8252_v13, %v8251_v62  ;;  %v2017_v61 = vmul.f32 %v2013_v16, %v8254_v1  ;;  %vm8255_vm11 = vmmov %vm8253_vm3  ;;  %v2018_v52 = vmul.f32 %v2014_v19, %v8254_v1  ;;  %vm8256_vm9 = vcmp.lt.s32.totalorder %v3830_v3, 33  ;;  %1588 = vmatpush1.bf16.msra.mxu1 %v574_v17  ;;  %v8260_v16 = vld [vmem:[#allocation134_spill] sm:$0xff]  ;;  %v1471_v1 = vpop.permute.xlu1 %1470 }
 0x30a   :  { %v1519_v36 = vsel %vm8255_vm11, %v8251_v62, %v8252_v13  ;;  %v2032_v38 = vsel %vm8256_vm9, %v8245_v0, %v8246_v14  ;;  %vm8258_vm3 = vnez %v8257_v2  ;;  %v8259_v57 = vsel %vm5656_vm4, %v5740_v37, 0.0  ;;  %v5934_v14 = vpop.permute.xlu0 %2193 }
 0x30b   :  { %v2037_v31 = vsel %vm8258_vm3, %v2034_v53, 0.0  ;;  %v1456_v43 = vmul.f32 %v8260_v16, %v8259_v57  ;;  %vm8263_vm11 = vcmp.lt.s32.totalorder %v3830_v3, 32  ;;  %v1416_v62 = vadd.f32 %v1412_v8, %v5526_v26  ;;  %v8264_v57 = vld [vmem:[#allocation135_spill] sm:$0xff]  ;;  %v8266_v26 = vld [vmem:[#allocation142_spill] sm:$0xff] }
 0x30c   :  { %v2058_v19 = vsel %vm8263_vm11, %v8262_v24, %v8261_v48  ;;  %v1417_v13 = vadd.f32 %v1413_v55, %v5555_v23  ;;  %v1457_v53 = vmul.f32 %v8260_v16, %v1445_v11  ;;  %v1532_v0 = vsel %vm5836_vm10, %v1517_v56, 0.0  ;;  %1911 = vrot.lane.b32.xlu0 %v8264_v57, %s2924_s13  ;;  %v8268_v55 = vld [vmem:[#allocation5_spill] sm:$0xff]  ;;  %1791 = vrot.lane.b32.xlu1 %v8264_v57, %s2918_s27  ;;  %v8269_v11 = vld [vmem:[#allocation147_spill] sm:$0xff]  ;;  %v8290_v16 = vld [vmem:[#allocation106_spill] sm:$0xff] }
 0x30d   :  { %v1374_v17 = vadd.f32 %v1370_v5, %v1330_v28  ;;  %v1375_v37 = vadd.f32 %v1371_v49, %v1331_v18  ;;  %v1533_v20 = vsel %vm5854_vm15, %v1519_v36, 0.0  ;;  %v2021_v8 = vadd.f32 %v2017_v61, %v8265_v15  ;;  %v8270_v18 = vld [vmem:[#allocation155_spill] sm:$0xff] }
 0x30e   :  { %vm8267_vm9 = vnez %v8266_v26  ;;  %v2041_v32 = vmul.f32 %v2037_v31, %v8268_v55  ;;  %v2022_v5 = vadd.f32 %v2018_v52, %v8269_v11  ;;  %v2056_v28 = vsel %vm8263_vm11, %v8261_v48, %v8262_v24  ;;  %v8276_v31 = vld [vmem:[#allocation182_spill] sm:$0xff] }
 0x30f   :  { %v2038_v23 = vsel %vm8267_vm9, %v2032_v38, 0.0  ;;  %vm8271_vm7 = vnez %v8270_v18  ;;  %vm8272_vm0 = vcmp.lt.s32.totalorder %v3830_v3, 31  ;;  %v1460_v56 = vadd.f32 %v1456_v43, %v1416_v62  ;;  %v5966_v38 = vpop.permute.xlu0 %2197 }
 0x310   :  { %v2061_v49 = vsel %vm8271_vm7, %v2058_v19, 0.0  ;;  %v2082_v15 = vsel %vm8272_vm0, %v5528_v40, %v5493_v6  ;;  %v1461_v61 = vadd.f32 %v1457_v53, %v1417_v13  ;;  %v1430_v36 = vsel %vm8273_vm2, %v5829_v4, %v1427_v7  ;;  %vm8275_vm11 = vmmov %vm8272_vm0  ;;  %v8277_v19 = vld [vmem:[#allocation42_spill] sm:$0xff]  ;;  %v5975_v13 = vpop.permute.xlu1 %1559  ;;  %1913 = vrot.lane.b32.xlu0 %v7938_v45, %s2924_s13 }
 0x311   :  { %v1432_v52 = vsel %vm8274_vm5, %v1427_v7, %v5829_v4  ;;  %v2042_v24 = vmul.f32 %v2038_v23, %v8268_v55  ;;  %v2080_v48 = vsel %vm8275_vm11, %v5493_v6, %v5528_v40  ;;  %v1418_v43 = vadd.f32 %v8276_v31, %v1374_v17  ;;  %8278 = vst [vmem:[#allocation122_spill] sm:$0xff] %v5975_v13  ;;  %v8279_v4 = vld [vmem:[#allocation158_spill] sm:$0xff]  ;;  %v8283_v6 = vld [vmem:[#allocation136_spill] sm:$0xff] }
 0x312   :  { %v1419_v62 = vadd.f32 %v8277_v19, %v1375_v37  ;;  %v2045_v53 = vadd.f32 %v2041_v32, %v2021_v8  ;;  %vm8280_vm5 = vnez %v8279_v4  ;;  %vm8281_vm2 = vcmp.lt.s32.totalorder %v3830_v3, 95  ;;  %1795 = vrot.lane.b32.xlu1 %v8283_v6, %s2918_s27  ;;  %v8284_v40 = vld [vmem:[#allocation6_spill] sm:$0xff]  ;;  %v8285_v37 = vld [vmem:[#allocation148_spill] sm:$0xff]  ;;  %v8289_v19 = vld [vmem:[#allocation143_spill] sm:$0xff] }
 0x313   :  { %v2062_v7 = vsel %vm8280_vm5, %v2056_v28, 0.0  ;;  %v1474_v23 = vsel %vm8281_vm2, %v1467_v30, %v1471_v1  ;;  %vm8282_vm0 = vmmov %vm8281_vm2  ;;  %v2065_v17 = vmul.f32 %v2061_v49, %v8284_v40  ;;  %vm8286_vm11 = vnez %v8285_v37  ;;  %v8287_v28 = vld [vmem:[#allocation149_spill] sm:$0xff] }
 0x314   :  { %v1476_v55 = vsel %vm8282_vm0, %v1471_v1, %v1467_v30  ;;  %v2085_v11 = vsel %vm8286_vm11, %v2082_v15, 0.0  ;;  %v1446_v32 = vsel %vm5656_vm4, %v1430_v36, 0.0  ;;  %v1447_v8 = vsel %vm5798_vm1, %v1432_v52, 0.0  ;;  %v6000_v1 = vpop.permute.xlu0 %2217  ;;  %1915 = vrot.lane.b32.xlu0 %v8283_v6, %s2924_s13 }
 0x315   :  { %vm8288_vm5 = vnez %v8287_v28  ;;  %vm8291_vm2 = vcmp.lt.s32.totalorder %v3830_v3, 30  ;;  %v1505_v49 = vadd.f32 %v1501_v46, %v1461_v61  ;;  %v1504_v58 = vadd.f32 %v1500_v54, %v1460_v56  ;;  %v8294_v46 = vld [vmem:[#allocation123_spill] sm:$0xff] }
 0x316   :  { %v2086_v31 = vsel %vm8288_vm5, %v2080_v48, 0.0  ;;  %v2106_v30 = vsel %vm8291_vm2, %v8290_v16, %v8289_v19  ;;  %v1544_v15 = vmul.f32 %v8292_v63, %v1532_v0  ;;  %v1545_v35 = vmul.f32 %v8292_v63, %v1533_v20  ;;  %v1511_v48 = vpop.permute.xlu1 %1510  ;;  %vm8293_vm0 = vmmov %vm8291_vm2  ;;  %2335 = vrot.lane.b32.xlu1 %v7772_v44, %s7982_s19 }
 0x317   :  { %v1490_v36 = vsel %vm5717_vm6, %v1474_v23, 0.0  ;;  %v1491_v52 = vsel %vm5724_vm12, %v1476_v55, 0.0  ;;  %v2046_v27 = vadd.f32 %v2042_v24, %v2022_v5  ;;  %v2104_v54 = vsel %vm8293_vm0, %v8289_v19, %v8290_v16  ;;  %v8295_v23 = vld [vmem:[#allocation66_spill] sm:$0xff] }
 0x318   :  { %v1458_v0 = vmul.f32 %v8294_v46, %v1446_v32  ;;  %v1459_v20 = vmul.f32 %v8294_v46, %v1447_v8  ;;  %v2066_v56 = vmul.f32 %v2062_v7, %v8284_v40  ;;  %v2069_v61 = vadd.f32 %v2065_v17, %v2045_v53  ;;  %v8296_v5 = vld [vmem:[#allocation166_spill] sm:$0xff]  ;;  %v8301_v32 = vld [vmem:[#allocation39_spill] sm:$0xff]  ;;  %v6029_v46 = vpop.permute.xlu0 %2221  ;;  %v8302_v7 = vld [vmem:[#allocation168_spill] sm:$0xff]  ;;  %1917 = vrot.lane.b32.xlu0 %v7961_v42, %s2924_s13 }
 0x319   :  { %v2089_v55 = vmul.f32 %v2085_v11, %v8295_v23  ;;  %v2090_v63 = vmul.f32 %v2086_v31, %v8295_v23  ;;  %vm8297_vm2 = vnez %v8296_v5  ;;  %vm8300_vm0 = vcmp.lt.s32.totalorder %v3830_v3, 18 }
 0x31a   :  { %v2109_v24 = vsel %vm8297_vm2, %v2106_v30, 0.0  ;;  %v2130_v16 = vsel %vm8300_vm0, %v8299_v47, %v8298_v21  ;;  %v1502_v8 = vmul.f32 %v8301_v32, %v1490_v36  ;;  %v1503_v19 = vmul.f32 %v8301_v32, %v1491_v52  ;;  %vm8304_vm6 = vmmov %vm8300_vm0  ;;  %v1515_v17 = vpop.permute.xlu1 %1514  ;;  %2339 = vrot.lane.b32.xlu1 %v7791_v59, %s7982_s19 }
 0x31b   :  { %vm8303_vm12 = vnez %v8302_v7  ;;  %v2128_v40 = vsel %vm8304_vm6, %v8298_v21, %v8299_v47  ;;  %v1549_v11 = vadd.f32 %v1545_v35, %v1505_v49  ;;  %v1548_v31 = vadd.f32 %v1544_v15, %v1504_v58  ;;  %v8310_v49 = vld [vmem:[#allocation119_spill] sm:$0xff] }
 0x31c   :  { %v2110_v53 = vsel %vm8303_vm12, %v2104_v54, 0.0  ;;  %v1462_v30 = vadd.f32 %v1458_v0, %v1418_v43  ;;  %v1463_v36 = vadd.f32 %v1459_v20, %v1419_v62  ;;  %vm8305_vm0 = vcmp.lt.s32.totalorder %v3830_v3, 94  ;;  %v8307_v54 = vld [vmem:[#allocation152_spill] sm:$0xff]  ;;  %v2242_v0 = vpop.permute.xlu0 %2241  ;;  %2455 = vrot.lane.b32.xlu0 %v7772_v44, %s8313_s22 }
 0x31d   :  { %v1518_v52 = vsel %vm8305_vm0, %v1511_v48, %v1515_v17  ;;  %vm8306_vm1 = vmmov %vm8305_vm0  ;;  %vm8308_vm4 = vnez %v8307_v54  ;;  %vm8309_vm6 = vcmp.lt.s32.totalorder %v3830_v3, 17  ;;  %v2070_v20 = vadd.f32 %v2066_v56, %v2046_v27  ;;  %v8316_v27 = vld [vmem:[#allocation133_spill] sm:$0xff] }
 0x31e   :  { %v1520_v23 = vsel %vm8306_vm1, %v1515_v17, %v1511_v48  ;;  %v2133_v47 = vsel %vm8308_vm4, %v2130_v16, 0.0  ;;  %v2154_v35 = vsel %vm8309_vm6, %v5811_v12, %v5762_v41  ;;  %v1534_v21 = vsel %vm5836_vm10, %v1518_v52, 0.0  ;;  %v8311_v16 = vld [vmem:[#allocation8_spill] sm:$0xff]  ;;  %vm8312_vm1 = vmmov %vm8309_vm6  ;;  %v6063_v10 = vpop.permute.xlu1 %1999  ;;  %1815 = vrot.lane.b32.xlu1 %v8264_v57, %s2914_s24 }
 0x31f   :  { %v1535_v58 = vsel %vm5854_vm15, %v1520_v23, 0.0  ;;  %v1506_v43 = vadd.f32 %v1502_v8, %v1462_v30  ;;  %v1507_v62 = vadd.f32 %v1503_v19, %v1463_v36  ;;  %v1546_v15 = vmul.f32 %v8310_v49, %v1534_v21  ;;  %v8314_v8 = vld [vmem:[#allocation154_spill] sm:$0xff]  ;;  %v8318_v21 = vld [vmem:[#allocation36_spill] sm:$0xff] }
 0x320   :  { %v1547_v48 = vmul.f32 %v8310_v49, %v1535_v58  ;;  %v2113_v17 = vmul.f32 %v2109_v24, %v8311_v16  ;;  %v2114_v32 = vmul.f32 %v2110_v53, %v8311_v16  ;;  %v2152_v52 = vsel %vm8312_vm1, %v5762_v41, %v5811_v12  ;;  %v8317_v53 = vld [vmem:[#allocation77_spill] sm:$0xff]  ;;  %v8320_v16 = vld [vmem:[#allocation38_spill] sm:$0xff]  ;;  %2457 = vrot.lane.b32.xlu0 %v3703_v9, %s8313_s22 }
 0x321   :  { %vm8315_vm0 = vnez %v8314_v8  ;;  %v1550_v30 = vadd.f32 %v1546_v15, %v1506_v43  ;;  %v1563_v56 = vadd.f32 %v8316_v27, %v1549_v11  ;;  %v2093_v24 = vadd.f32 %v2089_v55, %v2069_v61 }
 0x322   :  { %v2134_v19 = vsel %vm8315_vm0, %v2128_v40, 0.0  ;;  %v1551_v36 = vadd.f32 %v1547_v48, %v1507_v62  ;;  %v2137_v23 = vmul.f32 %v2133_v47, %v8317_v53  ;;  %vm8319_vm6 = vnez %v8318_v21  ;;  %v2246_v40 = vpop.permute.xlu0 %2245  ;;  %v6089_v55 = vpop.permute.xlu1 %2003  ;;  %v8324_v47 = vld [vmem:[#allocation10_spill] sm:$0xff]  ;;  %1819 = vrot.lane.b32.xlu1 %v8283_v6, %s2914_s24 }
 0x323   :  { %v2157_v41 = vsel %vm8319_vm6, %v2154_v35, 0.0  ;;  %v1562_v12 = vadd.f32 %v8316_v27, %v1548_v31  ;;  %v2094_v58 = vadd.f32 %v2090_v63, %v2070_v20  ;;  %vm8321_vm1 = vnez %v8320_v16  ;;  %v8343_v27 = vld [vmem:[#allocation167_spill] sm:$0xff] }
 0x324   :  { %v2158_v49 = vsel %vm8321_vm1, %v2152_v52, 0.0  ;;  %v1565_v43 = vadd.f32 %v5975_v13, %v1551_v36  ;;  %v1564_v62 = vadd.f32 %v5975_v13, %v1550_v30  ;;  %v2117_v15 = vadd.f32 %v2113_v17, %v2093_v24  ;;  %v8327_v52 = vld [vmem:[#allocation160_spill] sm:$0xff]  ;;  %v8329_v30 = vld [vmem:[#allocation162_spill] sm:$0xff]  ;;  %2459 = vrot.lane.b32.xlu0 %v7791_v59, %s8313_s22 }
 0x325   :  { %v2138_v11 = vmul.f32 %v2134_v19, %v8317_v53  ;;  %vm8322_vm15 = vcmp.lt.s32.totalorder %v3830_v3, 16  ;;  %v2118_v31 = vadd.f32 %v2114_v32, %v2094_v58  ;;  %v2161_v35 = vmul.f32 %v2157_v41, %v8324_v47 }
 0x326   :  { %v2176_v61 = vsel %vm8322_vm15, %v5866_v50, %v5893_v51  ;;  %vm8323_vm10 = vmmov %vm8322_vm15  ;;  %vm8325_vm0 = vcmp.lt.s32.totalorder %v3830_v3, 15  ;;  %v1567_v20 = vmax.f32 %v1563_v56, 0.0  ;;  %v2141_v17 = vadd.f32 %v2137_v23, %v2117_v15  ;;  %v2266_v24 = vpop.permute.xlu0 %2265  ;;  %v8331_v56 = vld [vmem:[#allocation179_spill] sm:$0xff]  ;;  %2359 = vrot.lane.b32.xlu1 %v7772_v44, %s2924_s13 }
 0x327   :  { %v2178_v63 = vsel %vm8323_vm10, %v5893_v51, %v5866_v50  ;;  %v2202_v48 = vsel %vm8325_vm0, %v5966_v38, %v5934_v14  ;;  %v2162_v50 = vmul.f32 %v2158_v49, %v8324_v47  ;;  %vm8326_vm10 = vmmov %vm8325_vm0  ;;  %v1566_v32 = vmax.f32 %v1562_v12, 0.0 }
 0x328   :  { %v2200_v51 = vsel %vm8326_vm10, %v5934_v14, %v5966_v38  ;;  %vm8328_vm15 = vnez %v8327_v52  ;;  %vm8330_vm4 = vnez %v8329_v30  ;;  %v1569_v53 = vmax.f32 %v1565_v43, 0.0  ;;  %v6119_v38 = vpop.permute.xlu1 %2023  ;;  %v8335_v43 = vld [vmem:[#allocation180_spill] sm:$0xff]  ;;  %2461 = vrot.lane.b32.xlu0 %v3715_v33, %s8313_s22 }
 0x329   :  { %v2181_v19 = vsel %vm8328_vm15, %v2178_v63, 0.0  ;;  %v2182_v36 = vsel %vm8330_vm4, %v2176_v61, 0.0  ;;  %v1568_v41 = vmax.f32 %v1564_v62, 0.0  ;;  %v2142_v58 = vadd.f32 %v2138_v11, %v2118_v31  ;;  %v8337_v61 = vld [vmem:[#allocation100_spill] sm:$0xff] }
 0x32a   :  { %vm8332_vm0 = vnez %v8331_v56  ;;  %vm8333_vm12 = vcmp.lt.s32.totalorder %v3830_v3, 14  ;;  %v2165_v12 = vadd.f32 %v2161_v35, %v2141_v17  ;;  %vm8336_vm4 = vnez %v8335_v43  ;;  %v8340_v35 = vld [vmem:[#allocation13_spill] sm:$0xff]  ;;  %2363 = vrot.lane.b32.xlu1 %v7791_v59, %s2924_s13 }
 0x32b   :  { %v2205_v23 = vsel %vm8332_vm0, %v2202_v48, 0.0  ;;  %v2224_v49 = vsel %vm8333_vm12, %v6000_v1, %v6029_v46  ;;  %vm8334_vm10 = vmmov %vm8333_vm12  ;;  %v2206_v62 = vsel %vm8336_vm4, %v2200_v51, 0.0  ;;  %v1571_v15 = vpack.c.bf16 %v1569_v53, %v1567_v20  ;;  %v8341_v17 = vld [vmem:[#allocation165_spill] sm:$0xff]  ;;  %v8347_v53 = vld [vmem:[#allocation52_spill] sm:$0xff] }
 0x32c   :  { %v2226_v14 = vsel %vm8334_vm10, %v6029_v46, %v6000_v1  ;;  %v1570_v11 = vpack.c.bf16 %v1568_v41, %v1566_v32  ;;  %v2185_v63 = vmul.f32 %v2181_v19, %v8337_v61  ;;  %v2186_v31 = vmul.f32 %v2182_v36, %v8337_v61  ;;  %v2270_v32 = vpop.permute.xlu0 %2269  ;;  %1935 = vrot.lane.b32.xlu0 %v8264_v57, %s8124_s20 }
 0x32d   :  { %vm8338_vm12 = vcmp.lt.s32.totalorder %v3830_v3, 2  ;;  %v2166_v47 = vadd.f32 %v2162_v50, %v2142_v58  ;;  %v2209_v48 = vmul.f32 %v2205_v23, %v8340_v35  ;;  %vm8342_vm4 = vnez %v8341_v17  ;;  %1589 = vmatprep.subr.bf16.mxu1 %v1571_v15  ;;  %v82_v50 = vld [vmem:[%s6934_s8] sm:$0xf]  ;;  %v8349_v58 = vld [vmem:[#allocation181_spill] sm:$0xff] }
 0x32e   :  { %v2248_v1 = vsel %vm8338_vm12, %v2242_v0, %v2246_v40  ;;  %vm8339_vm10 = vmmov %vm8338_vm12  ;;  %v2229_v51 = vsel %vm8342_vm4, %v2226_v14, 0.0  ;;  %vm8344_vm0 = vnez %v8343_v27  ;;  %v2210_v19 = vmul.f32 %v2206_v62, %v8340_v35  ;;  %1590 = vmatpush1.bf16.msra.mxu1 %v1570_v11  ;;  %v8351_v14 = vld [vmem:[#allocation14_spill] sm:$0xff]  ;;  %v8352_v11 = vld [vmem:[#allocation169_spill] sm:$0xff]  ;;  %1839 = vrot.lane.b32.xlu1 %v8264_v57, %s2920_s29 }
 0x32f   :  { %v2250_v46 = vsel %vm8339_vm10, %v2246_v40, %v2242_v0  ;;  %v2230_v20 = vsel %vm8344_vm0, %v2224_v49, 0.0  ;;  %vm8345_vm15 = vcmp.lt.s32.totalorder %v3830_v3, 1  ;;  %v2028_v40 = vpop.permute.xlu1 %2027  ;;  %vm7446_vm10 = vcmask 261120   ;;  %v8354_v35 = vld [vmem:[#allocation170_spill] sm:$0xff] }
 0x330   :  { %v2272_v36 = vsel %vm8345_vm15, %v2266_v24, %v2270_v32  ;;  %vm8346_vm12 = vmmov %vm8345_vm15  ;;  %vm8348_vm0 = vnez %v8347_v53  ;;  %vm8350_vm4 = vnez %v8349_v58  ;;  %v2189_v49 = vadd.f32 %v2185_v63, %v2165_v12  ;;  %1939 = vrot.lane.b32.xlu0 %v8283_v6, %s8124_s20 }
 0x331   :  { %v2274_v0 = vsel %vm8346_vm12, %v2270_v32, %v2266_v24  ;;  %v2253_v41 = vsel %vm8348_vm0, %v2250_v46, 0.0  ;;  %v2254_v23 = vsel %vm8350_vm4, %v2248_v1, 0.0  ;;  %v2190_v24 = vadd.f32 %v2186_v31, %v2166_v47  ;;  %2734 = vmatmul.mubr.msk.bf16.vlgmr.msra.gmra.mrb[0].mxu1 %vm7446_vm10, %v82_v50  ;;  %v2290_v46 = vpop.permute.xlu0 %2289 }
 0x332   :  { %v2233_v62 = vmul.f32 %v2229_v51, %v8351_v14  ;;  %v2234_v15 = vmul.f32 %v2230_v20, %v8351_v14  ;;  %vm8353_vm15 = vnez %v8352_v11  ;;  %vm8355_vm12 = vnez %v8354_v35  ;;  %v8357_v51 = vld [vmem:[#allocation18_spill] sm:$0xff]  ;;  %1843 = vrot.lane.b32.xlu1 %v8283_v6, %s2920_s29 }
 0x333   :  { %v2277_v61 = vsel %vm8353_vm15, %v2274_v0, 0.0  ;;  %v2278_v32 = vsel %vm8355_vm12, %v2272_v36, 0.0  ;;  %v2213_v13 = vadd.f32 %v2209_v48, %v2189_v49  ;;  %v2214_v1 = vadd.f32 %v2210_v19, %v2190_v24  ;;  %v2048_v63 = vpop.permute.xlu1 %2047  ;;  %v8361_v49 = vld [vmem:[#allocation157_spill] sm:$0xff] }
 0x334   :  { %v2257_v22 = vmul.f32 %v2253_v41, %v8356_v60  ;;  %v2258_v12 = vmul.f32 %v2254_v23, %v8356_v60  ;;  %v2281_v20 = vmul.f32 %v2277_v61, %v8357_v51  ;;  %v2282_v36 = vmul.f32 %v2278_v32, %v8357_v51  ;;  %v8360_v23 = vld [vmem:[#allocation156_spill] sm:$0xff]  ;;  %1941 = vrot.lane.b32.xlu0 %v7961_v42, %s8124_s20 }
 0x335   :  { %v2237_v31 = vadd.f32 %v2233_v62, %v2213_v13  ;;  %v2238_v47 = vadd.f32 %v2234_v15, %v2214_v1  ;;  %v2294_v0 = vpop.permute.xlu0 %2293  ;;  %vm8358_vm10 = vcmp.lt.s32.totalorder %v3830_v3, 127  ;;  %vm8362_vm0 = vnez %v8361_v49  ;;  %v8363_v62 = vld [vmem:[#allocation21_spill] sm:$0xff] }
 0x336   :  { %v2296_v50 = vsel %vm8358_vm10, %v2290_v46, %v2294_v0  ;;  %vm8359_vm4 = vmmov %vm8358_vm10  ;;  %2383 = vrot.lane.b32.xlu1 %v7772_v44, %s8124_s20 }
 0x337   :  { %v2261_v48 = vadd.f32 %v2257_v22, %v2237_v31  ;;  %v2262_v19 = vadd.f32 %v2258_v12, %v2238_v47  ;;  %v2298_v60 = vsel %vm8359_vm4, %v2294_v0, %v2290_v46  ;;  %v2052_v41 = vpop.permute.xlu1 %2051  ;;  %v2301_v13 = vsel %vm8158_vm8, %v2296_v50, 0.0  ;;  %v8371_v50 = vld [vmem:[#allocation174_spill] sm:$0xff] }
 0x338   :  { %v2302_v24 = vsel %vm8362_vm0, %v2298_v60, 0.0  ;;  %v2305_v15 = vmul.f32 %v2301_v13, %v8363_v62  ;;  %vm8364_vm4 = vcmp.lt.s32.totalorder %v3830_v3, 34  ;;  %vm8366_vm0 = vcmp.lt.s32.totalorder %v3830_v3, 126  ;;  %2479 = vrot.lane.b32.xlu0 %v7772_v44, %s8368_s0  ;;  %v8375_v13 = vld [vmem:[#allocation22_spill] sm:$0xff] }
 0x339   :  { %v2285_v22 = vadd.f32 %v2281_v20, %v2261_v48  ;;  %v2286_v14 = vadd.f32 %v2282_v36, %v2262_v19  ;;  %v2306_v61 = vmul.f32 %v2302_v24, %v8363_v62  ;;  %v2314_v32 = vpop.permute.xlu0 %2313  ;;  %v2007_v47 = vsel %vm8364_vm4, %v6063_v10, %v6089_v55  ;;  %vm8365_vm10 = vmmov %vm8364_vm4  ;;  %v8369_v48 = vld [vmem:[#allocation171_spill] sm:$0xff] }
 0x33a   :  { %v2009_v51 = vsel %vm8365_vm10, %v6089_v55, %v6063_v10  ;;  %vm8367_vm8 = vmmov %vm8366_vm0  ;;  %vm8370_vm12 = vnez %v8369_v48  ;;  %vm8372_vm4 = vnez %v8371_v50  ;;  %2387 = vrot.lane.b32.xlu1 %v7791_v59, %s8124_s20  ;;  %vm8373_vm10 = vcmp.lt.s32.totalorder %v3830_v3, 33 }
 0x33b   :  { %v2309_v46 = vadd.f32 %v2305_v15, %v2285_v22  ;;  %v2310_v1 = vadd.f32 %v2306_v61, %v2286_v14  ;;  %v2072_v12 = vpop.permute.xlu1 %2071  ;;  %v2031_v10 = vsel %vm8373_vm10, %v6119_v38, %v2028_v40  ;;  %v2011_v14 = vsel %vm8242_vm14, %v2009_v51, 0.0 }
 0x33c   :  { %v2012_v62 = vsel %vm8244_vm13, %v2007_v47, 0.0  ;;  %2481 = vrot.lane.b32.xlu0 %v3703_v9, %s8368_s0  ;;  %v2036_v29 = vsel %vm8267_vm9, %v2031_v10, 0.0  ;;  %vm8380_vm13 = vnez %v8279_v4  ;;  %vm8382_vm14 = vcmp.lt.s32.totalorder %v3830_v3, 17 }
 0x33d   :  { %v2318_v31 = vpop.permute.xlu0 %2317 }
 0x33e   :  { %v2320_v20 = vsel %vm8366_vm0, %v2314_v32, %v2318_v31  ;;  %v2322_v36 = vsel %vm8367_vm8, %v2318_v31, %v2314_v32  ;;  %vm8374_vm8 = vmmov %vm8373_vm10  ;;  %vm8376_vm0 = vcmp.lt.s32.totalorder %v3830_v3, 32  ;;  %1863 = vrot.lane.b32.xlu1 %v8264_v57, %s2917_s26 }
 0x33f   :  { %v2076_v0 = vpop.permute.xlu1 %2075  ;;  %v2325_v19 = vsel %vm8370_vm12, %v2320_v20, 0.0  ;;  %v2326_v60 = vsel %vm8372_vm4, %v2322_v36, 0.0  ;;  %v2033_v55 = vsel %vm8374_vm8, %v2028_v40, %v6119_v38  ;;  %v2055_v61 = vsel %vm8376_vm0, %v2048_v63, %v2052_v41  ;;  %vm8377_vm10 = vmmov %vm8376_vm0  ;;  %v8378_v40 = vld [vmem:[#allocation3_spill] sm:$0xff]  ;;  %v8381_v36 = vld [vmem:[#allocation4_spill] sm:$0xff] }
 0x340   :  { %v2329_v24 = vmul.f32 %v2325_v19, %v8375_v13  ;;  %v2330_v22 = vmul.f32 %v2326_v60, %v8375_v13  ;;  %v2057_v32 = vsel %vm8377_vm10, %v2052_v41, %v2048_v63  ;;  %v2035_v39 = vsel %vm8258_vm3, %v2033_v55, 0.0  ;;  %v8379_v63 = vld [vmem:[#allocation12_spill] sm:$0xff]  ;;  %vm8383_vm3 = vmmov %vm8382_vm14  ;;  %2485 = vrot.lane.b32.xlu0 %v3715_v33, %s8368_s0 }
 0x341   :  { %v1794_v15 = vpop.permute.xlu0 %1793  ;;  %v2015_v47 = vmul.f32 %v2011_v14, %v8378_v40  ;;  %v2016_v51 = vmul.f32 %v2012_v62, %v8378_v40  ;;  %v1995_v41 = vmul.f32 %v7772_v44, %v8379_v63  ;;  %v2059_v2 = vsel %vm8271_vm7, %v2057_v32, 0.0 }
 0x342   :  { %v2333_v31 = vadd.f32 %v2329_v24, %v2309_v46  ;;  %v2334_v20 = vadd.f32 %v2330_v22, %v2310_v1  ;;  %v1996_v46 = vmul.f32 %v7791_v59, %v8379_v63  ;;  %v2060_v26 = vsel %vm8380_vm13, %v2055_v61, 0.0  ;;  %1867 = vrot.lane.b32.xlu1 %v8283_v6, %s2917_s26  ;;  %v8384_v24 = vld [vmem:[#allocation32_spill] sm:$0xff] }
 0x343   :  { %v2096_v38 = vpop.permute.xlu1 %2095  ;;  %v2039_v19 = vmul.f32 %v2035_v39, %v8381_v36  ;;  %v2040_v60 = vmul.f32 %v2036_v29, %v8381_v36  ;;  %v2019_v18 = vadd.f32 %v2015_v47, %v1995_v41  ;;  %v2063_v22 = vmul.f32 %v2059_v2, %v8384_v24  ;;  %v8392_v36 = vld [vmem:[#allocation45_spill] sm:$0xff] }
 0x344   :  { %v2020_v4 = vadd.f32 %v2016_v51, %v1996_v46  ;;  %v2064_v14 = vmul.f32 %v2060_v26, %v8384_v24  ;;  %vm8385_vm7 = vcmp.lt.s32.totalorder %v3830_v3, 31  ;;  %1961 = vrot.lane.b32.xlu0 %v7938_v45, %s2928_s15  ;;  %vm8387_vm8 = vcmp.lt.s32.totalorder %v3830_v3, 30 }
 0x345   :  { %v1798_v1 = vpop.permute.xlu0 %1797  ;;  %v2043_v61 = vadd.f32 %v2039_v19, %v2019_v18  ;;  %v2079_v39 = vsel %vm8385_vm7, %v2072_v12, %v2076_v0  ;;  %vm8386_vm9 = vmmov %vm8385_vm7  ;;  %vm8389_vm10 = vnez %v8302_v7  ;;  %vm8390_vm13 = vcmp.lt.s32.totalorder %v3830_v3, 114 }
 0x346   :  { %v1800_v10 = vsel %vm8382_vm14, %v1794_v15, %v1798_v1  ;;  %v1802_v55 = vsel %vm8383_vm3, %v1798_v1, %v1794_v15  ;;  %v2044_v32 = vadd.f32 %v2040_v60, %v2020_v4  ;;  %v2081_v15 = vsel %vm8386_vm9, %v2076_v0, %v2072_v12  ;;  %vm8388_vm0 = vmmov %vm8387_vm8  ;;  %2407 = vrot.lane.b32.xlu1 %v7772_v44, %s2928_s15  ;;  %v8394_v60 = vld [vmem:[#allocation53_spill] sm:$0xff]  ;;  %v8399_v4 = vld [vmem:[#allocation31_spill] sm:$0xff] }
 0x347   :  { %v2100_v13 = vpop.permute.xlu1 %2099  ;;  %v2067_v51 = vadd.f32 %v2063_v22, %v2043_v61  ;;  %v2083_v41 = vsel %vm8286_vm11, %v2081_v15, 0.0  ;;  %v2084_v12 = vsel %vm8288_vm5, %v2079_v39, 0.0  ;;  %v1805_v0 = vsel %vm8319_vm6, %v1802_v55, 0.0  ;;  %vm8391_vm11 = vmmov %vm8390_vm13  ;;  %v8398_v55 = vld [vmem:[#allocation7_spill] sm:$0xff] }
 0x348   :  { %v2103_v40 = vsel %vm8387_vm8, %v2096_v38, %v2100_v13  ;;  %v2105_v47 = vsel %vm8388_vm0, %v2100_v13, %v2096_v38  ;;  %v2068_v63 = vadd.f32 %v2064_v14, %v2044_v32  ;;  %v1806_v46 = vsel %vm8321_vm1, %v1800_v10, 0.0  ;;  %1965 = vrot.lane.b32.xlu0 %v7961_v42, %s2928_s15  ;;  %v8400_v14 = vld [vmem:[#allocation163_spill] sm:$0xff]  ;;  %v8401_v32 = vld [vmem:[#allocation24_spill] sm:$0xff] }
 0x349   :  { %v2338_v62 = vpop.permute.xlu0 %2337  ;;  %v2107_v38 = vsel %vm8297_vm2, %v2105_v47, 0.0  ;;  %v2108_v26 = vsel %vm8389_vm10, %v2103_v40, 0.0  ;;  %vm8393_vm5 = vnez %v8392_v36  ;;  %vm8395_vm14 = vnez %v8394_v60  ;;  %v8484_v60 = vld [vmem:[#allocation27_spill] sm:$0xff] }
 0x34a   :  { %vm8396_vm2 = vcmp.lt.s32.totalorder %v3830_v3, 18  ;;  %2411 = vrot.lane.b32.xlu1 %v7791_v59, %s2928_s15  ;;  %v2087_v13 = vmul.f32 %v2083_v41, %v8398_v55  ;;  %v2088_v18 = vmul.f32 %v2084_v12, %v8398_v55  ;;  %v1810_v61 = vmul.f32 %v1806_v46, %v8400_v14 }
 0x34b   :  { %v2120_v29 = vpop.permute.xlu1 %2119  ;;  %vm8397_vm3 = vmmov %vm8396_vm2  ;;  %v2111_v39 = vmul.f32 %v2107_v38, %v8401_v32  ;;  %v2112_v15 = vmul.f32 %v2108_v26, %v8401_v32  ;;  %vm8402_vm7 = vnez %v8307_v54  ;;  %vm8403_vm9 = vnez %v8314_v8  ;;  %v8413_v32 = vld [vmem:[#allocation88_spill] sm:$0xff] }
 0x34c   :  { %2505 = vrot.lane.b32.xlu0 %v3703_v9, %s2935_s17  ;;  %vm8406_vm8 = vcmp.lt.s32.totalorder %v3830_v3, 16  ;;  %vm8408_vm10 = vnez %v8327_v52 }
 0x34d   :  { %v2342_v2 = vpop.permute.xlu0 %2341  ;;  %vm8407_vm0 = vmmov %vm8406_vm8 }
 0x34e   :  { %v2344_v37 = vsel %vm8390_vm13, %v2338_v62, %v2342_v2  ;;  %v2346_v28 = vsel %vm8391_vm11, %v2342_v2, %v2338_v62  ;;  %v1809_v62 = vmul.f32 %v1805_v0, %v8400_v14  ;;  %v8404_v0 = vld [vmem:[#allocation25_spill] sm:$0xff]  ;;  %1887 = vrot.lane.b32.xlu1 %v8264_v57, %s2908_s4  ;;  %vm8409_vm13 = vnez %v8329_v30 }
 0x34f   :  { %v2124_v1 = vpop.permute.xlu1 %2123  ;;  %v2349_v19 = vsel %vm8393_vm5, %v2344_v37, 0.0  ;;  %v2350_v5 = vsel %vm8395_vm14, %v2346_v28, 0.0  ;;  %v1789_v46 = vmul.f32 %v7938_v45, %v8404_v0  ;;  %v1790_v38 = vmul.f32 %v7961_v42, %v8404_v0  ;;  %v8405_v37 = vld [vmem:[#allocation9_spill] sm:$0xff] }
 0x350   :  { %v2127_v7 = vsel %vm8396_vm2, %v2120_v29, %v2124_v1  ;;  %v2129_v10 = vsel %vm8397_vm3, %v2124_v1, %v2120_v29  ;;  %v2353_v24 = vmul.f32 %v2349_v19, %v8399_v4  ;;  %v2354_v22 = vmul.f32 %v2350_v5, %v8399_v4  ;;  %2509 = vrot.lane.b32.xlu0 %v3715_v33, %s2935_s17 }
 0x351   :  { %v1818_v29 = vpop.permute.xlu0 %1817  ;;  %v2131_v41 = vsel %vm8402_vm7, %v2129_v10, 0.0  ;;  %v2132_v12 = vsel %vm8403_vm9, %v2127_v7, 0.0  ;;  %v1813_v54 = vadd.f32 %v1809_v62, %v1789_v46  ;;  %v1814_v26 = vadd.f32 %v1810_v61, %v1790_v38 }
 0x352   :  { %v2357_v40 = vadd.f32 %v2353_v24, %v2333_v31  ;;  %v2358_v47 = vadd.f32 %v2354_v22, %v2334_v20  ;;  %v2091_v31 = vadd.f32 %v2087_v13, %v2067_v51  ;;  %v2092_v20 = vadd.f32 %v2088_v18, %v2068_v63  ;;  %1891 = vrot.lane.b32.xlu1 %v8283_v6, %s2908_s4  ;;  %v8412_v18 = vld [vmem:[#allocation33_spill] sm:$0xff] }
 0x353   :  { %v2144_v2 = vpop.permute.xlu1 %2143  ;;  %v2135_v8 = vmul.f32 %v2131_v41, %v8405_v37  ;;  %v2136_v28 = vmul.f32 %v2132_v12, %v8405_v37  ;;  %vm8410_vm11 = vcmp.lt.s32.totalorder %v3830_v3, 17  ;;  %vm8414_vm3 = vcmp.lt.s32.totalorder %v3830_v3, 113 }
 0x354   :  { %v2115_v19 = vadd.f32 %v2111_v39, %v2091_v31  ;;  %v2116_v5 = vadd.f32 %v2112_v15, %v2092_v20  ;;  %vm8411_vm2 = vmmov %vm8410_vm11  ;;  %2529 = vrot.lane.b32.xlu0 %v3703_v9, %s2936_s18 }
 0x355   :  { %v1822_v1 = vpop.permute.xlu0 %1821  ;;  %vm8415_vm7 = vmmov %vm8414_vm3 }
 0x356   :  { %v1824_v7 = vsel %vm8406_vm8, %v1818_v29, %v1822_v1  ;;  %v1826_v42 = vsel %vm8407_vm0, %v1822_v1, %v1818_v29  ;;  %v2139_v62 = vadd.f32 %v2135_v8, %v2115_v19  ;;  %v2140_v61 = vadd.f32 %v2136_v28, %v2116_v5  ;;  %2431 = vrot.lane.b32.xlu1 %v7772_v44, %s8240_s21  ;;  %v8418_v8 = vld [vmem:[#allocation58_spill] sm:$0xff] }
 0x357   :  { %v2148_v10 = vpop.permute.xlu1 %2147  ;;  %v1829_v51 = vsel %vm8408_vm10, %v1826_v42, 0.0  ;;  %v1830_v63 = vsel %vm8409_vm13, %v1824_v7, 0.0  ;;  %vm8419_vm8 = vnez %v8418_v8  ;;  %v8421_v5 = vld [vmem:[#allocation30_spill] sm:$0xff] }
 0x358   :  { %v2151_v55 = vsel %vm8410_vm11, %v2144_v2, %v2148_v10  ;;  %v2153_v13 = vsel %vm8411_vm2, %v2148_v10, %v2144_v2  ;;  %v1833_v4 = vmul.f32 %v1829_v51, %v8412_v18  ;;  %v1834_v24 = vmul.f32 %v1830_v63, %v8412_v18  ;;  %2533 = vrot.lane.b32.xlu0 %v3715_v33, %s2936_s18  ;;  %vm8420_vm11 = vmmov %vm8407_vm0  ;;  %v8422_v63 = vld [vmem:[#allocation11_spill] sm:$0xff] }
 0x359   :  { %v2155_v22 = vsel %vm8319_vm6, %v2153_v13, 0.0  ;;  %v2156_v14 = vsel %vm8321_vm1, %v2151_v55, 0.0  ;;  %v2362_v29 = vpop.permute.xlu0 %2361  ;;  %vm8423_vm2 = vcmp.lt.s32.totalorder %v3830_v3, 15 }
 0x35a   :  { %v2159_v39 = vmul.f32 %v2155_v22, %v8413_v32  ;;  %v2160_v15 = vmul.f32 %v2156_v14, %v8413_v32  ;;  %v1837_v41 = vadd.f32 %v1833_v4, %v1813_v54  ;;  %v1838_v12 = vadd.f32 %v1834_v24, %v1814_v26  ;;  %v8416_v54 = vld [vmem:[#allocation74_spill] sm:$0xff]  ;;  %2435 = vrot.lane.b32.xlu1 %v7791_v59, %s8240_s21 }
 0x35b   :  { %v2168_v2 = vpop.permute.xlu1 %2167  ;;  %vm8417_vm9 = vnez %v8416_v54 }
 0x35c   :  { %v2163_v0 = vadd.f32 %v2159_v39, %v2139_v62  ;;  %v2164_v46 = vadd.f32 %v2160_v15, %v2140_v61  ;;  %2553 = vrot.lane.b32.xlu0 %v3703_v9, %s2937_s16 }
 0x35d   :  { %v2366_v38 = vpop.permute.xlu0 %2365 }
 0x35e   :  { %v2368_v31 = vsel %vm8414_vm3, %v2362_v29, %v2366_v38  ;;  %v2370_v20 = vsel %vm8415_vm7, %v2366_v38, %v2362_v29  ;;  %vm8424_vm3 = vmmov %vm8423_vm2  ;;  %vm8425_vm7 = vnez %v8331_v56 }
 0x35f   :  { %v2172_v37 = vpop.permute.xlu1 %2171  ;;  %v2373_v26 = vsel %vm8417_vm9, %v2368_v31, 0.0  ;;  %v2374_v28 = vsel %vm8419_vm8, %v2370_v20, 0.0  ;;  %vm8428_vm8 = vmmov %vm8423_vm2  ;;  %v8430_v31 = vld [vmem:[#allocation112_spill] sm:$0xff] }
 0x360   :  { %v2175_v1 = vsel %vm8407_vm0, %v2168_v2, %v2172_v37  ;;  %v2177_v19 = vsel %vm8420_vm11, %v2172_v37, %v2168_v2  ;;  %v2377_v7 = vmul.f32 %v2373_v26, %v8421_v5  ;;  %v2378_v42 = vmul.f32 %v2374_v28, %v8421_v5  ;;  %2557 = vrot.lane.b32.xlu0 %v3715_v33, %s2937_s16  ;;  %vm8427_vm11 = vmmov %vm8423_vm2  ;;  %v8429_v2 = vld [vmem:[#allocation87_spill] sm:$0xff] }
 0x361   :  { %v2179_v10 = vsel %vm8408_vm10, %v2177_v19, 0.0  ;;  %v2180_v51 = vsel %vm8409_vm13, %v2175_v1, 0.0  ;;  %v1842_v18 = vpop.permute.xlu0 %1841  ;;  %vm8426_vm0 = vnez %v8335_v43 }
 0x362   :  { %v2183_v55 = vmul.f32 %v2179_v10, %v8422_v63  ;;  %v2184_v13 = vmul.f32 %v2180_v51, %v8422_v63  ;;  %v2381_v4 = vadd.f32 %v2377_v7, %v2357_v40  ;;  %v2382_v24 = vadd.f32 %v2378_v42, %v2358_v47 }
 0x363   :  { %v2192_v22 = vpop.permute.xlu1 %2191 }
 0x364   :  { %v2187_v14 = vadd.f32 %v2183_v55, %v2163_v0  ;;  %v2188_v62 = vadd.f32 %v2184_v13, %v2164_v46  ;;  %v8433_v55 = vld [vmem:[#allocation60_spill] sm:$0xff] }
 0x365   :  { %v1846_v61 = vpop.permute.xlu0 %1845 }
 0x366   :  { %v1848_v32 = vsel %vm8423_vm2, %v1842_v18, %v1846_v61  ;;  %v1850_v39 = vsel %vm8424_vm3, %v1846_v61, %v1842_v18  ;;  %vm8434_vm3 = vnez %v8433_v55  ;;  %v8435_v18 = vld [vmem:[#allocation63_spill] sm:$0xff] }
 0x367   :  { %v2196_v15 = vpop.permute.xlu1 %2195  ;;  %v1853_v40 = vsel %vm8425_vm7, %v1850_v39, 0.0  ;;  %v1854_v47 = vsel %vm8426_vm0, %v1848_v32, 0.0 }
 0x368   :  { %v2199_v9 = vsel %vm8427_vm11, %v2192_v22, %v2196_v15  ;;  %v2201_v29 = vsel %vm8428_vm8, %v2196_v15, %v2192_v22  ;;  %v1857_v0 = vmul.f32 %v1853_v40, %v8429_v2  ;;  %v1858_v46 = vmul.f32 %v1854_v47, %v8429_v2  ;;  %v8442_v15 = vld [vmem:[#allocation15_spill] sm:$0xff] }
 0x369   :  { %v2203_v38 = vsel %vm8425_vm7, %v2201_v29, 0.0  ;;  %v2204_v33 = vsel %vm8426_vm0, %v2199_v9, 0.0  ;;  %v2386_v26 = vpop.permute.xlu0 %2385  ;;  %vm8431_vm8 = vcmp.lt.s32.totalorder %v3830_v3, 112  ;;  %vm8436_vm11 = vnez %v8435_v18 }
 0x36a   :  { %v2207_v20 = vmul.f32 %v2203_v38, %v8430_v31  ;;  %v2208_v37 = vmul.f32 %v2204_v33, %v8430_v31  ;;  %v1861_v28 = vadd.f32 %v1857_v0, %v1837_v41  ;;  %v1862_v1 = vadd.f32 %v1858_v46, %v1838_v12  ;;  %vm8432_vm2 = vmmov %vm8431_vm8 }
 0x36b   :  { %v2216_v19 = vpop.permute.xlu1 %2215  ;;  %vm8437_vm0 = vcmp.lt.s32.totalorder %v3830_v3, 14 }
 0x36c   :  { %v2211_v5 = vadd.f32 %v2207_v20, %v2187_v14  ;;  %v2212_v7 = vadd.f32 %v2208_v37, %v2188_v62  ;;  %vm8438_vm7 = vmmov %vm8437_vm0  ;;  %v8439_v14 = vld [vmem:[#allocation64_spill] sm:$0xff] }
 0x36d   :  { %v2390_v42 = vpop.permute.xlu0 %2389 }
 0x36e   :  { %v2392_v10 = vsel %vm8431_vm8, %v2386_v26, %v2390_v42  ;;  %v2394_v51 = vsel %vm8432_vm2, %v2390_v42, %v2386_v26  ;;  %vm8440_vm8 = vnez %v8341_v17  ;;  %vm8441_vm2 = vnez %v8343_v27  ;;  %v8448_v26 = vld [vmem:[#allocation101_spill] sm:$0xff] }
 0x36f   :  { %v2220_v63 = vpop.permute.xlu1 %2219  ;;  %v2397_v13 = vsel %vm8434_vm3, %v2392_v10, 0.0  ;;  %v2398_v22 = vsel %vm8436_vm11, %v2394_v51, 0.0  ;;  %v8451_v10 = vld [vmem:[#allocation16_spill] sm:$0xff]  ;;  %vm8456_vm3 = vcmp.lt.s32.totalorder %v3830_v3, 1 }
 0x370   :  { %v2223_v41 = vsel %vm8437_vm0, %v2216_v19, %v2220_v63  ;;  %v2225_v12 = vsel %vm8438_vm7, %v2220_v63, %v2216_v19  ;;  %v2401_v62 = vmul.f32 %v2397_v13, %v8439_v14  ;;  %v2402_v61 = vmul.f32 %v2398_v22, %v8439_v14  ;;  %vm8457_vm9 = vmmov %vm8456_vm3 }
 0x371   :  { %v2227_v32 = vsel %vm8440_vm8, %v2225_v12, 0.0  ;;  %v2228_v39 = vsel %vm8441_vm2, %v2223_v41, 0.0  ;;  %v1866_v9 = vpop.permute.xlu0 %1865  ;;  %vm8443_vm7 = vcmp.lt.s32.totalorder %v3830_v3, 1  ;;  %vm8445_vm8 = vnez %v8354_v35  ;;  %v8510_v35 = vld [vmem:[#allocation34_spill] sm:$0xff] }
 0x372   :  { %v2231_v40 = vmul.f32 %v2227_v32, %v8442_v15  ;;  %v2232_v47 = vmul.f32 %v2228_v39, %v8442_v15  ;;  %v2405_v29 = vadd.f32 %v2401_v62, %v2381_v4  ;;  %v2406_v2 = vadd.f32 %v2402_v61, %v2382_v24  ;;  %vm8444_vm0 = vmmov %vm8443_vm7 }
 0x373   :  { %v2240_v0 = vpop.permute.xlu1 %2239  ;;  %vm8446_vm2 = vcmp.lt.s32.totalorder %v3830_v3, 2 }
 0x374   :  { %v2235_v46 = vadd.f32 %v2231_v40, %v2211_v5  ;;  %v2236_v38 = vadd.f32 %v2232_v47, %v2212_v7  ;;  %vm8447_vm11 = vmmov %vm8446_vm2  ;;  %v8458_v40 = vld [vmem:[#allocation75_spill] sm:$0xff] }
 0x375   :  { %v1870_v33 = vpop.permute.xlu0 %1869 }
 0x376   :  { %v1872_v31 = vsel %vm8443_vm7, %v1866_v9, %v1870_v33  ;;  %v1874_v17 = vsel %vm8444_vm0, %v1870_v33, %v1866_v9  ;;  %vm8449_vm7 = vnez %v8347_v53  ;;  %vm8450_vm0 = vnez %v8349_v58 }
 0x377   :  { %v2244_v20 = vpop.permute.xlu1 %2243  ;;  %v1877_v27 = vsel %vm8353_vm15, %v1874_v17, 0.0  ;;  %v1878_v37 = vsel %vm8445_vm8, %v1872_v31, 0.0 }
 0x378   :  { %v2247_v4 = vsel %vm8446_vm2, %v2240_v0, %v2244_v20  ;;  %v2249_v24 = vsel %vm8447_vm11, %v2244_v20, %v2240_v0  ;;  %v1881_v19 = vmul.f32 %v1877_v27, %v8448_v26  ;;  %v1882_v5 = vmul.f32 %v1878_v37, %v8448_v26 }
 0x379   :  { %v2251_v7 = vsel %vm8449_vm7, %v2249_v24, 0.0  ;;  %v2252_v42 = vsel %vm8450_vm0, %v2247_v4, 0.0  ;;  %v2410_v13 = vpop.permute.xlu0 %2409  ;;  %vm8452_vm11 = vcmp.lt.s32.totalorder %v3830_v3, 111  ;;  %vm8454_vm7 = vnez %v7990_v25 }
 0x37a   :  { %v2255_v51 = vmul.f32 %v2251_v7, %v8451_v10  ;;  %v2256_v63 = vmul.f32 %v2252_v42, %v8451_v10  ;;  %v1885_v22 = vadd.f32 %v1881_v19, %v1861_v28  ;;  %v1886_v41 = vadd.f32 %v1882_v5, %v1862_v1  ;;  %vm8453_vm2 = vmmov %vm8452_vm11 }
 0x37b   :  { %v2264_v12 = vpop.permute.xlu1 %2263  ;;  %vm8455_vm0 = vnez %v7993_v34 }
 0x37c   :  { %v2259_v14 = vadd.f32 %v2255_v51, %v2235_v46  ;;  %v2260_v62 = vadd.f32 %v2256_v63, %v2236_v38  ;;  %v8459_v38 = vld [vmem:[#allocation19_spill] sm:$0xff] }
 0x37d   :  { %v2414_v61 = vpop.permute.xlu0 %2413  ;;  %v8466_v51 = vld [vmem:[#allocation115_spill] sm:$0xff] }
 0x37e   :  { %v2416_v32 = vsel %vm8452_vm11, %v2410_v13, %v2414_v61  ;;  %v2418_v53 = vsel %vm8453_vm2, %v2414_v61, %v2410_v13  ;;  %vm8462_vm11 = vnez %v8360_v23  ;;  %vm8463_vm2 = vnez %v8361_v49 }
 0x37f   :  { %v2268_v39 = vpop.permute.xlu1 %2267  ;;  %v2421_v58 = vsel %vm8454_vm7, %v2416_v32, 0.0  ;;  %v2422_v15 = vsel %vm8455_vm0, %v2418_v53, 0.0 }
 0x380   :  { %v2271_v28 = vsel %vm8456_vm3, %v2264_v12, %v2268_v39  ;;  %v2273_v1 = vsel %vm8457_vm9, %v2268_v39, %v2264_v12  ;;  %v2425_v47 = vmul.f32 %v2421_v58, %v8458_v40  ;;  %v2426_v9 = vmul.f32 %v2422_v15, %v8458_v40 }
 0x381   :  { %v2275_v0 = vsel %vm8353_vm15, %v2273_v1, 0.0  ;;  %v2276_v46 = vsel %vm8445_vm8, %v2271_v28, 0.0  ;;  %v1890_v17 = vpop.permute.xlu0 %1889  ;;  %vm8460_vm9 = vcmp.lt.s32.totalorder %v3830_v3, 127 }
 0x382   :  { %v2279_v33 = vmul.f32 %v2275_v0, %v8459_v38  ;;  %v2280_v31 = vmul.f32 %v2276_v46, %v8459_v38  ;;  %v2429_v20 = vadd.f32 %v2425_v47, %v2405_v29  ;;  %v2430_v27 = vadd.f32 %v2426_v9, %v2406_v2  ;;  %vm8461_vm3 = vmmov %vm8460_vm9  ;;  %v8470_v46 = vld [vmem:[#allocation120_spill] sm:$0xff] }
 0x383   :  { %v2288_v37 = vpop.permute.xlu1 %2287  ;;  %vm8464_vm0 = vmmov %vm8461_vm3 }
 0x384   :  { %v2283_v4 = vadd.f32 %v2279_v33, %v2259_v14  ;;  %v2284_v24 = vadd.f32 %v2280_v31, %v2260_v62  ;;  %vm8465_vm7 = vmmov %vm8464_vm0  ;;  %v8467_v62 = vld [vmem:[#allocation20_spill] sm:$0xff]  ;;  %v8472_v33 = vld [vmem:[#allocation94_spill] sm:$0xff] }
 0x385   :  { %v1894_v26 = vpop.permute.xlu0 %1893 }
 0x386   :  { %v1896_v19 = vsel %vm8460_vm9, %v1890_v17, %v1894_v26  ;;  %v1898_v5 = vsel %vm8461_vm3, %v1894_v26, %v1890_v17  ;;  %vm8471_vm9 = vnez %v8470_v46  ;;  %vm8473_vm3 = vnez %v8472_v33  ;;  %v8476_v17 = vld [vmem:[#allocation86_spill] sm:$0xff] }
 0x387   :  { %v2292_v7 = vpop.permute.xlu1 %2291  ;;  %v1901_v42 = vsel %vm8462_vm11, %v1896_v19, 0.0  ;;  %v1902_v10 = vsel %vm8463_vm2, %v1898_v5, 0.0  ;;  %v8477_v19 = vld [vmem:[#allocation23_spill] sm:$0xff] }
 0x388   :  { %v2295_v29 = vsel %vm8464_vm0, %v2288_v37, %v2292_v7  ;;  %v2297_v2 = vsel %vm8465_vm7, %v2292_v7, %v2288_v37  ;;  %v1905_v63 = vmul.f32 %v1901_v42, %v8466_v51  ;;  %v1906_v13 = vmul.f32 %v1902_v10, %v8466_v51 }
 0x389   :  { %v2299_v12 = vsel %vm8462_vm11, %v2295_v29, 0.0  ;;  %v2300_v14 = vsel %vm8463_vm2, %v2297_v2, 0.0  ;;  %v2434_v53 = vpop.permute.xlu0 %2433  ;;  %vm8468_vm7 = vcmp.lt.s32.totalorder %v3830_v3, 110  ;;  %vm8474_vm2 = vcmp.lt.s32.totalorder %v3830_v3, 126 }
 0x38a   :  { %v2303_v61 = vmul.f32 %v2299_v12, %v8467_v62  ;;  %v2304_v32 = vmul.f32 %v2300_v14, %v8467_v62  ;;  %v6471_v39 = vadd.f32 %v1905_v63, %v1885_v22  ;;  %v6473_v58 = vadd.f32 %v1906_v13, %v1886_v41  ;;  %vm8469_vm0 = vmmov %vm8468_vm7 }
 0x38b   :  { %v2312_v15 = vpop.permute.xlu1 %2311  ;;  %vm8475_vm11 = vmmov %vm8474_vm2 }
 0x38c   :  { %v2307_v28 = vadd.f32 %v2303_v61, %v2283_v4  ;;  %v2308_v1 = vadd.f32 %v2304_v32, %v2284_v24  ;;  %v8482_v61 = vld [vmem:[#allocation29_spill] sm:$0xff] }
 0x38d   :  { %v2438_v40 = vpop.permute.xlu0 %2437 }
 0x38e   :  { %v2440_v47 = vsel %vm8468_vm7, %v2434_v53, %v2438_v40  ;;  %v2442_v9 = vsel %vm8469_vm0, %v2438_v40, %v2434_v53  ;;  %vm8493_vm7 = vcmp.lt.s32.totalorder %v3830_v3, 112 }
 0x38f   :  { %v2316_v0 = vpop.permute.xlu1 %2315  ;;  %v2445_v38 = vsel %vm8471_vm9, %v2440_v47, 0.0  ;;  %v2446_v22 = vsel %vm8473_vm3, %v2442_v9, 0.0  ;;  %v8483_v9 = vld [vmem:[#allocation26_spill] sm:$0xff]  ;;  %vm8494_vm0 = vmmov %vm8493_vm7 }
 0x390   :  { %v2319_v41 = vsel %vm8474_vm2, %v2312_v15, %v2316_v0  ;;  %v2321_v31 = vsel %vm8475_vm11, %v2316_v0, %v2312_v15  ;;  %v2449_v37 = vmul.f32 %v2445_v38, %v8476_v17  ;;  %v2450_v4 = vmul.f32 %v2446_v22, %v8476_v17 }
 0x391   :  { %v2323_v24 = vsel %vm8370_vm12, %v2319_v41, 0.0  ;;  %v2324_v26 = vsel %vm8372_vm4, %v2321_v31, 0.0  ;;  %vm8478_vm11 = vcmp.lt.s32.totalorder %v3830_v3, 17  ;;  %vm8480_vm4 = vcmp.lt.s32.totalorder %v3830_v3, 114 }
 0x392   :  { %v2327_v5 = vmul.f32 %v2323_v24, %v8477_v19  ;;  %v2328_v7 = vmul.f32 %v2324_v26, %v8477_v19  ;;  %v6495_v42 = vadd.f32 %v2449_v37, %v2429_v20  ;;  %v6497_v10 = vadd.f32 %v2450_v4, %v2430_v27  ;;  %vm8479_vm12 = vmmov %vm8478_vm11  ;;  %v8487_v24 = vld [vmem:[#allocation28_spill] sm:$0xff] }
 0x393   :  { %v1792_v29 = vpop.permute.xlu1 %1791  ;;  %vm8481_vm2 = vmmov %vm8480_vm4  ;;  %v1787_v22 = vmul.f32 %v8264_v57, %v8484_v60  ;;  %v1788_v41 = vmul.f32 %v8283_v6, %v8484_v60 }
 0x394   :  { %v2331_v2 = vadd.f32 %v2327_v5, %v2307_v28  ;;  %v2332_v51 = vadd.f32 %v2328_v7, %v2308_v1 }
 0x397   :  { %v1796_v63 = vpop.permute.xlu1 %1795 }
 0x398   :  { %v1799_v13 = vsel %vm8478_vm11, %v1792_v29, %v1796_v63  ;;  %v1801_v48 = vsel %vm8479_vm12, %v1796_v63, %v1792_v29  ;;  %vm8495_vm11 = vnez %v8433_v55  ;;  %vm8496_vm12 = vnez %v8435_v18 }
 0x399   :  { %v1803_v15 = vsel %vm8319_vm6, %v1801_v48, 0.0  ;;  %v1804_v28 = vsel %vm8321_vm1, %v1799_v13, 0.0  ;;  %vm8488_vm1 = vcmp.lt.s32.totalorder %v3830_v3, 113  ;;  %v8492_v13 = vld [vmem:[#allocation35_spill] sm:$0xff] }
 0x39a   :  { %v1807_v0 = vmul.f32 %v1803_v15, %v8483_v9  ;;  %v1808_v36 = vmul.f32 %v1804_v28, %v8483_v9 }
 0x39b   :  { %v2336_v50 = vpop.permute.xlu1 %2335 }
 0x39c   :  { %v1811_v37 = vadd.f32 %v1807_v0, %v1787_v22  ;;  %v1812_v4 = vadd.f32 %v1808_v36, %v1788_v41 }
 0x39f   :  { %v2340_v12 = vpop.permute.xlu1 %2339 }
 0x3a0   :  { %v2343_v14 = vsel %vm8480_vm4, %v2336_v50, %v2340_v12  ;;  %v2345_v20 = vsel %vm8481_vm2, %v2340_v12, %v2336_v50  ;;  %vm2940_vm4 = vmmov 0   ;;  %vm8499_vm2 = vcmp.lt.s32.totalorder %v3830_v3, 15 }
 0x3a1   :  { %v2347_v27 = vsel %vm8393_vm5, %v2343_v14, 0.0  ;;  %v2348_v62 = vsel %vm8395_vm14, %v2345_v20, 0.0  ;;  %vm8485_vm5 = vcmp.lt.s32.totalorder %v3830_v3, 16  ;;  %vm8489_vm14 = vmmov %vm8488_vm1 }
 0x3a2   :  { %v2351_v32 = vmul.f32 %v2347_v27, %v8482_v61  ;;  %v2352_v53 = vmul.f32 %v2348_v62, %v8482_v61  ;;  %vm8486_vm6 = vmmov %vm8485_vm5 }
 0x3a3   :  { %v1816_v1 = vpop.permute.xlu1 %1815 }
 0x3a4   :  { %v2355_v40 = vadd.f32 %v2351_v32, %v2331_v2  ;;  %v2356_v47 = vadd.f32 %v2352_v53, %v2332_v51 }
 0x3a7   :  { %v1820_v38 = vpop.permute.xlu1 %1819 }
 0x3a8   :  { %v1823_v21 = vsel %vm8485_vm5, %v1816_v1, %v1820_v38  ;;  %v1825_v16 = vsel %vm8486_vm6, %v1820_v38, %v1816_v1  ;;  %v8497_v1 = vld [vmem:[#allocation89_spill] sm:$0xff]  ;;  %v8498_v38 = vld [vmem:[#allocation138_spill] sm:$0xff]  ;;  %vm8500_vm5 = vmmov %vm8499_vm2 }
 0x3a9   :  { %v1827_v31 = vsel %vm8408_vm10, %v1825_v16, 0.0  ;;  %v1828_v17 = vsel %vm8409_vm13, %v1823_v21, 0.0  ;;  %vm8490_vm10 = vnez %v8416_v54  ;;  %vm8491_vm13 = vnez %v8418_v8  ;;  %vm8501_vm6 = vmmov %vm8488_vm1 }
 0x3aa   :  { %v1831_v26 = vmul.f32 %v1827_v31, %v8487_v24  ;;  %v1832_v19 = vmul.f32 %v1828_v17, %v8487_v24  ;;  %v2939_v17 = vmov 0.0  }
 0x3ab   :  { %v2360_v5 = vpop.permute.xlu1 %2359  ;;  %2752 = vmatprep.subr.mxu1 %v2939_v17  ;;  %2754 = vmatprep.mubr.msk.f32.mxu1 %vm2940_vm4, %v2939_v17 }
 0x3ac   :  { %v6533_v7 = vadd.f32 %v1831_v26, %v1811_v37  ;;  %v6535_v29 = vadd.f32 %v1832_v19, %v1812_v4  ;;  %v1912_v37 = vpop.permute.xlu0 %1911 }
 0x3af   :  { %v2364_v2 = vpop.permute.xlu1 %2363 }
 0x3b0   :  { %v2367_v51 = vsel %vm8488_vm1, %v2360_v5, %v2364_v2  ;;  %v2369_v52 = vsel %vm8489_vm14, %v2364_v2, %v2360_v5  ;;  %vm8502_vm14 = vcmp.lt.s32.totalorder %v3830_v3, 1 }
 0x3b1   :  { %v2371_v30 = vsel %vm8490_vm10, %v2367_v51, 0.0  ;;  %v2372_v63 = vsel %vm8491_vm13, %v2369_v52, 0.0 }
 0x3b2   :  { %v2375_v48 = vmul.f32 %v2371_v30, %v8492_v13  ;;  %v2376_v50 = vmul.f32 %v2372_v63, %v8492_v13 }
 0x3b3   :  { %v1840_v12 = vpop.permute.xlu1 %1839 }
 0x3b4   :  { %v2379_v14 = vadd.f32 %v2375_v48, %v2355_v40  ;;  %v2380_v20 = vadd.f32 %v2376_v50, %v2356_v47 }
 0x3b7   :  { %v1844_v27 = vpop.permute.xlu1 %1843 }
 0x3bb   :  { %v2384_v62 = vpop.permute.xlu1 %2383 }
 0x3bf   :  { %v2388_v61 = vpop.permute.xlu1 %2387 }
 0x3c0   :  { %v2391_v32 = vsel %vm8493_vm7, %v2384_v62, %v2388_v61  ;;  %v2393_v53 = vsel %vm8494_vm0, %v2388_v61, %v2384_v62  ;;  %vm8503_vm7 = vmmov %vm8502_vm14 }
 0x3c1   :  { %v2395_v15 = vsel %vm8495_vm11, %v2391_v32, 0.0  ;;  %v2396_v28 = vsel %vm8496_vm12, %v2393_v53, 0.0  ;;  %v1847_v32 = vsel %vm8499_vm2, %v1840_v12, %v1844_v27  ;;  %v1849_v53 = vsel %vm8500_vm5, %v1844_v27, %v1840_v12  ;;  %vm8504_vm0 = vmmov %vm8488_vm1 }
 0x3c2   :  { %v2399_v9 = vmul.f32 %v2395_v15, %v8497_v1  ;;  %v2400_v40 = vmul.f32 %v2396_v28, %v8497_v1  ;;  %vm8505_vm2 = vmmov %vm8504_vm0  ;;  %vm8506_vm5 = vnez %v8331_v56 }
 0x3c3   :  { %v1864_v2 = vpop.permute.xlu1 %1863  ;;  %v1851_v27 = vsel %vm8506_vm5, %v1849_v53, 0.0 }
 0x3c4   :  { %v6557_v47 = vadd.f32 %v2399_v9, %v2379_v14  ;;  %v6559_v0 = vadd.f32 %v2400_v40, %v2380_v20 }
 0x3c7   :  { %v1868_v52 = vpop.permute.xlu1 %1867 }
 0x3c8   :  { %v1873_v9 = vsel %vm8502_vm14, %v1868_v52, %v1864_v2 }
 0x3cb   :  { %v6604_v30 = vpop.permute.xlu1 %2407 }
 0x3cf   :  { %v6608_v63 = vpop.permute.xlu1 %2411 }
 0x3d3   :  { %v1888_v48 = vpop.permute.xlu1 %1887 }
 0x3d7   :  { %v1892_v14 = vpop.permute.xlu1 %1891 }
 0x3db   :  { %v6614_v62 = vpop.permute.xlu1 %2431 }
 0x3df   :  { %v6620_v15 = vpop.permute.xlu1 %2435 }
 0x404   :  { %v1621_v36 = vpop.f32.mrb[0].mxu1 }
 0x405   :  { %v6562_v60 = vadd.f32 %v1621_v36, %v8498_v38  ;;  %v1623_v22 = vpop.f32.mrb[1].mxu1  ;;  %v1871_v36 = vsel %vm8503_vm7, %v1864_v2, %v1868_v52 }
 0x406   :  { %v6565_v41 = vadd.f32 %v1623_v22, %v8498_v38  ;;  %v1625_v21 = vpop.f32.mrb[2].mxu1  ;;  %v1876_v2 = vsel %vm8445_vm8, %v1871_v36, 0.0  ;;  %vm8514_vm8 = vnez %v8361_v49 }
 0x407   :  { %v1626_v16 = vpop.f32.mrb[3].mxu1 }
 0x408   :  { %v1628_v31 = vadd.f32 %v6565_v41, %v6562_v60 }
 0x40a   :  { %1629 = vadd.xlane.f32.xlu1 %v1628_v31 }
 0x41b   :  { %1937 = vrot.lane.b32.xlu1 %v7938_v45, %s8124_s20  ;;  %v1914_v45 = vpop.permute.xlu0 %1913 }
 0x41f   :  { %2483 = vrot.lane.b32.xlu1 %v7791_v59, %s8368_s0 }
 0x423   :  { %1959 = vrot.lane.b32.xlu1 %v8264_v57, %s2928_s15  ;;  %v1916_v57 = vpop.permute.xlu0 %1915 }
 0x424   :  { %v1919_v28 = vsel %vm8501_vm6, %v1912_v37, %v1916_v57  ;;  %v1921_v1 = vsel %vm8488_vm1, %v1916_v57, %v1912_v37  ;;  %vm8507_vm6 = vnez %v8335_v43  ;;  %v1875_v37 = vsel %vm8353_vm15, %v1873_v9, 0.0  ;;  %v8512_v9 = vld [vmem:[#allocation73_spill] sm:$0xff] }
 0x425   :  { %v1852_v21 = vsel %vm8507_vm6, %v1847_v32, 0.0  ;;  %v1923_v16 = vsel %vm8490_vm10, %v1919_v28, 0.0  ;;  %v1924_v31 = vsel %vm8491_vm13, %v1921_v1, 0.0  ;;  %vm8508_vm1 = vcmp.lt.s32.totalorder %v3830_v3, 127  ;;  %v8511_v28 = vld [vmem:[#allocation96_spill] sm:$0xff] }
 0x426   :  { %v1895_v56 = vsel %vm8508_vm1, %v1888_v48, %v1892_v14  ;;  %vm8509_vm14 = vmmov %vm8508_vm1  ;;  %v1855_v32 = vmul.f32 %v1851_v27, %v8510_v35  ;;  %v1856_v53 = vmul.f32 %v1852_v21, %v8510_v35  ;;  %v1927_v1 = vmul.f32 %v1923_v16, %v8511_v28 }
 0x427   :  { %1963 = vrot.lane.b32.xlu1 %v8283_v6, %s2928_s15  ;;  %v1918_v6 = vpop.permute.xlu0 %1917  ;;  %v1897_v43 = vsel %vm8509_vm14, %v1892_v14, %v1888_v48  ;;  %v1928_v48 = vmul.f32 %v1924_v31, %v8511_v28  ;;  %v1879_v36 = vmul.f32 %v1875_v37, %v8512_v9  ;;  %vm8513_vm15 = vnez %v8360_v23 }
 0x428   :  { %v1920_v22 = vsel %vm8504_vm0, %v1914_v45, %v1918_v6  ;;  %v1922_v12 = vsel %vm8505_vm2, %v1918_v6, %v1914_v45  ;;  %v6655_v6 = vld [vmem:[%s6935_s10] sm:$0xff]  ;;  %v1899_v54 = vsel %vm8513_vm15, %v1895_v56, 0.0  ;;  %v1900_v8 = vsel %vm8514_vm8, %v1897_v43, 0.0 }
 0x429   :  { %v1925_v11 = vsel %vm8490_vm10, %v1920_v22, 0.0  ;;  %v1926_v52 = vsel %vm8491_vm13, %v1922_v12, 0.0  ;;  %vm8515_vm10 = vcmask 64512   ;;  %v8516_v12 = vld [vmem:[#allocation140_spill] sm:$0xff]  ;;  %vm8517_vm13 = vcmp.lt.s32.totalorder %v3830_v3, 112 }
 0x42a   :  { %v1929_v27 = vmul.f32 %v1925_v11, %v8516_v12  ;;  %v1930_v21 = vmul.f32 %v1926_v52, %v8516_v12  ;;  %vm8518_vm7 = vmmov %vm8517_vm13  ;;  %v8519_v37 = vmov 0   ;;  %v1859_v23 = vadd.f32 %v1855_v32, %v6533_v7  ;;  %v8522_v7 = vld [vmem:[#allocation84_spill] sm:$0xff] }
 0x42b   :  { %2503 = vrot.lane.b32.xlu1 %v7772_v44, %s2935_s17  ;;  %v6592_v4 = vpop.permute.xlu0 %2455  ;;  %v1860_v49 = vadd.f32 %v1856_v53, %v6535_v29  ;;  %vm8520_vm0 = vcmp.lt.s32.totalorder %v3830_v3, 98  ;;  %v1903_v29 = vmul.f32 %v1899_v54, %v8522_v7  ;;  %vm8525_vm1 = vcmp.lt.s32.totalorder %v3830_v3, 111  ;;  %vm8528_vm15 = vmmov %vm8518_vm7 }
 0x42c   :  { %vm8521_vm2 = vmmov %vm8520_vm0  ;;  %v1883_v35 = vadd.f32 %v1879_v36, %v1859_v23 }
 0x42d   :  { %vm8523_vm5 = vmmov %vm8520_vm0 }
 0x42e   :  { %vm8524_vm6 = vmmov %vm8520_vm0 }
 0x42f   :  { %2507 = vrot.lane.b32.xlu1 %v7791_v59, %s2935_s17  ;;  %v6594_v24 = vpop.permute.xlu0 %2457  ;;  %vm8526_vm14 = vmmov %vm8525_vm1 }
 0x430   :  { %vm8529_vm8 = vmmov %vm8518_vm7 }
 0x433   :  { %2527 = vrot.lane.b32.xlu1 %v7772_v44, %s2936_s18  ;;  %v6596_v26 = vpop.permute.xlu0 %2459 }
 0x434   :  { %v6692_v43 = vsel %vm8520_vm0, %v6592_v4, %v6596_v26  ;;  %vm8535_vm0 = vnez %v7993_v34 }
 0x437   :  { %2531 = vrot.lane.b32.xlu1 %v7791_v59, %s2936_s18  ;;  %v6598_v19 = vpop.permute.xlu0 %2461 }
 0x438   :  { %v2464_v11 = vsel %vm8523_vm5, %v6594_v24, %v6598_v19  ;;  %v2466_v52 = vsel %vm8524_vm6, %v6598_v19, %v6594_v24  ;;  %v1934_v24 = vadd.f32 %v1930_v21, %v6473_v58  ;;  %vm8543_vm6 = vmmov %vm8525_vm1 }
 0x43b   :  { %2551 = vrot.lane.b32.xlu1 %v7772_v44, %s2937_s16  ;;  %v6600_v5 = vpop.permute.xlu0 %1935 }
 0x43f   :  { %2555 = vrot.lane.b32.xlu1 %v7791_v59, %s2937_s16  ;;  %v6602_v51 = vpop.permute.xlu0 %1939 }
 0x440   :  { %v1943_v19 = vsel %vm8528_vm15, %v6600_v5, %v6602_v51 }
 0x443   :  { %v1942_v44 = vpop.permute.xlu0 %1941 }
 0x447   :  { %v6606_v59 = vpop.permute.xlu0 %2479 }
 0x44b   :  { %v6610_v13 = vpop.permute.xlu0 %2481 }
 0x44f   :  { %v6612_v50 = vpop.permute.xlu0 %2485 }
 0x453   :  { %v1962_v20 = vpop.permute.xlu0 %1961 }
 0x457   :  { %v1966_v61 = vpop.permute.xlu0 %1965 }
 0x45b   :  { %v6628_v40 = vpop.permute.xlu0 %2505 }
 0x45f   :  { %v6665_v14 = vpop.permute.xlu0 %2509 }
 0x463   :  { %v6716_v28 = vpop.permute.xlu0 %2529 }
 0x497   :  { %v1630_v57 = vpop.xlane.xlu1 %1629 }
 0x498   :  { %v1632_v45 = vmul.f32 0.00390625, %v1630_v57  ;;  %v1880_v57 = vmul.f32 %v1876_v2, %v8512_v9  ;;  %v8527_v9 = vld [vmem:[#allocation40_spill] sm:$0xff] }
 0x49a   :  { %2753 = vmatpush3.msra.mxu1 %v1632_v45  ;;  %v1904_v45 = vmul.f32 %v1900_v8, %v8522_v7  ;;  %v1884_v32 = vadd.f32 %v1880_v57, %v1860_v49  ;;  %v8532_v57 = vld [vmem:[#allocation93_spill] sm:$0xff] }
 0x49b   :  { %2755 = vmatmul.mubr.msk.f32.vlgmr.msra.gmra.mrb[4].mxu1 %vm8515_vm10, %v6655_v6  ;;  %v1938_v22 = vpop.permute.xlu1 %1937  ;;  %v8539_v7 = vld [vmem:[#allocation61_spill] sm:$0xff] }
 0x49c   :  { %v1944_v16 = vsel %vm8517_vm13, %v1938_v22, %v1942_v44  ;;  %v1946_v31 = vsel %vm8518_vm7, %v1942_v44, %v1938_v22  ;;  %2623 = vmatprep.mubr.bf16.mxu1 %v8519_v37  ;;  %v6698_v44 = vsel %vm8521_vm2, %v6596_v26, %v6592_v4  ;;  %v1968_v4 = vsel %vm8525_vm1, %v1962_v20, %v1966_v61 }
 0x49d   :  { %v1949_v2 = vsel %vm8495_vm11, %v1944_v16, 0.0  ;;  %v1950_v56 = vsel %vm8496_vm12, %v1946_v31, 0.0  ;;  %v1970_v26 = vsel %vm8526_vm14, %v1966_v61, %v1962_v20  ;;  %v1933_v22 = vadd.f32 %v1929_v27, %v6471_v39  ;;  %v8530_v61 = vld [vmem:[#allocation50_spill] sm:$0xff] }
 0x49e   :  { %v1953_v54 = vmul.f32 %v1949_v2, %v8527_v9  ;;  %v1954_v8 = vmul.f32 %v1950_v56, %v8527_v9  ;;  %v1945_v20 = vsel %vm8529_vm8, %v6602_v51, %v6600_v5  ;;  %vm8531_vm10 = vnez %v8530_v61  ;;  %v8536_v2 = vld [vmem:[#allocation98_spill] sm:$0xff] }
 0x49f   :  { %v6710_v53 = vpop.permute.xlu1 %2483  ;;  %v2469_v36 = vsel %vm8531_vm10, %v2464_v11, 0.0  ;;  %vm8533_vm13 = vnez %v8532_v57  ;;  %v1907_v16 = vadd.f32 %v1903_v29, %v1883_v35  ;;  %v1908_v39 = vadd.f32 %v1904_v45, %v1884_v32  ;;  %v8540_v35 = vld [vmem:[#allocation108_spill] sm:$0xff] }
 0x4a0   :  { %v2470_v12 = vsel %vm8533_vm13, %v2466_v52, 0.0  ;;  %v2467_v58 = vsel %vm8531_vm10, %v6692_v43, 0.0  ;;  %v2468_v27 = vsel %vm8533_vm13, %v6698_v44, 0.0  ;;  %vm8534_vm7 = vnez %v7990_v25  ;;  %v2534_v52 = vpop.permute.xlu0 %2533 }
 0x4a1   :  { %v1973_v21 = vsel %vm8534_vm7, %v1968_v4, 0.0  ;;  %v1974_v5 = vsel %vm8535_vm0, %v1970_v26, 0.0  ;;  %v1947_v31 = vsel %vm8495_vm11, %v1943_v19, 0.0  ;;  %v1948_v37 = vsel %vm8496_vm12, %v1945_v20, 0.0  ;;  %vm8541_vm11 = vmmov %vm8525_vm1 }
 0x4a2   :  { %v1957_v23 = vadd.f32 %v1953_v54, %v1933_v22  ;;  %v1958_v49 = vadd.f32 %v1954_v8, %v1934_v24  ;;  %v2473_v56 = vmul.f32 %v2469_v36, %v8536_v2  ;;  %v2474_v43 = vmul.f32 %v2470_v12, %v8536_v2  ;;  %vm8542_vm12 = vmmov %vm8525_vm1  ;;  %v8544_v8 = vld [vmem:[#allocation97_spill] sm:$0xff] }
 0x4a3   :  { %v1960_v51 = vpop.permute.xlu1 %1959  ;;  %vm8537_vm2 = vcmp.lt.s32.totalorder %v3830_v3, 97  ;;  %v1977_v29 = vmul.f32 %v1973_v21, %v8539_v7  ;;  %v1978_v18 = vmul.f32 %v1974_v5, %v8539_v7  ;;  %v1931_v45 = vadd.f32 %v1927_v1, %v1907_v16  ;;  %v8546_v24 = vld [vmem:[#allocation105_spill] sm:$0xff] }
 0x4a4   :  { %v2488_v44 = vsel %vm8537_vm2, %v6610_v13, %v6612_v50  ;;  %vm8538_vm5 = vmmov %vm8537_vm2  ;;  %v1932_v11 = vadd.f32 %v1928_v48, %v1908_v39  ;;  %v1951_v32 = vmul.f32 %v1947_v31, %v8540_v35  ;;  %v1952_v4 = vmul.f32 %v1948_v37, %v8540_v35  ;;  %v8548_v36 = vld [vmem:[#allocation121_spill] sm:$0xff]  ;;  %v2554_v31 = vpop.permute.xlu0 %2553 }
 0x4a5   :  { %v2490_v55 = vsel %vm8538_vm5, %v6612_v50, %v6610_v13  ;;  %v2415_v26 = vsel %vm8541_vm11, %v6604_v30, %v6608_v63  ;;  %v2417_v13 = vsel %vm8542_vm12, %v6608_v63, %v6604_v30  ;;  %v1981_v9 = vadd.f32 %v1977_v29, %v1957_v23  ;;  %v8551_v37 = vld [vmem:[#allocation37_spill] sm:$0xff]  ;;  %vm8565_vm11 = vmmov %vm8538_vm5 }
 0x4a6   :  { %v1982_v54 = vadd.f32 %v1978_v18, %v1958_v49  ;;  %vm8545_vm14 = vnez %v8544_v8  ;;  %vm8547_vm15 = vnez %v8546_v24  ;;  %v1955_v63 = vadd.f32 %v1951_v32, %v1931_v45  ;;  %v8553_v18 = vld [vmem:[#allocation103_spill] sm:$0xff] }
 0x4a7   :  { %v1964_v50 = vpop.permute.xlu1 %1963  ;;  %v2493_v22 = vsel %vm8545_vm14, %v2488_v44, 0.0  ;;  %v2494_v19 = vsel %vm8547_vm15, %v2490_v55, 0.0  ;;  %v1956_v61 = vadd.f32 %v1952_v4, %v1932_v11  ;;  %v2419_v16 = vsel %vm8534_vm7, %v2415_v26, 0.0  ;;  %v8552_v55 = vld [vmem:[#allocation110_spill] sm:$0xff] }
 0x4a8   :  { %v1967_v1 = vsel %vm8543_vm6, %v1960_v51, %v1964_v50  ;;  %v1969_v48 = vsel %vm8525_vm1, %v1964_v50, %v1960_v51  ;;  %v2420_v39 = vsel %vm8535_vm0, %v2417_v13, 0.0  ;;  %vm8549_vm8 = vcmp.lt.s32.totalorder %v3830_v3, 110 }
 0x4a9   :  { %v1971_v20 = vsel %vm8534_vm7, %v1967_v1, 0.0  ;;  %v1972_v30 = vsel %vm8535_vm0, %v1969_v48, 0.0  ;;  %v2439_v21 = vsel %vm8549_vm8, %v6614_v62, %v6620_v15  ;;  %vm8550_vm10 = vmmov %vm8549_vm8  ;;  %v1985_v23 = vadd.f32 %v1981_v9, %v8551_v37  ;;  %v8557_v9 = vld [vmem:[#allocation151_spill] sm:$0xff] }
 0x4aa   :  { %v1975_v57 = vmul.f32 %v1971_v20, %v8548_v36  ;;  %v1976_v12 = vmul.f32 %v1972_v30, %v8548_v36  ;;  %v2441_v5 = vsel %vm8550_vm10, %v6620_v15, %v6614_v62  ;;  %v1986_v2 = vadd.f32 %v1982_v54, %v8551_v37  ;;  %v8554_v15 = vld [vmem:[#allocation79_spill] sm:$0xff]  ;;  %v2558_v20 = vpop.permute.xlu0 %2557  ;;  %v8569_v37 = vld [vmem:[#allocation109_spill] sm:$0xff] }
 0x4ab   :  { %v2504_v51 = vpop.permute.xlu1 %2503  ;;  %v2477_v34 = vadd.f32 %v2473_v56, %v6495_v42  ;;  %v2478_v44 = vadd.f32 %v2474_v43, %v6497_v10  ;;  %v2497_v7 = vmul.f32 %v2493_v22, %v8552_v55  ;;  %v2498_v29 = vmul.f32 %v2494_v19, %v8552_v55  ;;  %v8558_v19 = vld [vmem:[#allocation59_spill] sm:$0xff] }
 0x4ac   :  { %v1979_v49 = vadd.f32 %v1975_v57, %v1955_v63  ;;  %v1980_v25 = vadd.f32 %v1976_v12, %v1956_v61  ;;  %v2423_v45 = vmul.f32 %v2419_v16, %v8553_v18  ;;  %v2424_v62 = vmul.f32 %v2420_v39, %v8553_v18  ;;  %v8577_v18 = vld [vmem:[#allocation116_spill] sm:$0xff] }
 0x4ad   :  { %vm8555_vm13 = vcmp.lt.s32.totalorder %v3830_v3, 96  ;;  %v2443_v10 = vsel %vm8471_vm9, %v2439_v21, 0.0  ;;  %v2444_v56 = vsel %vm8473_vm3, %v2441_v5, 0.0  ;;  %v1990_v13 = vmax.f32 %v1986_v2, 0.0 }
 0x4ae   :  { %v1983_v11 = vadd.f32 %v1979_v49, %v8554_v15  ;;  %v1984_v35 = vadd.f32 %v1980_v25, %v8554_v15  ;;  %v2512_v32 = vsel %vm8555_vm13, %v6628_v40, %v6665_v14  ;;  %vm8556_vm7 = vmmov %vm8555_vm13  ;;  %v1989_v50 = vmax.f32 %v1985_v23, 0.0  ;;  %v8571_v49 = vld [vmem:[#allocation107_spill] sm:$0xff] }
 0x4af   :  { %v2514_v42 = vsel %vm8556_vm7, %v6665_v14, %v6628_v40  ;;  %v2508_v43 = vpop.permute.xlu1 %2507  ;;  %v2471_v54 = vmul.f32 %v2467_v58, %v8557_v9  ;;  %v2472_v1 = vmul.f32 %v2468_v27, %v8557_v9  ;;  %v2501_v48 = vadd.f32 %v2497_v7, %v2477_v34  ;;  %v8560_v14 = vld [vmem:[#allocation111_spill] sm:$0xff]  ;;  %v8564_v27 = vld [vmem:[#allocation117_spill] sm:$0xff]  ;;  %vm8573_vm10 = vmmov %vm8556_vm7 }
 0x4b0   :  { %v1987_v4 = vmax.f32 %v1983_v11, 0.0  ;;  %v1988_v26 = vmax.f32 %v1984_v35, 0.0  ;;  %v2502_v22 = vadd.f32 %v2498_v29, %v2478_v44  ;;  %vm8559_vm0 = vnez %v8558_v19  ;;  %vm8574_vm13 = vmmov %vm8556_vm7  ;;  %v8575_v7 = vld [vmem:[#allocation118_spill] sm:$0xff]  ;;  %v8580_v15 = vld [vmem:[#allocation39_spill] sm:$0xff] }
 0x4b1   :  { %v2517_v40 = vsel %vm8559_vm0, %v2512_v32, 0.0  ;;  %vm8561_vm2 = vnez %v8560_v14  ;;  %vm8562_vm9 = vcmp.lt.s32.totalorder %v3830_v3, 95  ;;  %v2447_v61 = vmul.f32 %v2443_v10, %v8564_v27  ;;  %v8581_v10 = vld [vmem:[#allocation54_spill] sm:$0xff] }
 0x4b2   :  { %v2518_v46 = vsel %vm8561_vm2, %v2514_v42, 0.0  ;;  %v1992_v33 = vpack.c.bf16 %v1990_v13, %v1988_v26  ;;  %v1991_v30 = vpack.c.bf16 %v1989_v50, %v1987_v4  ;;  %v2536_v63 = vsel %vm8562_vm9, %v6716_v28, %v2534_v52  ;;  %vm8563_vm3 = vmmov %vm8562_vm9  ;;  %v8582_v4 = vld [vmem:[#allocation119_spill] sm:$0xff] }
 0x4b3   :  { %v2538_v58 = vsel %vm8563_vm3, %v2534_v52, %v6716_v28  ;;  %v2448_v36 = vmul.f32 %v2444_v56, %v8564_v27  ;;  %v2528_v57 = vpop.permute.xlu1 %2527  ;;  %v2427_v12 = vadd.f32 %v2423_v45, %v6557_v47  ;;  %v2428_v16 = vadd.f32 %v2424_v62, %v6559_v0  ;;  %v8566_v28 = vld [vmem:[#allocation123_spill] sm:$0xff] }
 0x4b4   :  { %v2487_v39 = vsel %vm8538_vm5, %v6606_v59, %v6710_v53  ;;  %v2489_v21 = vsel %vm8565_vm11, %v6710_v53, %v6606_v59  ;;  %2591 = vmatprep.subr.bf16.mxu1 %v1992_v33  ;;  %v2521_v52 = vmul.f32 %v2517_v40, %v8566_v28  ;;  %v2522_v5 = vmul.f32 %v2518_v46, %v8566_v28  ;;  %vm8579_vm5 = vmmov %vm8563_vm3  ;;  %v8583_v46 = vld [vmem:[#allocation134_spill] sm:$0xff] }
 0x4b5   :  { %vm8567_vm12 = vcmp.lt.s32.totalorder %v3830_v3, 94  ;;  %2592 = vmatpush1.bf16.msra.mxu1 %v1991_v30  ;;  %vm8570_vm1 = vnez %v8569_v37  ;;  %vm8572_vm8 = vnez %v8571_v49  ;;  %v2511_v59 = vsel %vm8573_vm10, %v2504_v51, %v2508_v43  ;;  %v8589_v3 = vld [vmem:[#allocation133_spill] sm:$0xff] }
 0x4b6   :  { %v2560_v47 = vsel %vm8567_vm12, %v2554_v31, %v2558_v20  ;;  %vm8568_vm6 = vmmov %vm8567_vm12  ;;  %v2541_v23 = vsel %vm8570_vm1, %v2536_v63, 0.0  ;;  %v2542_v25 = vsel %vm8572_vm8, %v2538_v58, 0.0  ;;  %v2513_v53 = vsel %vm8574_vm13, %v2508_v43, %v2504_v51  ;;  %v8584_v58 = vld [vmem:[#allocation146_spill] sm:$0xff] }
 0x4b7   :  { %v2562_v0 = vsel %vm8568_vm6, %v2558_v20, %v2554_v31  ;;  %v2451_v2 = vadd.f32 %v2447_v61, %v2427_v12  ;;  %v2452_v34 = vadd.f32 %v2448_v36, %v2428_v16  ;;  %v2491_v44 = vsel %vm8545_vm14, %v2487_v39, 0.0  ;;  %v2532_v55 = vpop.permute.xlu1 %2531  ;;  %vm8585_vm14 = vmmov %vm8568_vm6 }
 0x4b8   :  { %v2492_v31 = vsel %vm8547_vm15, %v2489_v21, 0.0  ;;  %vm8576_vm7 = vnez %v8575_v7  ;;  %vm8578_vm9 = vnez %v8577_v18  ;;  %v2535_v62 = vsel %vm8563_vm3, %v2528_v57, %v2532_v55  ;;  %vm8586_vm15 = vmmov %vm8568_vm6 }
 0x4b9   :  { %v2565_v29 = vsel %vm8576_vm7, %v2560_v47, 0.0  ;;  %v2566_v45 = vsel %vm8578_vm9, %v2562_v0, 0.0  ;;  %v2537_v51 = vsel %vm8579_vm5, %v2532_v55, %v2528_v57  ;;  %v2545_v11 = vmul.f32 %v2541_v23, %v8580_v15  ;;  %v8587_v47 = vld [vmem:[#allocation104_spill] sm:$0xff]  ;;  %v8588_v23 = vld [vmem:[#allocation122_spill] sm:$0xff] }
 0x4ba   :  { %v2546_v8 = vmul.f32 %v2542_v25, %v8580_v15  ;;  %v2515_v24 = vsel %vm8559_vm0, %v2511_v59, 0.0  ;;  %v2516_v35 = vsel %vm8561_vm2, %v2513_v53, 0.0  ;;  %v2525_v32 = vadd.f32 %v2521_v52, %v2501_v48 }
 0x4bb   :  { %v2526_v42 = vadd.f32 %v2522_v5, %v2502_v22  ;;  %v2495_v56 = vmul.f32 %v2491_v44, %v8581_v10  ;;  %v2496_v43 = vmul.f32 %v2492_v31, %v8581_v10  ;;  %v2569_v26 = vmul.f32 %v2565_v29, %v8582_v4  ;;  %v2552_v19 = vpop.permute.xlu1 %2551 }
 0x4bc   :  { %v2570_v13 = vmul.f32 %v2566_v45, %v8582_v4  ;;  %v2539_v50 = vsel %vm8570_vm1, %v2535_v62, 0.0  ;;  %v2540_v9 = vsel %vm8572_vm8, %v2537_v51, 0.0  ;;  %v2475_v40 = vadd.f32 %v2471_v54, %v2451_v2  ;;  %v2889_v45 = vld [vmem:[%s6934_s8] sm:$0xf] }
 0x4bd   :  { %v2476_v14 = vadd.f32 %v2472_v1, %v2452_v34  ;;  %v2519_v48 = vmul.f32 %v2515_v24, %v8583_v46  ;;  %v2520_v22 = vmul.f32 %v2516_v35, %v8583_v46  ;;  %v2549_v20 = vadd.f32 %v2545_v11, %v2525_v32 }
 0x4be   :  { %v2550_v33 = vadd.f32 %v2546_v8, %v2526_v42  ;;  %v2499_v30 = vadd.f32 %v2495_v56, %v2475_v40  ;;  %v2543_v27 = vmul.f32 %v2539_v50, %v8584_v58  ;;  %v2544_v61 = vmul.f32 %v2540_v9, %v8584_v58 }
 0x4bf   :  { %v2500_v63 = vadd.f32 %v2496_v43, %v2476_v14  ;;  %v2573_v36 = vadd.f32 %v2569_v26, %v2549_v20  ;;  %v2556_v12 = vpop.permute.xlu1 %2555  ;;  %vm8590_vm0 = vcmask 261120  }
 0x4c0   :  { %v2574_v57 = vadd.f32 %v2570_v13, %v2550_v33  ;;  %v2523_v16 = vadd.f32 %v2519_v48, %v2499_v30  ;;  %v2559_v54 = vsel %vm8585_vm14, %v2552_v19, %v2556_v12  ;;  %v2561_v1 = vsel %vm8586_vm15, %v2556_v12, %v2552_v19 }
 0x4c1   :  { %v2524_v39 = vadd.f32 %v2520_v22, %v2500_v63  ;;  %v2563_v21 = vsel %vm8576_vm7, %v2559_v54, 0.0  ;;  %v2564_v28 = vsel %vm8578_vm9, %v2561_v1, 0.0  ;;  %v2577_v49 = vadd.f32 %v2573_v36, %v8588_v23 }
 0x4c2   :  { %v2547_v52 = vadd.f32 %v2543_v27, %v2523_v16  ;;  %v2567_v0 = vmul.f32 %v2563_v21, %v8587_v47  ;;  %v2568_v37 = vmul.f32 %v2564_v28, %v8587_v47  ;;  %v2578_v53 = vadd.f32 %v2574_v57, %v8588_v23 }
 0x4c3   :  { %v2548_v5 = vadd.f32 %v2544_v61, %v2524_v39  ;;  %v2581_v44 = vmax.f32 %v2577_v49, 0.0 }
 0x4c4   :  { %v2571_v25 = vadd.f32 %v2567_v0, %v2547_v52  ;;  %v2582_v7 = vmax.f32 %v2578_v53, 0.0 }
 0x4c5   :  { %v2572_v59 = vadd.f32 %v2568_v37, %v2548_v5 }
 0x4c6   :  { %v2575_v2 = vadd.f32 %v2571_v25, %v8589_v3 }
 0x4c7   :  { %v2576_v34 = vadd.f32 %v2572_v59, %v8589_v3 }
 0x4c8   :  { %v2579_v31 = vmax.f32 %v2575_v2, 0.0 }
 0x4c9   :  { %v2580_v55 = vmax.f32 %v2576_v34, 0.0 }
 0x4ca   :  { %v2583_v18 = vpack.c.bf16 %v2581_v44, %v2579_v31 }
 0x4cb   :  { %v2584_v29 = vpack.c.bf16 %v2582_v7, %v2580_v55 }
 0x4cd   :  { %2593 = vmatprep.subr.bf16.mxu1 %v2584_v29 }
 0x4ce   :  { %2594 = vmatpush1.bf16.msra.mxu1 %v2583_v18 }
 0x4cf   :  { %2757 = vmatprep.subr.mxu1 %v2939_v17 }
 0x4d1   :  { %2743 = vmatmul.mubr.msk.bf16.vlgmr.msra.gmra.mrb[8].mxu1 %vm8590_vm0, %v2889_v45 }
 0x4d2   :  { %2759 = vmatprep.mubr.msk.f32.mxu1 %vm2940_vm4, %v2939_v17  ;;  %vm8591_vm4 = vcmask 64512  }
 0x56e   :  { %v1702_v62 = vpop.f32.mrb[4].mxu1 }
 0x56f   :  { %v2736_v51 = vmul.f32 -1.442695, %v1702_v62  ;;  %v2756_v15 = vpop.f32.mrb[5].mxu1 }
 0x571   :  { %2880 = vpow2.f32 %v2736_v51 }
 0x57b   :  { %v2881_v11 = vpop.eup %2880 }
 0x57c   :  { %v1709_v8 = vadd.f32 1.0, %v2881_v11 }
 0x57e   :  { %2882 = vrcp.f32 %v1709_v8 }
 0x588   :  { %v2883_v24 = vpop.eup %2882 }
 0x589   :  { %1714 = vperm.xlu0 %2869, %v2883_v24  }
 0x5a4   :  { %v2625_v35 = vpop.f32.mrb[8].mxu1 }
 0x5a5   :  { %v2626_v32 = vadd.f32 %v2625_v35, %v8498_v38  ;;  %v2627_v42 = vpop.f32.mrb[9].mxu1 }
 0x5a6   :  { %v2628_v10 = vadd.f32 %v2627_v42, %v8498_v38  ;;  %v2629_v56 = vpop.f32.mrb[10].mxu1 }
 0x5a7   :  { %v2630_v43 = vpop.f32.mrb[11].mxu1 }
 0x5a8   :  { %v2632_v4 = vadd.f32 %v2628_v10, %v2626_v32 }
 0x5aa   :  { %2633 = vadd.xlane.f32.xlu1 %v2632_v4 }
 0x608   :  { %v1715_v17 = vpop.permute.xlu0 %1714 }
 0x609   :  { %v1717_v26 = vmul.f32 %v1715_v17, %v6562_v60  ;;  %v1718_v13 = vmul.f32 %v1715_v17, %v6565_v41 }
 0x60b   :  { %1719 = vst [vmem:[%s6936_s11] sm:$0xff] %v1717_v26  ;;  %1720 = vst [vmem:[%s6936_s11 + $0x8] sm:$0xff] %v1718_v13 }
 0x637   :  { %v2634_v50 = vpop.xlane.xlu1 %2633 }
 0x638   :  { %v2635_v9 = vmul.f32 0.00390625, %v2634_v50 }
 0x63a   :  { %2758 = vmatpush3.msra.mxu1 %v2635_v9 }
 0x63b   :  { %2760 = vmatmul.mubr.msk.f32.vlgmr.msra.gmra.mrb[6].mxu1 %vm8591_vm4, %v6655_v6 }
 0x70e   :  { %v2702_v38 = vpop.f32.mrb[6].mxu1 }
 0x70f   :  { %v2745_v19 = vmul.f32 -1.442695, %v2702_v38  ;;  %v2761_v40 = vpop.f32.mrb[7].mxu1 }
 0x711   :  { %2884 = vpow2.f32 %v2745_v19 }
 0x71b   :  { %v2885_v60 = vpop.eup %2884 }
 0x71c   :  { %v2709_v41 = vadd.f32 1.0, %v2885_v60 }
 0x71e   :  { %2886 = vrcp.f32 %v2709_v41 }
 0x728   :  { %v2887_v14 = vpop.eup %2886 }
 0x729   :  { %2714 = vperm.xlu0 %2869, %v2887_v14  }
 0x7a8   :  { %v2715_v46 = vpop.permute.xlu0 %2714 }
 0x7a9   :  { %v2717_v48 = vmul.f32 %v2715_v46, %v2626_v32  ;;  %v2718_v22 = vmul.f32 %v2715_v46, %v2628_v10 }
 0x7ab   :  { %2746 = vst [vmem:[%s6936_s11 + $0x10] sm:$0xff] %v2717_v48  ;;  %2747 = vst [vmem:[%s6936_s11 + $0x18] sm:$0xff] %v2718_v22 }

</bundles_post_ra>
